<compile_context>
chip_gen: v7x
topology: tpu7x:2x2x1
jax: 0.10.0
libtpu: 0.0.40
codegen_flags: <defaults>
</compile_context>

<pallas_src>
import jax
import jax.numpy as jnp
from jax import lax
from jax.experimental import pallas as pl
from jax.experimental.pallas import tpu as pltpu


# Static network dimensions (MNIST / Fashion-MNIST Net).
_IMG = 28              # input spatial size
_K = 5                 # conv kernel size
_C1 = 10               # conv1 out channels
_C2 = 20               # conv2 out channels
_CONV1_OUT = _IMG - _K + 1        # 24
_H1 = _CONV1_OUT // 2             # 12  (conv1 pooled spatial size)
_CONV2_OUT = _H1 - _K + 1         # 8
_H2 = _CONV2_OUT // 2             # 4   (conv2 pooled spatial size)
_FLAT = _H2 * _H2 * _C2           # 320
_FC1 = 50
_NCLS = 10


# ----------------------------------------------------------------------------
# Single fused kernel: the whole forward pass.
#   p1_ref : (4*B*144, 25)  pool-grouped im2col of the input (rows: g, b, hp, wp)
#   w1_ref : (25, 10)       conv1 weight, b1_ref: (1, 10)
#   w2_ref : (250, 20)      conv2 weight (rows ordered (dy, dx, cin)), b2t_ref: (1, 320)
#   wf1_ref: (320, 50)      fc1 weight permuted to NHWC-flat order, bf1_ref: (1, 50)
#   wf2_ref: (50, 10), bf2_ref: (1, 10)
#   o_ref  : (B, 10)        log-probabilities
# ----------------------------------------------------------------------------
def _make_fused_kernel(batch):
    rows_per_group = batch * _H1 * _H1        # 288 for batch=2

    def kernel(p1_ref, w1_ref, b1_ref, w2_ref, b2t_ref,
               wf1_ref, bf1_ref, wf2_ref, bf2_ref, o_ref):
        P = rows_per_group

        # ---- conv1: ONE matmul over all 4 pool positions, then pool-max ----
        r = jnp.dot(p1_ref[...], w1_ref[...], preferred_element_type=jnp.float32)
        m = jnp.maximum(jnp.maximum(r[0:P], r[P:2 * P]),
                        jnp.maximum(r[2 * P:3 * P], r[3 * P:4 * P]))
        # per-channel bias commutes with maxpool; relu afterwards
        a1 = jnp.maximum(m + b1_ref[...], 0.0)     # (B*144, 10); row = (b*12+hp)*12+wp

        # ---- conv2: in-kernel im2col (static slices + lane concat) ----
        # row_slabs[b][rr]: (8, 5*C1) features for dx=0..4 of a1 row (b, rr)
        row_slabs = []
        for b in range(batch):
            slabs = []
            for rr in range(_H1):
                base = (b * _H1 + rr) * _H1
                slabs.append(jnp.concatenate(
                    [a1[base + dx: base + dx + _CONV2_OUT, :] for dx in range(_K)],
                    axis=-1))                                   # (8, 50)
            row_slabs.append(slabs)

        # one big (B*64, 250) patch matrix; blocks are 8-row aligned
        patches = []
        for b in range(batch):
            for h2 in range(_CONV2_OUT):
                patches.append(jnp.concatenate(
                    [row_slabs[b][h2 + dy] for dy in range(_K)], axis=-1))  # (8, 250)
        patch_mat = jnp.concatenate(patches, axis=0)            # (B*64, 250)

        # ---- conv2: ONE matmul instead of 16 tiny ones ----
        c2_all = jnp.dot(patch_mat, w2_ref[...],
                         preferred_element_type=jnp.float32)    # (B*64, 20)

        # ---- 2x2 maxpool + NHWC flatten (fc1 weight is pre-permuted to match) ----
        flat_rows = []
        for b in range(batch):
            pieces = []
            for hp in range(_H2):
                ra = (b * _CONV2_OUT + 2 * hp) * _CONV2_OUT       # 8-row aligned
                rb = (b * _CONV2_OUT + 2 * hp + 1) * _CONV2_OUT   # 8-row aligned
                hm = jnp.maximum(c2_all[ra:ra + _CONV2_OUT, :],
                                 c2_all[rb:rb + _CONV2_OUT, :])   # (8, 20)
                for wp in range(_H2):
                    pieces.append(jnp.maximum(hm[2 * wp:2 * wp + 1, :],
                                              hm[2 * wp + 1:2 * wp + 2, :]))  # (1, 20)
            flat_rows.append(jnp.concatenate(pieces, axis=-1))              # (1, 320)
        flat = jnp.concatenate(flat_rows, axis=0) if batch > 1 else flat_rows[0]
        # conv2 bias (pre-tiled to flat layout) + relu
        flat = jnp.maximum(flat + b2t_ref[...], 0.0)                        # (B, 320)
        # TODO(synk): dropout layers are eval-mode identity here.

        # ---- fc1 + relu -> fc2 -> log_softmax ----
        h = jnp.dot(flat, wf1_ref[...], preferred_element_type=jnp.float32) + bf1_ref[...]
        h = jnp.maximum(h, 0.0)
        logits = jnp.dot(h, wf2_ref[...], preferred_element_type=jnp.float32) + bf2_ref[...]
        mx = jnp.max(logits, axis=-1, keepdims=True)
        lse = jnp.log(jnp.sum(jnp.exp(logits - mx), axis=-1, keepdims=True)) + mx
        o_ref[...] = logits - lse

    return kernel


def _full_block(shape):
    return pl.BlockSpec(shape, lambda *_: (0,) * len(shape))


def fused_net(p1, prep, batch):
    (w1, b1, w2, b2t, wf1, bf1, wf2, bf2) = prep
    ins = (p1, w1, b1, w2, b2t, wf1, bf1, wf2, bf2)
    return pl.pallas_call(
        _make_fused_kernel(batch),
        out_shape=jax.ShapeDtypeStruct((batch, _NCLS), jnp.float32),
        grid=(1,),
        in_specs=[_full_block(a.shape) for a in ins],
        out_specs=_full_block((batch, _NCLS)),
        compiler_params=pltpu.CompilerParams(
            dimension_semantics=("arbitrary",)),
    )(*ins)


# ----------------------------------------------------------------------------
# Per-call JAX glue: pool-grouped im2col of the raw input (one XLA gather).
# Row layout: group g=(a,b2) major, then (b, hp, wp); column order (dy, dx).
# ----------------------------------------------------------------------------
def _conv1_pool_patches(x_img):
    B = x_img.shape[0]
    ho = _CONV1_OUT
    cols = [x_img[:, dy:dy + ho, dx:dx + ho]
            for dy in range(_K) for dx in range(_K)]
    pat = jnp.stack(cols, axis=-1)                       # (B, 24, 24, 25)
    groups = []
    for a in range(2):
        for b2 in range(2):
            g = pat[:, a::2, b2::2, :]                   # (B, 12, 12, 25)
            groups.append(g.reshape(B * _H1 * _H1, _K * _K))
    return jnp.concatenate(groups, axis=0)               # (4*B*144, 25)


def net_forward(x_nchw, prep):
    B = x_nchw.shape[0]
    p1 = _conv1_pool_patches(x_nchw[:, 0])
    return fused_net(p1, prep, B)                         # (B, 10) log-probs


# ----------------------------------------------------------------------------
# One-time parameter preprocessing (outside the jitted hot path).
# ----------------------------------------------------------------------------
def preprocess_params(params):
    w1c, b1c, w2c, b2c, w1f, b1f, w2f, b2f = params
    w1 = w1c.reshape(_C1, _K * _K).T                                    # (25, 10)
    b1 = b1c.reshape(1, _C1)
    w2 = jnp.transpose(w2c, (2, 3, 1, 0)).reshape(_K * _K * _C1, _C2)   # (250, 20), rows (dy,dx,cin)
    b2t = jnp.tile(b2c, _H2 * _H2).reshape(1, _FLAT)                    # (1, 320)
    # fc1 consumes the NHWC (hp, wp, c) flatten directly -> no NCHW transpose at runtime
    wf1 = jnp.transpose(w1f.reshape(_FC1, _C2, _H2, _H2),
                        (2, 3, 1, 0)).reshape(_FLAT, _FC1)              # (320, 50)
    bf1 = b1f.reshape(1, _FC1)
    wf2 = w2f.T                                                         # (50, 10)
    bf2 = b2f.reshape(1, _NCLS)
    return (w1, b1, w2, b2t, wf1, bf1, wf2, bf2)


# ----------------------------------------------------------------------------
# Pure-JAX reference (PyTorch semantics) for a sanity check.
# ----------------------------------------------------------------------------
def reference_forward(x, params):
    w1c, b1c, w2c, b2c, w1f, b1f, w2f, b2f = params

    def conv(v, w, b):
        y = lax.conv_general_dilated(v, w, (1, 1), 'VALID',
                                     dimension_numbers=('NCHW', 'OIHW', 'NCHW'))
        return y + b.reshape(1, -1, 1, 1)

    def pool2(v):
        return lax.reduce_window(v, -jnp.inf, lax.max,
                                 (1, 1, 2, 2), (1, 1, 2, 2), 'VALID')

    a = jax.nn.relu(pool2(conv(x, w1c, b1c)))
    a = jax.nn.relu(pool2(conv(a, w2c, b2c)))
    a = a.reshape(a.shape[0], -1)                       # NCHW view(-1, 320)
    h = jax.nn.relu(a @ w1f.T + b1f)
    logits = h @ w2f.T + b2f
    return jax.nn.log_softmax(logits, axis=-1)


def init_params():
    key = jax.random.PRNGKey(0)
    ks = jax.random.split(key, 8)
    scale = 0.1
    w1c = scale * jax.random.normal(ks[0], (10, 1, 5, 5), jnp.float32)
    b1c = scale * jax.random.normal(ks[1], (10,), jnp.float32)
    w2c = scale * jax.random.normal(ks[2], (20, 10, 5, 5), jnp.float32)
    b2c = scale * jax.random.normal(ks[3], (20,), jnp.float32)
    w1f = scale * jax.random.normal(ks[4], (50, 320), jnp.float32)
    b1f = scale * jax.random.normal(ks[5], (50,), jnp.float32)
    w2f = scale * jax.random.normal(ks[6], (10, 50), jnp.float32)
    b2f = scale * jax.random.normal(ks[7], (10,), jnp.float32)
    return (w1c, b1c, w2c, b2c, w1f, b1f, w2f, b2f)


if __name__ == "__main__":
    params = init_params()
    prep = preprocess_params(params)        # one-time, outside the hot path
    x = jax.random.normal(jax.random.PRNGKey(0), (2, 1, 28, 28), jnp.float32)

    fwd = jax.jit(net_forward)
    out = jax.block_until_ready(fwd(x, prep))

    assert out.shape == (2, 10)
    assert bool(jnp.all(jnp.isfinite(out)))
    # log_softmax rows must exponentiate to a probability distribution
    assert bool(jnp.allclose(jnp.sum(jnp.exp(out), axis=1), 1.0, atol=1e-4))
    # match the PyTorch-semantics reference (MXU vs XLA-conv precision slack)
    ref = reference_forward(x, params)
    assert bool(jnp.allclose(out, ref, atol=5e-2)), (out, ref)
    print("KERNEL_OK")
</pallas_src>

<mosaic_0001>
module attributes {stable_mosaic.version = 11 : i64} {
  func.func @kernel(%arg0: i32, %arg1: memref<1152x25xf32, #tpu.memory_space<vmem>>, %arg2: memref<25x10xf32, #tpu.memory_space<vmem>>, %arg3: memref<1x10xf32, #tpu.memory_space<vmem>>, %arg4: memref<250x20xf32, #tpu.memory_space<vmem>>, %arg5: memref<1x320xf32, #tpu.memory_space<vmem>>, %arg6: memref<320x50xf32, #tpu.memory_space<vmem>>, %arg7: memref<1x50xf32, #tpu.memory_space<vmem>>, %arg8: memref<50x10xf32, #tpu.memory_space<vmem>>, %arg9: memref<1x10xf32, #tpu.memory_space<vmem>>, %arg10: memref<2x10xf32, #tpu.memory_space<vmem>>) attributes {dimension_semantics = [#tpu.dimension_semantics<arbitrary>], iteration_bounds = array<i64: 1>, scalar_prefetch = 0 : i64, scratch_operands = 0 : i64, tpu.core_type = #tpu.core_type<tc>, window_params = [{pipeline_mode = #tpu.pipeline_mode<synchronous>, transform_indices = @transform_0, window_bounds = array<i64: 1152, 25>}, {pipeline_mode = #tpu.pipeline_mode<synchronous>, transform_indices = @transform_1, window_bounds = array<i64: 25, 10>}, {pipeline_mode = #tpu.pipeline_mode<synchronous>, transform_indices = @transform_2, window_bounds = array<i64: 1, 10>}, {pipeline_mode = #tpu.pipeline_mode<synchronous>, transform_indices = @transform_3, window_bounds = array<i64: 250, 20>}, {pipeline_mode = #tpu.pipeline_mode<synchronous>, transform_indices = @transform_4, window_bounds = array<i64: 1, 320>}, {pipeline_mode = #tpu.pipeline_mode<synchronous>, transform_indices = @transform_5, window_bounds = array<i64: 320, 50>}, {pipeline_mode = #tpu.pipeline_mode<synchronous>, transform_indices = @transform_6, window_bounds = array<i64: 1, 50>}, {pipeline_mode = #tpu.pipeline_mode<synchronous>, transform_indices = @transform_7, window_bounds = array<i64: 50, 10>}, {pipeline_mode = #tpu.pipeline_mode<synchronous>, transform_indices = @transform_8, window_bounds = array<i64: 1, 10>}, {pipeline_mode = #tpu.pipeline_mode<synchronous>, transform_indices = @transform_9, window_bounds = array<i64: 2, 10>}]} {
    %c0 = arith.constant 0 : index
    %c0_0 = arith.constant 0 : index
    %0 = vector.load %arg1[%c0, %c0_0] : memref<1152x25xf32, #tpu.memory_space<vmem>>, vector<1152x25xf32>
    %c0_1 = arith.constant 0 : index
    %c0_2 = arith.constant 0 : index
    %1 = vector.load %arg2[%c0_1, %c0_2] : memref<25x10xf32, #tpu.memory_space<vmem>>, vector<25x10xf32>
    %cst = arith.constant dense<0.000000e+00> : vector<1152x10xf32>
    %2 = tpu.matmul %0, %1, %cst {dimension_numbers = #tpu.dot_dimension_numbers<[1], [0], [0], [1], [0, 0, 1, 1], [], []>} : vector<1152x25xf32>, vector<25x10xf32>, vector<1152x10xf32> -> vector<1152x10xf32>
    %3 = vector.extract_strided_slice %2 {offsets = [0, 0], sizes = [288, 10], strides = [1, 1]} : vector<1152x10xf32> to vector<288x10xf32>
    %4 = vector.extract_strided_slice %2 {offsets = [288, 0], sizes = [288, 10], strides = [1, 1]} : vector<1152x10xf32> to vector<288x10xf32>
    %5 = arith.maximumf %3, %4 : vector<288x10xf32>
    %6 = vector.extract_strided_slice %2 {offsets = [576, 0], sizes = [288, 10], strides = [1, 1]} : vector<1152x10xf32> to vector<288x10xf32>
    %7 = vector.extract_strided_slice %2 {offsets = [864, 0], sizes = [288, 10], strides = [1, 1]} : vector<1152x10xf32> to vector<288x10xf32>
    %8 = arith.maximumf %6, %7 : vector<288x10xf32>
    %9 = arith.maximumf %5, %8 : vector<288x10xf32>
    %c0_3 = arith.constant 0 : index
    %c0_4 = arith.constant 0 : index
    %10 = vector.load %arg3[%c0_3, %c0_4] : memref<1x10xf32, #tpu.memory_space<vmem>>, vector<1x10xf32>
    %11 = vector.broadcast %10 : vector<1x10xf32> to vector<288x10xf32>
    %12 = arith.addf %9, %11 : vector<288x10xf32>
    %cst_5 = arith.constant 0.000000e+00 : f32
    %13 = vector.broadcast %cst_5 : f32 to vector<288x10xf32>
    %14 = arith.maximumf %12, %13 : vector<288x10xf32>
    %15 = vector.extract_strided_slice %14 {offsets = [0, 0], sizes = [8, 10], strides = [1, 1]} : vector<288x10xf32> to vector<8x10xf32>
    %16 = vector.extract_strided_slice %14 {offsets = [1, 0], sizes = [8, 10], strides = [1, 1]} : vector<288x10xf32> to vector<8x10xf32>
    %17 = vector.extract_strided_slice %14 {offsets = [2, 0], sizes = [8, 10], strides = [1, 1]} : vector<288x10xf32> to vector<8x10xf32>
    %18 = vector.extract_strided_slice %14 {offsets = [3, 0], sizes = [8, 10], strides = [1, 1]} : vector<288x10xf32> to vector<8x10xf32>
    %19 = vector.extract_strided_slice %14 {offsets = [4, 0], sizes = [8, 10], strides = [1, 1]} : vector<288x10xf32> to vector<8x10xf32>
    %20 = tpu.concatenate %15, %16, %17, %18, %19 in 1 : vector<8x10xf32>, vector<8x10xf32>, vector<8x10xf32>, vector<8x10xf32>, vector<8x10xf32> -> vector<8x50xf32>
    %21 = vector.extract_strided_slice %14 {offsets = [12, 0], sizes = [8, 10], strides = [1, 1]} : vector<288x10xf32> to vector<8x10xf32>
    %22 = vector.extract_strided_slice %14 {offsets = [13, 0], sizes = [8, 10], strides = [1, 1]} : vector<288x10xf32> to vector<8x10xf32>
    %23 = vector.extract_strided_slice %14 {offsets = [14, 0], sizes = [8, 10], strides = [1, 1]} : vector<288x10xf32> to vector<8x10xf32>
    %24 = vector.extract_strided_slice %14 {offsets = [15, 0], sizes = [8, 10], strides = [1, 1]} : vector<288x10xf32> to vector<8x10xf32>
    %25 = vector.extract_strided_slice %14 {offsets = [16, 0], sizes = [8, 10], strides = [1, 1]} : vector<288x10xf32> to vector<8x10xf32>
    %26 = tpu.concatenate %21, %22, %23, %24, %25 in 1 : vector<8x10xf32>, vector<8x10xf32>, vector<8x10xf32>, vector<8x10xf32>, vector<8x10xf32> -> vector<8x50xf32>
    %27 = vector.extract_strided_slice %14 {offsets = [24, 0], sizes = [8, 10], strides = [1, 1]} : vector<288x10xf32> to vector<8x10xf32>
    %28 = vector.extract_strided_slice %14 {offsets = [25, 0], sizes = [8, 10], strides = [1, 1]} : vector<288x10xf32> to vector<8x10xf32>
    %29 = vector.extract_strided_slice %14 {offsets = [26, 0], sizes = [8, 10], strides = [1, 1]} : vector<288x10xf32> to vector<8x10xf32>
    %30 = vector.extract_strided_slice %14 {offsets = [27, 0], sizes = [8, 10], strides = [1, 1]} : vector<288x10xf32> to vector<8x10xf32>
    %31 = vector.extract_strided_slice %14 {offsets = [28, 0], sizes = [8, 10], strides = [1, 1]} : vector<288x10xf32> to vector<8x10xf32>
    %32 = tpu.concatenate %27, %28, %29, %30, %31 in 1 : vector<8x10xf32>, vector<8x10xf32>, vector<8x10xf32>, vector<8x10xf32>, vector<8x10xf32> -> vector<8x50xf32>
    %33 = vector.extract_strided_slice %14 {offsets = [36, 0], sizes = [8, 10], strides = [1, 1]} : vector<288x10xf32> to vector<8x10xf32>
    %34 = vector.extract_strided_slice %14 {offsets = [37, 0], sizes = [8, 10], strides = [1, 1]} : vector<288x10xf32> to vector<8x10xf32>
    %35 = vector.extract_strided_slice %14 {offsets = [38, 0], sizes = [8, 10], strides = [1, 1]} : vector<288x10xf32> to vector<8x10xf32>
    %36 = vector.extract_strided_slice %14 {offsets = [39, 0], sizes = [8, 10], strides = [1, 1]} : vector<288x10xf32> to vector<8x10xf32>
    %37 = vector.extract_strided_slice %14 {offsets = [40, 0], sizes = [8, 10], strides = [1, 1]} : vector<288x10xf32> to vector<8x10xf32>
    %38 = tpu.concatenate %33, %34, %35, %36, %37 in 1 : vector<8x10xf32>, vector<8x10xf32>, vector<8x10xf32>, vector<8x10xf32>, vector<8x10xf32> -> vector<8x50xf32>
    %39 = vector.extract_strided_slice %14 {offsets = [48, 0], sizes = [8, 10], strides = [1, 1]} : vector<288x10xf32> to vector<8x10xf32>
    %40 = vector.extract_strided_slice %14 {offsets = [49, 0], sizes = [8, 10], strides = [1, 1]} : vector<288x10xf32> to vector<8x10xf32>
    %41 = vector.extract_strided_slice %14 {offsets = [50, 0], sizes = [8, 10], strides = [1, 1]} : vector<288x10xf32> to vector<8x10xf32>
    %42 = vector.extract_strided_slice %14 {offsets = [51, 0], sizes = [8, 10], strides = [1, 1]} : vector<288x10xf32> to vector<8x10xf32>
    %43 = vector.extract_strided_slice %14 {offsets = [52, 0], sizes = [8, 10], strides = [1, 1]} : vector<288x10xf32> to vector<8x10xf32>
    %44 = tpu.concatenate %39, %40, %41, %42, %43 in 1 : vector<8x10xf32>, vector<8x10xf32>, vector<8x10xf32>, vector<8x10xf32>, vector<8x10xf32> -> vector<8x50xf32>
    %45 = vector.extract_strided_slice %14 {offsets = [60, 0], sizes = [8, 10], strides = [1, 1]} : vector<288x10xf32> to vector<8x10xf32>
    %46 = vector.extract_strided_slice %14 {offsets = [61, 0], sizes = [8, 10], strides = [1, 1]} : vector<288x10xf32> to vector<8x10xf32>
    %47 = vector.extract_strided_slice %14 {offsets = [62, 0], sizes = [8, 10], strides = [1, 1]} : vector<288x10xf32> to vector<8x10xf32>
    %48 = vector.extract_strided_slice %14 {offsets = [63, 0], sizes = [8, 10], strides = [1, 1]} : vector<288x10xf32> to vector<8x10xf32>
    %49 = vector.extract_strided_slice %14 {offsets = [64, 0], sizes = [8, 10], strides = [1, 1]} : vector<288x10xf32> to vector<8x10xf32>
    %50 = tpu.concatenate %45, %46, %47, %48, %49 in 1 : vector<8x10xf32>, vector<8x10xf32>, vector<8x10xf32>, vector<8x10xf32>, vector<8x10xf32> -> vector<8x50xf32>
    %51 = vector.extract_strided_slice %14 {offsets = [72, 0], sizes = [8, 10], strides = [1, 1]} : vector<288x10xf32> to vector<8x10xf32>
    %52 = vector.extract_strided_slice %14 {offsets = [73, 0], sizes = [8, 10], strides = [1, 1]} : vector<288x10xf32> to vector<8x10xf32>
    %53 = vector.extract_strided_slice %14 {offsets = [74, 0], sizes = [8, 10], strides = [1, 1]} : vector<288x10xf32> to vector<8x10xf32>
    %54 = vector.extract_strided_slice %14 {offsets = [75, 0], sizes = [8, 10], strides = [1, 1]} : vector<288x10xf32> to vector<8x10xf32>
    %55 = vector.extract_strided_slice %14 {offsets = [76, 0], sizes = [8, 10], strides = [1, 1]} : vector<288x10xf32> to vector<8x10xf32>
    %56 = tpu.concatenate %51, %52, %53, %54, %55 in 1 : vector<8x10xf32>, vector<8x10xf32>, vector<8x10xf32>, vector<8x10xf32>, vector<8x10xf32> -> vector<8x50xf32>
    %57 = vector.extract_strided_slice %14 {offsets = [84, 0], sizes = [8, 10], strides = [1, 1]} : vector<288x10xf32> to vector<8x10xf32>
    %58 = vector.extract_strided_slice %14 {offsets = [85, 0], sizes = [8, 10], strides = [1, 1]} : vector<288x10xf32> to vector<8x10xf32>
    %59 = vector.extract_strided_slice %14 {offsets = [86, 0], sizes = [8, 10], strides = [1, 1]} : vector<288x10xf32> to vector<8x10xf32>
    %60 = vector.extract_strided_slice %14 {offsets = [87, 0], sizes = [8, 10], strides = [1, 1]} : vector<288x10xf32> to vector<8x10xf32>
    %61 = vector.extract_strided_slice %14 {offsets = [88, 0], sizes = [8, 10], strides = [1, 1]} : vector<288x10xf32> to vector<8x10xf32>
    %62 = tpu.concatenate %57, %58, %59, %60, %61 in 1 : vector<8x10xf32>, vector<8x10xf32>, vector<8x10xf32>, vector<8x10xf32>, vector<8x10xf32> -> vector<8x50xf32>
    %63 = vector.extract_strided_slice %14 {offsets = [96, 0], sizes = [8, 10], strides = [1, 1]} : vector<288x10xf32> to vector<8x10xf32>
    %64 = vector.extract_strided_slice %14 {offsets = [97, 0], sizes = [8, 10], strides = [1, 1]} : vector<288x10xf32> to vector<8x10xf32>
    %65 = vector.extract_strided_slice %14 {offsets = [98, 0], sizes = [8, 10], strides = [1, 1]} : vector<288x10xf32> to vector<8x10xf32>
    %66 = vector.extract_strided_slice %14 {offsets = [99, 0], sizes = [8, 10], strides = [1, 1]} : vector<288x10xf32> to vector<8x10xf32>
    %67 = vector.extract_strided_slice %14 {offsets = [100, 0], sizes = [8, 10], strides = [1, 1]} : vector<288x10xf32> to vector<8x10xf32>
    %68 = tpu.concatenate %63, %64, %65, %66, %67 in 1 : vector<8x10xf32>, vector<8x10xf32>, vector<8x10xf32>, vector<8x10xf32>, vector<8x10xf32> -> vector<8x50xf32>
    %69 = vector.extract_strided_slice %14 {offsets = [108, 0], sizes = [8, 10], strides = [1, 1]} : vector<288x10xf32> to vector<8x10xf32>
    %70 = vector.extract_strided_slice %14 {offsets = [109, 0], sizes = [8, 10], strides = [1, 1]} : vector<288x10xf32> to vector<8x10xf32>
    %71 = vector.extract_strided_slice %14 {offsets = [110, 0], sizes = [8, 10], strides = [1, 1]} : vector<288x10xf32> to vector<8x10xf32>
    %72 = vector.extract_strided_slice %14 {offsets = [111, 0], sizes = [8, 10], strides = [1, 1]} : vector<288x10xf32> to vector<8x10xf32>
    %73 = vector.extract_strided_slice %14 {offsets = [112, 0], sizes = [8, 10], strides = [1, 1]} : vector<288x10xf32> to vector<8x10xf32>
    %74 = tpu.concatenate %69, %70, %71, %72, %73 in 1 : vector<8x10xf32>, vector<8x10xf32>, vector<8x10xf32>, vector<8x10xf32>, vector<8x10xf32> -> vector<8x50xf32>
    %75 = vector.extract_strided_slice %14 {offsets = [120, 0], sizes = [8, 10], strides = [1, 1]} : vector<288x10xf32> to vector<8x10xf32>
    %76 = vector.extract_strided_slice %14 {offsets = [121, 0], sizes = [8, 10], strides = [1, 1]} : vector<288x10xf32> to vector<8x10xf32>
    %77 = vector.extract_strided_slice %14 {offsets = [122, 0], sizes = [8, 10], strides = [1, 1]} : vector<288x10xf32> to vector<8x10xf32>
    %78 = vector.extract_strided_slice %14 {offsets = [123, 0], sizes = [8, 10], strides = [1, 1]} : vector<288x10xf32> to vector<8x10xf32>
    %79 = vector.extract_strided_slice %14 {offsets = [124, 0], sizes = [8, 10], strides = [1, 1]} : vector<288x10xf32> to vector<8x10xf32>
    %80 = tpu.concatenate %75, %76, %77, %78, %79 in 1 : vector<8x10xf32>, vector<8x10xf32>, vector<8x10xf32>, vector<8x10xf32>, vector<8x10xf32> -> vector<8x50xf32>
    %81 = vector.extract_strided_slice %14 {offsets = [132, 0], sizes = [8, 10], strides = [1, 1]} : vector<288x10xf32> to vector<8x10xf32>
    %82 = vector.extract_strided_slice %14 {offsets = [133, 0], sizes = [8, 10], strides = [1, 1]} : vector<288x10xf32> to vector<8x10xf32>
    %83 = vector.extract_strided_slice %14 {offsets = [134, 0], sizes = [8, 10], strides = [1, 1]} : vector<288x10xf32> to vector<8x10xf32>
    %84 = vector.extract_strided_slice %14 {offsets = [135, 0], sizes = [8, 10], strides = [1, 1]} : vector<288x10xf32> to vector<8x10xf32>
    %85 = vector.extract_strided_slice %14 {offsets = [136, 0], sizes = [8, 10], strides = [1, 1]} : vector<288x10xf32> to vector<8x10xf32>
    %86 = tpu.concatenate %81, %82, %83, %84, %85 in 1 : vector<8x10xf32>, vector<8x10xf32>, vector<8x10xf32>, vector<8x10xf32>, vector<8x10xf32> -> vector<8x50xf32>
    %87 = vector.extract_strided_slice %14 {offsets = [144, 0], sizes = [8, 10], strides = [1, 1]} : vector<288x10xf32> to vector<8x10xf32>
    %88 = vector.extract_strided_slice %14 {offsets = [145, 0], sizes = [8, 10], strides = [1, 1]} : vector<288x10xf32> to vector<8x10xf32>
    %89 = vector.extract_strided_slice %14 {offsets = [146, 0], sizes = [8, 10], strides = [1, 1]} : vector<288x10xf32> to vector<8x10xf32>
    %90 = vector.extract_strided_slice %14 {offsets = [147, 0], sizes = [8, 10], strides = [1, 1]} : vector<288x10xf32> to vector<8x10xf32>
    %91 = vector.extract_strided_slice %14 {offsets = [148, 0], sizes = [8, 10], strides = [1, 1]} : vector<288x10xf32> to vector<8x10xf32>
    %92 = tpu.concatenate %87, %88, %89, %90, %91 in 1 : vector<8x10xf32>, vector<8x10xf32>, vector<8x10xf32>, vector<8x10xf32>, vector<8x10xf32> -> vector<8x50xf32>
    %93 = vector.extract_strided_slice %14 {offsets = [156, 0], sizes = [8, 10], strides = [1, 1]} : vector<288x10xf32> to vector<8x10xf32>
    %94 = vector.extract_strided_slice %14 {offsets = [157, 0], sizes = [8, 10], strides = [1, 1]} : vector<288x10xf32> to vector<8x10xf32>
    %95 = vector.extract_strided_slice %14 {offsets = [158, 0], sizes = [8, 10], strides = [1, 1]} : vector<288x10xf32> to vector<8x10xf32>
    %96 = vector.extract_strided_slice %14 {offsets = [159, 0], sizes = [8, 10], strides = [1, 1]} : vector<288x10xf32> to vector<8x10xf32>
    %97 = vector.extract_strided_slice %14 {offsets = [160, 0], sizes = [8, 10], strides = [1, 1]} : vector<288x10xf32> to vector<8x10xf32>
    %98 = tpu.concatenate %93, %94, %95, %96, %97 in 1 : vector<8x10xf32>, vector<8x10xf32>, vector<8x10xf32>, vector<8x10xf32>, vector<8x10xf32> -> vector<8x50xf32>
    %99 = vector.extract_strided_slice %14 {offsets = [168, 0], sizes = [8, 10], strides = [1, 1]} : vector<288x10xf32> to vector<8x10xf32>
    %100 = vector.extract_strided_slice %14 {offsets = [169, 0], sizes = [8, 10], strides = [1, 1]} : vector<288x10xf32> to vector<8x10xf32>
    %101 = vector.extract_strided_slice %14 {offsets = [170, 0], sizes = [8, 10], strides = [1, 1]} : vector<288x10xf32> to vector<8x10xf32>
    %102 = vector.extract_strided_slice %14 {offsets = [171, 0], sizes = [8, 10], strides = [1, 1]} : vector<288x10xf32> to vector<8x10xf32>
    %103 = vector.extract_strided_slice %14 {offsets = [172, 0], sizes = [8, 10], strides = [1, 1]} : vector<288x10xf32> to vector<8x10xf32>
    %104 = tpu.concatenate %99, %100, %101, %102, %103 in 1 : vector<8x10xf32>, vector<8x10xf32>, vector<8x10xf32>, vector<8x10xf32>, vector<8x10xf32> -> vector<8x50xf32>
    %105 = vector.extract_strided_slice %14 {offsets = [180, 0], sizes = [8, 10], strides = [1, 1]} : vector<288x10xf32> to vector<8x10xf32>
    %106 = vector.extract_strided_slice %14 {offsets = [181, 0], sizes = [8, 10], strides = [1, 1]} : vector<288x10xf32> to vector<8x10xf32>
    %107 = vector.extract_strided_slice %14 {offsets = [182, 0], sizes = [8, 10], strides = [1, 1]} : vector<288x10xf32> to vector<8x10xf32>
    %108 = vector.extract_strided_slice %14 {offsets = [183, 0], sizes = [8, 10], strides = [1, 1]} : vector<288x10xf32> to vector<8x10xf32>
    %109 = vector.extract_strided_slice %14 {offsets = [184, 0], sizes = [8, 10], strides = [1, 1]} : vector<288x10xf32> to vector<8x10xf32>
    %110 = tpu.concatenate %105, %106, %107, %108, %109 in 1 : vector<8x10xf32>, vector<8x10xf32>, vector<8x10xf32>, vector<8x10xf32>, vector<8x10xf32> -> vector<8x50xf32>
    %111 = vector.extract_strided_slice %14 {offsets = [192, 0], sizes = [8, 10], strides = [1, 1]} : vector<288x10xf32> to vector<8x10xf32>
    %112 = vector.extract_strided_slice %14 {offsets = [193, 0], sizes = [8, 10], strides = [1, 1]} : vector<288x10xf32> to vector<8x10xf32>
    %113 = vector.extract_strided_slice %14 {offsets = [194, 0], sizes = [8, 10], strides = [1, 1]} : vector<288x10xf32> to vector<8x10xf32>
    %114 = vector.extract_strided_slice %14 {offsets = [195, 0], sizes = [8, 10], strides = [1, 1]} : vector<288x10xf32> to vector<8x10xf32>
    %115 = vector.extract_strided_slice %14 {offsets = [196, 0], sizes = [8, 10], strides = [1, 1]} : vector<288x10xf32> to vector<8x10xf32>
    %116 = tpu.concatenate %111, %112, %113, %114, %115 in 1 : vector<8x10xf32>, vector<8x10xf32>, vector<8x10xf32>, vector<8x10xf32>, vector<8x10xf32> -> vector<8x50xf32>
    %117 = vector.extract_strided_slice %14 {offsets = [204, 0], sizes = [8, 10], strides = [1, 1]} : vector<288x10xf32> to vector<8x10xf32>
    %118 = vector.extract_strided_slice %14 {offsets = [205, 0], sizes = [8, 10], strides = [1, 1]} : vector<288x10xf32> to vector<8x10xf32>
    %119 = vector.extract_strided_slice %14 {offsets = [206, 0], sizes = [8, 10], strides = [1, 1]} : vector<288x10xf32> to vector<8x10xf32>
    %120 = vector.extract_strided_slice %14 {offsets = [207, 0], sizes = [8, 10], strides = [1, 1]} : vector<288x10xf32> to vector<8x10xf32>
    %121 = vector.extract_strided_slice %14 {offsets = [208, 0], sizes = [8, 10], strides = [1, 1]} : vector<288x10xf32> to vector<8x10xf32>
    %122 = tpu.concatenate %117, %118, %119, %120, %121 in 1 : vector<8x10xf32>, vector<8x10xf32>, vector<8x10xf32>, vector<8x10xf32>, vector<8x10xf32> -> vector<8x50xf32>
    %123 = vector.extract_strided_slice %14 {offsets = [216, 0], sizes = [8, 10], strides = [1, 1]} : vector<288x10xf32> to vector<8x10xf32>
    %124 = vector.extract_strided_slice %14 {offsets = [217, 0], sizes = [8, 10], strides = [1, 1]} : vector<288x10xf32> to vector<8x10xf32>
    %125 = vector.extract_strided_slice %14 {offsets = [218, 0], sizes = [8, 10], strides = [1, 1]} : vector<288x10xf32> to vector<8x10xf32>
    %126 = vector.extract_strided_slice %14 {offsets = [219, 0], sizes = [8, 10], strides = [1, 1]} : vector<288x10xf32> to vector<8x10xf32>
    %127 = vector.extract_strided_slice %14 {offsets = [220, 0], sizes = [8, 10], strides = [1, 1]} : vector<288x10xf32> to vector<8x10xf32>
    %128 = tpu.concatenate %123, %124, %125, %126, %127 in 1 : vector<8x10xf32>, vector<8x10xf32>, vector<8x10xf32>, vector<8x10xf32>, vector<8x10xf32> -> vector<8x50xf32>
    %129 = vector.extract_strided_slice %14 {offsets = [228, 0], sizes = [8, 10], strides = [1, 1]} : vector<288x10xf32> to vector<8x10xf32>
    %130 = vector.extract_strided_slice %14 {offsets = [229, 0], sizes = [8, 10], strides = [1, 1]} : vector<288x10xf32> to vector<8x10xf32>
    %131 = vector.extract_strided_slice %14 {offsets = [230, 0], sizes = [8, 10], strides = [1, 1]} : vector<288x10xf32> to vector<8x10xf32>
    %132 = vector.extract_strided_slice %14 {offsets = [231, 0], sizes = [8, 10], strides = [1, 1]} : vector<288x10xf32> to vector<8x10xf32>
    %133 = vector.extract_strided_slice %14 {offsets = [232, 0], sizes = [8, 10], strides = [1, 1]} : vector<288x10xf32> to vector<8x10xf32>
    %134 = tpu.concatenate %129, %130, %131, %132, %133 in 1 : vector<8x10xf32>, vector<8x10xf32>, vector<8x10xf32>, vector<8x10xf32>, vector<8x10xf32> -> vector<8x50xf32>
    %135 = vector.extract_strided_slice %14 {offsets = [240, 0], sizes = [8, 10], strides = [1, 1]} : vector<288x10xf32> to vector<8x10xf32>
    %136 = vector.extract_strided_slice %14 {offsets = [241, 0], sizes = [8, 10], strides = [1, 1]} : vector<288x10xf32> to vector<8x10xf32>
    %137 = vector.extract_strided_slice %14 {offsets = [242, 0], sizes = [8, 10], strides = [1, 1]} : vector<288x10xf32> to vector<8x10xf32>
    %138 = vector.extract_strided_slice %14 {offsets = [243, 0], sizes = [8, 10], strides = [1, 1]} : vector<288x10xf32> to vector<8x10xf32>
    %139 = vector.extract_strided_slice %14 {offsets = [244, 0], sizes = [8, 10], strides = [1, 1]} : vector<288x10xf32> to vector<8x10xf32>
    %140 = tpu.concatenate %135, %136, %137, %138, %139 in 1 : vector<8x10xf32>, vector<8x10xf32>, vector<8x10xf32>, vector<8x10xf32>, vector<8x10xf32> -> vector<8x50xf32>
    %141 = vector.extract_strided_slice %14 {offsets = [252, 0], sizes = [8, 10], strides = [1, 1]} : vector<288x10xf32> to vector<8x10xf32>
    %142 = vector.extract_strided_slice %14 {offsets = [253, 0], sizes = [8, 10], strides = [1, 1]} : vector<288x10xf32> to vector<8x10xf32>
    %143 = vector.extract_strided_slice %14 {offsets = [254, 0], sizes = [8, 10], strides = [1, 1]} : vector<288x10xf32> to vector<8x10xf32>
    %144 = vector.extract_strided_slice %14 {offsets = [255, 0], sizes = [8, 10], strides = [1, 1]} : vector<288x10xf32> to vector<8x10xf32>
    %145 = vector.extract_strided_slice %14 {offsets = [256, 0], sizes = [8, 10], strides = [1, 1]} : vector<288x10xf32> to vector<8x10xf32>
    %146 = tpu.concatenate %141, %142, %143, %144, %145 in 1 : vector<8x10xf32>, vector<8x10xf32>, vector<8x10xf32>, vector<8x10xf32>, vector<8x10xf32> -> vector<8x50xf32>
    %147 = vector.extract_strided_slice %14 {offsets = [264, 0], sizes = [8, 10], strides = [1, 1]} : vector<288x10xf32> to vector<8x10xf32>
    %148 = vector.extract_strided_slice %14 {offsets = [265, 0], sizes = [8, 10], strides = [1, 1]} : vector<288x10xf32> to vector<8x10xf32>
    %149 = vector.extract_strided_slice %14 {offsets = [266, 0], sizes = [8, 10], strides = [1, 1]} : vector<288x10xf32> to vector<8x10xf32>
    %150 = vector.extract_strided_slice %14 {offsets = [267, 0], sizes = [8, 10], strides = [1, 1]} : vector<288x10xf32> to vector<8x10xf32>
    %151 = vector.extract_strided_slice %14 {offsets = [268, 0], sizes = [8, 10], strides = [1, 1]} : vector<288x10xf32> to vector<8x10xf32>
    %152 = tpu.concatenate %147, %148, %149, %150, %151 in 1 : vector<8x10xf32>, vector<8x10xf32>, vector<8x10xf32>, vector<8x10xf32>, vector<8x10xf32> -> vector<8x50xf32>
    %153 = vector.extract_strided_slice %14 {offsets = [276, 0], sizes = [8, 10], strides = [1, 1]} : vector<288x10xf32> to vector<8x10xf32>
    %154 = vector.extract_strided_slice %14 {offsets = [277, 0], sizes = [8, 10], strides = [1, 1]} : vector<288x10xf32> to vector<8x10xf32>
    %155 = vector.extract_strided_slice %14 {offsets = [278, 0], sizes = [8, 10], strides = [1, 1]} : vector<288x10xf32> to vector<8x10xf32>
    %156 = vector.extract_strided_slice %14 {offsets = [279, 0], sizes = [8, 10], strides = [1, 1]} : vector<288x10xf32> to vector<8x10xf32>
    %157 = vector.extract_strided_slice %14 {offsets = [280, 0], sizes = [8, 10], strides = [1, 1]} : vector<288x10xf32> to vector<8x10xf32>
    %158 = tpu.concatenate %153, %154, %155, %156, %157 in 1 : vector<8x10xf32>, vector<8x10xf32>, vector<8x10xf32>, vector<8x10xf32>, vector<8x10xf32> -> vector<8x50xf32>
    %159 = tpu.concatenate %20, %26, %32, %38, %44 in 1 : vector<8x50xf32>, vector<8x50xf32>, vector<8x50xf32>, vector<8x50xf32>, vector<8x50xf32> -> vector<8x250xf32>
    %160 = tpu.concatenate %26, %32, %38, %44, %50 in 1 : vector<8x50xf32>, vector<8x50xf32>, vector<8x50xf32>, vector<8x50xf32>, vector<8x50xf32> -> vector<8x250xf32>
    %161 = tpu.concatenate %32, %38, %44, %50, %56 in 1 : vector<8x50xf32>, vector<8x50xf32>, vector<8x50xf32>, vector<8x50xf32>, vector<8x50xf32> -> vector<8x250xf32>
    %162 = tpu.concatenate %38, %44, %50, %56, %62 in 1 : vector<8x50xf32>, vector<8x50xf32>, vector<8x50xf32>, vector<8x50xf32>, vector<8x50xf32> -> vector<8x250xf32>
    %163 = tpu.concatenate %44, %50, %56, %62, %68 in 1 : vector<8x50xf32>, vector<8x50xf32>, vector<8x50xf32>, vector<8x50xf32>, vector<8x50xf32> -> vector<8x250xf32>
    %164 = tpu.concatenate %50, %56, %62, %68, %74 in 1 : vector<8x50xf32>, vector<8x50xf32>, vector<8x50xf32>, vector<8x50xf32>, vector<8x50xf32> -> vector<8x250xf32>
    %165 = tpu.concatenate %56, %62, %68, %74, %80 in 1 : vector<8x50xf32>, vector<8x50xf32>, vector<8x50xf32>, vector<8x50xf32>, vector<8x50xf32> -> vector<8x250xf32>
    %166 = tpu.concatenate %62, %68, %74, %80, %86 in 1 : vector<8x50xf32>, vector<8x50xf32>, vector<8x50xf32>, vector<8x50xf32>, vector<8x50xf32> -> vector<8x250xf32>
    %167 = tpu.concatenate %92, %98, %104, %110, %116 in 1 : vector<8x50xf32>, vector<8x50xf32>, vector<8x50xf32>, vector<8x50xf32>, vector<8x50xf32> -> vector<8x250xf32>
    %168 = tpu.concatenate %98, %104, %110, %116, %122 in 1 : vector<8x50xf32>, vector<8x50xf32>, vector<8x50xf32>, vector<8x50xf32>, vector<8x50xf32> -> vector<8x250xf32>
    %169 = tpu.concatenate %104, %110, %116, %122, %128 in 1 : vector<8x50xf32>, vector<8x50xf32>, vector<8x50xf32>, vector<8x50xf32>, vector<8x50xf32> -> vector<8x250xf32>
    %170 = tpu.concatenate %110, %116, %122, %128, %134 in 1 : vector<8x50xf32>, vector<8x50xf32>, vector<8x50xf32>, vector<8x50xf32>, vector<8x50xf32> -> vector<8x250xf32>
    %171 = tpu.concatenate %116, %122, %128, %134, %140 in 1 : vector<8x50xf32>, vector<8x50xf32>, vector<8x50xf32>, vector<8x50xf32>, vector<8x50xf32> -> vector<8x250xf32>
    %172 = tpu.concatenate %122, %128, %134, %140, %146 in 1 : vector<8x50xf32>, vector<8x50xf32>, vector<8x50xf32>, vector<8x50xf32>, vector<8x50xf32> -> vector<8x250xf32>
    %173 = tpu.concatenate %128, %134, %140, %146, %152 in 1 : vector<8x50xf32>, vector<8x50xf32>, vector<8x50xf32>, vector<8x50xf32>, vector<8x50xf32> -> vector<8x250xf32>
    %174 = tpu.concatenate %134, %140, %146, %152, %158 in 1 : vector<8x50xf32>, vector<8x50xf32>, vector<8x50xf32>, vector<8x50xf32>, vector<8x50xf32> -> vector<8x250xf32>
    %175 = tpu.concatenate %159, %160, %161, %162, %163, %164, %165, %166, %167, %168, %169, %170, %171, %172, %173, %174 in 0 : vector<8x250xf32>, vector<8x250xf32>, vector<8x250xf32>, vector<8x250xf32>, vector<8x250xf32>, vector<8x250xf32>, vector<8x250xf32>, vector<8x250xf32>, vector<8x250xf32>, vector<8x250xf32>, vector<8x250xf32>, vector<8x250xf32>, vector<8x250xf32>, vector<8x250xf32>, vector<8x250xf32>, vector<8x250xf32> -> vector<128x250xf32>
    %c0_6 = arith.constant 0 : index
    %c0_7 = arith.constant 0 : index
    %176 = vector.load %arg4[%c0_6, %c0_7] : memref<250x20xf32, #tpu.memory_space<vmem>>, vector<250x20xf32>
    %cst_8 = arith.constant dense<0.000000e+00> : vector<128x20xf32>
    %177 = tpu.matmul %175, %176, %cst_8 {dimension_numbers = #tpu.dot_dimension_numbers<[1], [0], [0], [1], [0, 0, 1, 1], [], []>} : vector<128x250xf32>, vector<250x20xf32>, vector<128x20xf32> -> vector<128x20xf32>
    %178 = vector.extract_strided_slice %177 {offsets = [0, 0], sizes = [8, 20], strides = [1, 1]} : vector<128x20xf32> to vector<8x20xf32>
    %179 = vector.extract_strided_slice %177 {offsets = [8, 0], sizes = [8, 20], strides = [1, 1]} : vector<128x20xf32> to vector<8x20xf32>
    %180 = arith.maximumf %178, %179 : vector<8x20xf32>
    %181 = vector.extract_strided_slice %180 {offsets = [0, 0], sizes = [1, 20], strides = [1, 1]} : vector<8x20xf32> to vector<1x20xf32>
    %182 = vector.extract_strided_slice %180 {offsets = [1, 0], sizes = [1, 20], strides = [1, 1]} : vector<8x20xf32> to vector<1x20xf32>
    %183 = arith.maximumf %181, %182 : vector<1x20xf32>
    %184 = vector.extract_strided_slice %180 {offsets = [2, 0], sizes = [1, 20], strides = [1, 1]} : vector<8x20xf32> to vector<1x20xf32>
    %185 = vector.extract_strided_slice %180 {offsets = [3, 0], sizes = [1, 20], strides = [1, 1]} : vector<8x20xf32> to vector<1x20xf32>
    %186 = arith.maximumf %184, %185 : vector<1x20xf32>
    %187 = vector.extract_strided_slice %180 {offsets = [4, 0], sizes = [1, 20], strides = [1, 1]} : vector<8x20xf32> to vector<1x20xf32>
    %188 = vector.extract_strided_slice %180 {offsets = [5, 0], sizes = [1, 20], strides = [1, 1]} : vector<8x20xf32> to vector<1x20xf32>
    %189 = arith.maximumf %187, %188 : vector<1x20xf32>
    %190 = vector.extract_strided_slice %180 {offsets = [6, 0], sizes = [1, 20], strides = [1, 1]} : vector<8x20xf32> to vector<1x20xf32>
    %191 = vector.extract_strided_slice %180 {offsets = [7, 0], sizes = [1, 20], strides = [1, 1]} : vector<8x20xf32> to vector<1x20xf32>
    %192 = arith.maximumf %190, %191 : vector<1x20xf32>
    %193 = vector.extract_strided_slice %177 {offsets = [16, 0], sizes = [8, 20], strides = [1, 1]} : vector<128x20xf32> to vector<8x20xf32>
    %194 = vector.extract_strided_slice %177 {offsets = [24, 0], sizes = [8, 20], strides = [1, 1]} : vector<128x20xf32> to vector<8x20xf32>
    %195 = arith.maximumf %193, %194 : vector<8x20xf32>
    %196 = vector.extract_strided_slice %195 {offsets = [0, 0], sizes = [1, 20], strides = [1, 1]} : vector<8x20xf32> to vector<1x20xf32>
    %197 = vector.extract_strided_slice %195 {offsets = [1, 0], sizes = [1, 20], strides = [1, 1]} : vector<8x20xf32> to vector<1x20xf32>
    %198 = arith.maximumf %196, %197 : vector<1x20xf32>
    %199 = vector.extract_strided_slice %195 {offsets = [2, 0], sizes = [1, 20], strides = [1, 1]} : vector<8x20xf32> to vector<1x20xf32>
    %200 = vector.extract_strided_slice %195 {offsets = [3, 0], sizes = [1, 20], strides = [1, 1]} : vector<8x20xf32> to vector<1x20xf32>
    %201 = arith.maximumf %199, %200 : vector<1x20xf32>
    %202 = vector.extract_strided_slice %195 {offsets = [4, 0], sizes = [1, 20], strides = [1, 1]} : vector<8x20xf32> to vector<1x20xf32>
    %203 = vector.extract_strided_slice %195 {offsets = [5, 0], sizes = [1, 20], strides = [1, 1]} : vector<8x20xf32> to vector<1x20xf32>
    %204 = arith.maximumf %202, %203 : vector<1x20xf32>
    %205 = vector.extract_strided_slice %195 {offsets = [6, 0], sizes = [1, 20], strides = [1, 1]} : vector<8x20xf32> to vector<1x20xf32>
    %206 = vector.extract_strided_slice %195 {offsets = [7, 0], sizes = [1, 20], strides = [1, 1]} : vector<8x20xf32> to vector<1x20xf32>
    %207 = arith.maximumf %205, %206 : vector<1x20xf32>
    %208 = vector.extract_strided_slice %177 {offsets = [32, 0], sizes = [8, 20], strides = [1, 1]} : vector<128x20xf32> to vector<8x20xf32>
    %209 = vector.extract_strided_slice %177 {offsets = [40, 0], sizes = [8, 20], strides = [1, 1]} : vector<128x20xf32> to vector<8x20xf32>
    %210 = arith.maximumf %208, %209 : vector<8x20xf32>
    %211 = vector.extract_strided_slice %210 {offsets = [0, 0], sizes = [1, 20], strides = [1, 1]} : vector<8x20xf32> to vector<1x20xf32>
    %212 = vector.extract_strided_slice %210 {offsets = [1, 0], sizes = [1, 20], strides = [1, 1]} : vector<8x20xf32> to vector<1x20xf32>
    %213 = arith.maximumf %211, %212 : vector<1x20xf32>
    %214 = vector.extract_strided_slice %210 {offsets = [2, 0], sizes = [1, 20], strides = [1, 1]} : vector<8x20xf32> to vector<1x20xf32>
    %215 = vector.extract_strided_slice %210 {offsets = [3, 0], sizes = [1, 20], strides = [1, 1]} : vector<8x20xf32> to vector<1x20xf32>
    %216 = arith.maximumf %214, %215 : vector<1x20xf32>
    %217 = vector.extract_strided_slice %210 {offsets = [4, 0], sizes = [1, 20], strides = [1, 1]} : vector<8x20xf32> to vector<1x20xf32>
    %218 = vector.extract_strided_slice %210 {offsets = [5, 0], sizes = [1, 20], strides = [1, 1]} : vector<8x20xf32> to vector<1x20xf32>
    %219 = arith.maximumf %217, %218 : vector<1x20xf32>
    %220 = vector.extract_strided_slice %210 {offsets = [6, 0], sizes = [1, 20], strides = [1, 1]} : vector<8x20xf32> to vector<1x20xf32>
    %221 = vector.extract_strided_slice %210 {offsets = [7, 0], sizes = [1, 20], strides = [1, 1]} : vector<8x20xf32> to vector<1x20xf32>
    %222 = arith.maximumf %220, %221 : vector<1x20xf32>
    %223 = vector.extract_strided_slice %177 {offsets = [48, 0], sizes = [8, 20], strides = [1, 1]} : vector<128x20xf32> to vector<8x20xf32>
    %224 = vector.extract_strided_slice %177 {offsets = [56, 0], sizes = [8, 20], strides = [1, 1]} : vector<128x20xf32> to vector<8x20xf32>
    %225 = arith.maximumf %223, %224 : vector<8x20xf32>
    %226 = vector.extract_strided_slice %225 {offsets = [0, 0], sizes = [1, 20], strides = [1, 1]} : vector<8x20xf32> to vector<1x20xf32>
    %227 = vector.extract_strided_slice %225 {offsets = [1, 0], sizes = [1, 20], strides = [1, 1]} : vector<8x20xf32> to vector<1x20xf32>
    %228 = arith.maximumf %226, %227 : vector<1x20xf32>
    %229 = vector.extract_strided_slice %225 {offsets = [2, 0], sizes = [1, 20], strides = [1, 1]} : vector<8x20xf32> to vector<1x20xf32>
    %230 = vector.extract_strided_slice %225 {offsets = [3, 0], sizes = [1, 20], strides = [1, 1]} : vector<8x20xf32> to vector<1x20xf32>
    %231 = arith.maximumf %229, %230 : vector<1x20xf32>
    %232 = vector.extract_strided_slice %225 {offsets = [4, 0], sizes = [1, 20], strides = [1, 1]} : vector<8x20xf32> to vector<1x20xf32>
    %233 = vector.extract_strided_slice %225 {offsets = [5, 0], sizes = [1, 20], strides = [1, 1]} : vector<8x20xf32> to vector<1x20xf32>
    %234 = arith.maximumf %232, %233 : vector<1x20xf32>
    %235 = vector.extract_strided_slice %225 {offsets = [6, 0], sizes = [1, 20], strides = [1, 1]} : vector<8x20xf32> to vector<1x20xf32>
    %236 = vector.extract_strided_slice %225 {offsets = [7, 0], sizes = [1, 20], strides = [1, 1]} : vector<8x20xf32> to vector<1x20xf32>
    %237 = arith.maximumf %235, %236 : vector<1x20xf32>
    %238 = tpu.concatenate %183, %186, %189, %192, %198, %201, %204, %207, %213, %216, %219, %222, %228, %231, %234, %237 in 1 : vector<1x20xf32>, vector<1x20xf32>, vector<1x20xf32>, vector<1x20xf32>, vector<1x20xf32>, vector<1x20xf32>, vector<1x20xf32>, vector<1x20xf32>, vector<1x20xf32>, vector<1x20xf32>, vector<1x20xf32>, vector<1x20xf32>, vector<1x20xf32>, vector<1x20xf32>, vector<1x20xf32>, vector<1x20xf32> -> vector<1x320xf32>
    %239 = vector.extract_strided_slice %177 {offsets = [64, 0], sizes = [8, 20], strides = [1, 1]} : vector<128x20xf32> to vector<8x20xf32>
    %240 = vector.extract_strided_slice %177 {offsets = [72, 0], sizes = [8, 20], strides = [1, 1]} : vector<128x20xf32> to vector<8x20xf32>
    %241 = arith.maximumf %239, %240 : vector<8x20xf32>
    %242 = vector.extract_strided_slice %241 {offsets = [0, 0], sizes = [1, 20], strides = [1, 1]} : vector<8x20xf32> to vector<1x20xf32>
    %243 = vector.extract_strided_slice %241 {offsets = [1, 0], sizes = [1, 20], strides = [1, 1]} : vector<8x20xf32> to vector<1x20xf32>
    %244 = arith.maximumf %242, %243 : vector<1x20xf32>
    %245 = vector.extract_strided_slice %241 {offsets = [2, 0], sizes = [1, 20], strides = [1, 1]} : vector<8x20xf32> to vector<1x20xf32>
    %246 = vector.extract_strided_slice %241 {offsets = [3, 0], sizes = [1, 20], strides = [1, 1]} : vector<8x20xf32> to vector<1x20xf32>
    %247 = arith.maximumf %245, %246 : vector<1x20xf32>
    %248 = vector.extract_strided_slice %241 {offsets = [4, 0], sizes = [1, 20], strides = [1, 1]} : vector<8x20xf32> to vector<1x20xf32>
    %249 = vector.extract_strided_slice %241 {offsets = [5, 0], sizes = [1, 20], strides = [1, 1]} : vector<8x20xf32> to vector<1x20xf32>
    %250 = arith.maximumf %248, %249 : vector<1x20xf32>
    %251 = vector.extract_strided_slice %241 {offsets = [6, 0], sizes = [1, 20], strides = [1, 1]} : vector<8x20xf32> to vector<1x20xf32>
    %252 = vector.extract_strided_slice %241 {offsets = [7, 0], sizes = [1, 20], strides = [1, 1]} : vector<8x20xf32> to vector<1x20xf32>
    %253 = arith.maximumf %251, %252 : vector<1x20xf32>
    %254 = vector.extract_strided_slice %177 {offsets = [80, 0], sizes = [8, 20], strides = [1, 1]} : vector<128x20xf32> to vector<8x20xf32>
    %255 = vector.extract_strided_slice %177 {offsets = [88, 0], sizes = [8, 20], strides = [1, 1]} : vector<128x20xf32> to vector<8x20xf32>
    %256 = arith.maximumf %254, %255 : vector<8x20xf32>
    %257 = vector.extract_strided_slice %256 {offsets = [0, 0], sizes = [1, 20], strides = [1, 1]} : vector<8x20xf32> to vector<1x20xf32>
    %258 = vector.extract_strided_slice %256 {offsets = [1, 0], sizes = [1, 20], strides = [1, 1]} : vector<8x20xf32> to vector<1x20xf32>
    %259 = arith.maximumf %257, %258 : vector<1x20xf32>
    %260 = vector.extract_strided_slice %256 {offsets = [2, 0], sizes = [1, 20], strides = [1, 1]} : vector<8x20xf32> to vector<1x20xf32>
    %261 = vector.extract_strided_slice %256 {offsets = [3, 0], sizes = [1, 20], strides = [1, 1]} : vector<8x20xf32> to vector<1x20xf32>
    %262 = arith.maximumf %260, %261 : vector<1x20xf32>
    %263 = vector.extract_strided_slice %256 {offsets = [4, 0], sizes = [1, 20], strides = [1, 1]} : vector<8x20xf32> to vector<1x20xf32>
    %264 = vector.extract_strided_slice %256 {offsets = [5, 0], sizes = [1, 20], strides = [1, 1]} : vector<8x20xf32> to vector<1x20xf32>
    %265 = arith.maximumf %263, %264 : vector<1x20xf32>
    %266 = vector.extract_strided_slice %256 {offsets = [6, 0], sizes = [1, 20], strides = [1, 1]} : vector<8x20xf32> to vector<1x20xf32>
    %267 = vector.extract_strided_slice %256 {offsets = [7, 0], sizes = [1, 20], strides = [1, 1]} : vector<8x20xf32> to vector<1x20xf32>
    %268 = arith.maximumf %266, %267 : vector<1x20xf32>
    %269 = vector.extract_strided_slice %177 {offsets = [96, 0], sizes = [8, 20], strides = [1, 1]} : vector<128x20xf32> to vector<8x20xf32>
    %270 = vector.extract_strided_slice %177 {offsets = [104, 0], sizes = [8, 20], strides = [1, 1]} : vector<128x20xf32> to vector<8x20xf32>
    %271 = arith.maximumf %269, %270 : vector<8x20xf32>
    %272 = vector.extract_strided_slice %271 {offsets = [0, 0], sizes = [1, 20], strides = [1, 1]} : vector<8x20xf32> to vector<1x20xf32>
    %273 = vector.extract_strided_slice %271 {offsets = [1, 0], sizes = [1, 20], strides = [1, 1]} : vector<8x20xf32> to vector<1x20xf32>
    %274 = arith.maximumf %272, %273 : vector<1x20xf32>
    %275 = vector.extract_strided_slice %271 {offsets = [2, 0], sizes = [1, 20], strides = [1, 1]} : vector<8x20xf32> to vector<1x20xf32>
    %276 = vector.extract_strided_slice %271 {offsets = [3, 0], sizes = [1, 20], strides = [1, 1]} : vector<8x20xf32> to vector<1x20xf32>
    %277 = arith.maximumf %275, %276 : vector<1x20xf32>
    %278 = vector.extract_strided_slice %271 {offsets = [4, 0], sizes = [1, 20], strides = [1, 1]} : vector<8x20xf32> to vector<1x20xf32>
    %279 = vector.extract_strided_slice %271 {offsets = [5, 0], sizes = [1, 20], strides = [1, 1]} : vector<8x20xf32> to vector<1x20xf32>
    %280 = arith.maximumf %278, %279 : vector<1x20xf32>
    %281 = vector.extract_strided_slice %271 {offsets = [6, 0], sizes = [1, 20], strides = [1, 1]} : vector<8x20xf32> to vector<1x20xf32>
    %282 = vector.extract_strided_slice %271 {offsets = [7, 0], sizes = [1, 20], strides = [1, 1]} : vector<8x20xf32> to vector<1x20xf32>
    %283 = arith.maximumf %281, %282 : vector<1x20xf32>
    %284 = vector.extract_strided_slice %177 {offsets = [112, 0], sizes = [8, 20], strides = [1, 1]} : vector<128x20xf32> to vector<8x20xf32>
    %285 = vector.extract_strided_slice %177 {offsets = [120, 0], sizes = [8, 20], strides = [1, 1]} : vector<128x20xf32> to vector<8x20xf32>
    %286 = arith.maximumf %284, %285 : vector<8x20xf32>
    %287 = vector.extract_strided_slice %286 {offsets = [0, 0], sizes = [1, 20], strides = [1, 1]} : vector<8x20xf32> to vector<1x20xf32>
    %288 = vector.extract_strided_slice %286 {offsets = [1, 0], sizes = [1, 20], strides = [1, 1]} : vector<8x20xf32> to vector<1x20xf32>
    %289 = arith.maximumf %287, %288 : vector<1x20xf32>
    %290 = vector.extract_strided_slice %286 {offsets = [2, 0], sizes = [1, 20], strides = [1, 1]} : vector<8x20xf32> to vector<1x20xf32>
    %291 = vector.extract_strided_slice %286 {offsets = [3, 0], sizes = [1, 20], strides = [1, 1]} : vector<8x20xf32> to vector<1x20xf32>
    %292 = arith.maximumf %290, %291 : vector<1x20xf32>
    %293 = vector.extract_strided_slice %286 {offsets = [4, 0], sizes = [1, 20], strides = [1, 1]} : vector<8x20xf32> to vector<1x20xf32>
    %294 = vector.extract_strided_slice %286 {offsets = [5, 0], sizes = [1, 20], strides = [1, 1]} : vector<8x20xf32> to vector<1x20xf32>
    %295 = arith.maximumf %293, %294 : vector<1x20xf32>
    %296 = vector.extract_strided_slice %286 {offsets = [6, 0], sizes = [1, 20], strides = [1, 1]} : vector<8x20xf32> to vector<1x20xf32>
    %297 = vector.extract_strided_slice %286 {offsets = [7, 0], sizes = [1, 20], strides = [1, 1]} : vector<8x20xf32> to vector<1x20xf32>
    %298 = arith.maximumf %296, %297 : vector<1x20xf32>
    %299 = tpu.concatenate %244, %247, %250, %253, %259, %262, %265, %268, %274, %277, %280, %283, %289, %292, %295, %298 in 1 : vector<1x20xf32>, vector<1x20xf32>, vector<1x20xf32>, vector<1x20xf32>, vector<1x20xf32>, vector<1x20xf32>, vector<1x20xf32>, vector<1x20xf32>, vector<1x20xf32>, vector<1x20xf32>, vector<1x20xf32>, vector<1x20xf32>, vector<1x20xf32>, vector<1x20xf32>, vector<1x20xf32>, vector<1x20xf32> -> vector<1x320xf32>
    %300 = tpu.concatenate %238, %299 in 0 : vector<1x320xf32>, vector<1x320xf32> -> vector<2x320xf32>
    %c0_9 = arith.constant 0 : index
    %c0_10 = arith.constant 0 : index
    %301 = vector.load %arg5[%c0_9, %c0_10] : memref<1x320xf32, #tpu.memory_space<vmem>>, vector<1x320xf32>
    %302 = vector.broadcast %301 : vector<1x320xf32> to vector<2x320xf32>
    %303 = arith.addf %300, %302 : vector<2x320xf32>
    %cst_11 = arith.constant 0.000000e+00 : f32
    %304 = vector.broadcast %cst_11 : f32 to vector<2x320xf32>
    %305 = arith.maximumf %303, %304 : vector<2x320xf32>
    %c0_12 = arith.constant 0 : index
    %c0_13 = arith.constant 0 : index
    %306 = vector.load %arg6[%c0_12, %c0_13] : memref<320x50xf32, #tpu.memory_space<vmem>>, vector<320x50xf32>
    %cst_14 = arith.constant dense<0.000000e+00> : vector<2x50xf32>
    %307 = tpu.matmul %305, %306, %cst_14 {dimension_numbers = #tpu.dot_dimension_numbers<[1], [0], [0], [1], [0, 0, 1, 1], [], []>} : vector<2x320xf32>, vector<320x50xf32>, vector<2x50xf32> -> vector<2x50xf32>
    %c0_15 = arith.constant 0 : index
    %c0_16 = arith.constant 0 : index
    %308 = vector.load %arg7[%c0_15, %c0_16] : memref<1x50xf32, #tpu.memory_space<vmem>>, vector<1x50xf32>
    %309 = vector.broadcast %308 : vector<1x50xf32> to vector<2x50xf32>
    %310 = arith.addf %307, %309 : vector<2x50xf32>
    %cst_17 = arith.constant 0.000000e+00 : f32
    %311 = vector.broadcast %cst_17 : f32 to vector<2x50xf32>
    %312 = arith.maximumf %310, %311 : vector<2x50xf32>
    %c0_18 = arith.constant 0 : index
    %c0_19 = arith.constant 0 : index
    %313 = vector.load %arg8[%c0_18, %c0_19] : memref<50x10xf32, #tpu.memory_space<vmem>>, vector<50x10xf32>
    %cst_20 = arith.constant dense<0.000000e+00> : vector<2x10xf32>
    %314 = tpu.matmul %312, %313, %cst_20 {dimension_numbers = #tpu.dot_dimension_numbers<[1], [0], [0], [1], [0, 0, 1, 1], [], []>} : vector<2x50xf32>, vector<50x10xf32>, vector<2x10xf32> -> vector<2x10xf32>
    %c0_21 = arith.constant 0 : index
    %c0_22 = arith.constant 0 : index
    %315 = vector.load %arg9[%c0_21, %c0_22] : memref<1x10xf32, #tpu.memory_space<vmem>>, vector<1x10xf32>
    %316 = vector.broadcast %315 : vector<1x10xf32> to vector<2x10xf32>
    %317 = arith.addf %314, %316 : vector<2x10xf32>
    %cst_23 = arith.constant dense<0xFF800000> : vector<2xf32>
    %318 = vector.multi_reduction <maximumf>, %317, %cst_23 [1] : vector<2x10xf32> to vector<2xf32>
    %319 = vector.shape_cast %318 : vector<2xf32> to vector<2x1xf32>
    %320 = vector.broadcast %319 : vector<2x1xf32> to vector<2x10xf32>
    %321 = arith.subf %317, %320 : vector<2x10xf32>
    %322 = math.exp %321 : vector<2x10xf32>
    %cst_24 = arith.constant dense<0.000000e+00> : vector<2xf32>
    %323 = vector.multi_reduction <add>, %322, %cst_24 [1] : vector<2x10xf32> to vector<2xf32>
    %324 = vector.shape_cast %323 : vector<2xf32> to vector<2x1xf32>
    %325 = math.log %324 : vector<2x1xf32>
    %326 = arith.addf %325, %319 : vector<2x1xf32>
    %327 = vector.broadcast %326 : vector<2x1xf32> to vector<2x10xf32>
    %328 = arith.subf %317, %327 : vector<2x10xf32>
    %c0_25 = arith.constant 0 : index
    %c0_26 = arith.constant 0 : index
    %329 = vector.load %arg10[%c0_25, %c0_26] : memref<2x10xf32, #tpu.memory_space<vmem>>, vector<2x10xf32>
    tpu.vector_store %arg10[%c0_25, %c0_26], %328 {strides = array<i32>} : memref<2x10xf32, #tpu.memory_space<vmem>>, vector<2x10xf32>,
    return
  }
  func.func @transform_0(%arg0: i32) -> (i32, i32) {
    %c0_i32 = arith.constant 0 : i32
    %c0_i32_0 = arith.constant 0 : i32
    %c0_i32_1 = arith.constant 0 : i32
    return %c0_i32, %c0_i32_0 : i32, i32
  }
  func.func @transform_1(%arg0: i32) -> (i32, i32) {
    %c0_i32 = arith.constant 0 : i32
    %c0_i32_0 = arith.constant 0 : i32
    %c0_i32_1 = arith.constant 0 : i32
    return %c0_i32, %c0_i32_0 : i32, i32
  }
  func.func @transform_2(%arg0: i32) -> (i32, i32) {
    %c0_i32 = arith.constant 0 : i32
    %c0_i32_0 = arith.constant 0 : i32
    %c0_i32_1 = arith.constant 0 : i32
    return %c0_i32, %c0_i32_0 : i32, i32
  }
  func.func @transform_3(%arg0: i32) -> (i32, i32) {
    %c0_i32 = arith.constant 0 : i32
    %c0_i32_0 = arith.constant 0 : i32
    %c0_i32_1 = arith.constant 0 : i32
    return %c0_i32, %c0_i32_0 : i32, i32
  }
  func.func @transform_4(%arg0: i32) -> (i32, i32) {
    %c0_i32 = arith.constant 0 : i32
    %c0_i32_0 = arith.constant 0 : i32
    %c0_i32_1 = arith.constant 0 : i32
    return %c0_i32, %c0_i32_0 : i32, i32
  }
  func.func @transform_5(%arg0: i32) -> (i32, i32) {
    %c0_i32 = arith.constant 0 : i32
    %c0_i32_0 = arith.constant 0 : i32
    %c0_i32_1 = arith.constant 0 : i32
    return %c0_i32, %c0_i32_0 : i32, i32
  }
  func.func @transform_6(%arg0: i32) -> (i32, i32) {
    %c0_i32 = arith.constant 0 : i32
    %c0_i32_0 = arith.constant 0 : i32
    %c0_i32_1 = arith.constant 0 : i32
    return %c0_i32, %c0_i32_0 : i32, i32
  }
  func.func @transform_7(%arg0: i32) -> (i32, i32) {
    %c0_i32 = arith.constant 0 : i32
    %c0_i32_0 = arith.constant 0 : i32
    %c0_i32_1 = arith.constant 0 : i32
    return %c0_i32, %c0_i32_0 : i32, i32
  }
  func.func @transform_8(%arg0: i32) -> (i32, i32) {
    %c0_i32 = arith.constant 0 : i32
    %c0_i32_0 = arith.constant 0 : i32
    %c0_i32_1 = arith.constant 0 : i32
    return %c0_i32, %c0_i32_0 : i32, i32
  }
  func.func @transform_9(%arg0: i32) -> (i32, i32) {
    %c0_i32 = arith.constant 0 : i32
    %c0_i32_0 = arith.constant 0 : i32
    %c0_i32_1 = arith.constant 0 : i32
    return %c0_i32, %c0_i32_0 : i32, i32
  }
}

</mosaic_0001>

<bundles_post_ra>
// kernel: net_forward.1
= control target key start
LH: loop header
LB: loop body
LE: loop exit
PB: predicated region body
PF: predicated region fallthrough
CT: control target
= control target key end

     0   :  { %vm614_vm0 = vcmask 1040384   ;;  %vm181_vm1 = vcmask 203776   ;;  %vm4631_vm2 = vmmov 1   ;;  %s7656_s0 = inlined_call_operand.vmem [shape: f32[1152,25], index: 0, kind: input, shape index: {}]   ;;  %s7657_s1 = inlined_call_operand.vmem [shape: f32[25,10], index: 1, kind: input, shape index: {}]   ;;  %s7658_s2 = inlined_call_operand.vmem [shape: f32[1,10], index: 2, kind: input, shape index: {}]   ;;  %s7659_s3 = inlined_call_operand.vmem [shape: f32[250,20], index: 3, kind: input, shape index: {}]   ;;  %s7660_s4 = inlined_call_operand.vmem [shape: f32[1,320], index: 4, kind: input, shape index: {}]   ;;  %s7661_s5 = inlined_call_operand.vmem [shape: f32[320,50], index: 5, kind: input, shape index: {}]   ;;  %s7662_s6 = inlined_call_operand.vmem [shape: f32[1,50], index: 6, kind: input, shape index: {}]   ;;  %s7663_s7 = inlined_call_operand.vmem [shape: f32[50,10], index: 7, kind: input, shape index: {}]   ;;  %s7664_s8 = inlined_call_operand.vmem [shape: f32[1,10], index: 8, kind: input, shape index: {}]   ;;  %s7665_s9 = inlined_call_operand.hbm [shape: f32[2,10], index: 9, kind: output, shape index: {}]  }
   0x1   :  { %v177_v0 = vld [vmem:[%s7657_s1] sm:$0xff]  ;;  %v178_v1 = vld [vmem:[%s7657_s1 + $0x8] sm:$0xff]  ;;  %v179_v2 = vld [vmem:[%s7657_s1 + $0x10] sm:$0xff] }
   0x2   :  { %v4383_v3 = vpack.c.bf16 %v178_v1, %v177_v0  ;;  %v180_v4 = vld [vmem:[%s7657_s1 + $0x18] sm:$0x1]  ;;  %v33_v5 = vld [vmem:[%s7656_s0] sm:$0xff]  ;;  %vm4388_vm3 = vmpackc.low %vm614_vm0, %vm4631_vm2 }
   0x3   :  { %v4387_v6 = vpack.c.bf16 %v180_v4, %v179_v2  ;;  %4131 = vmatprep.mubr.msk.f32.mxu0 %vm181_vm1, %v33_v5  ;;  %v131_v7 = vld [vmem:[%s7656_s0 + $0x310] sm:$0xff]  ;;  %v34_v8 = vld [vmem:[%s7656_s0 + $0x8] sm:$0xff]  ;;  %v132_v9 = vld [vmem:[%s7656_s0 + $0x318] sm:$0xff] }
   0x4   :  { %4384 = vmatprep.subr.bf16.mxu0 %v4383_v3  ;;  %4479 = vmatprep.subr.bf16.mxu1 %v4383_v3  ;;  %v35_v10 = vld [vmem:[%s7656_s0 + $0x10] sm:$0xff]  ;;  %v133_v11 = vld [vmem:[%s7656_s0 + $0x320] sm:$0xff]  ;;  %v36_v12 = vld [vmem:[%s7656_s0 + $0x18] sm:$0xff] }
   0x5   :  { %4386 = vmatpush3.bf16.msra.mxu0 %v4383_v3  ;;  %4481 = vmatpush3.bf16.msra.mxu1 %v4383_v3  ;;  %v134_v13 = vld [vmem:[%s7656_s0 + $0x328] sm:$0xff]  ;;  %v37_v14 = vld [vmem:[%s7656_s0 + $0x20] sm:$0xff]  ;;  %v135_v15 = vld [vmem:[%s7656_s0 + $0x330] sm:$0xff] }
   0x6   :  { %4389 = vmatprep.subr.msk.bf16.mxu0 %vm4388_vm3, %v4387_v6  ;;  %4480 = vmatprep.subr.msk.bf16.mxu1 %vm4388_vm3, %v4387_v6  ;;  %v38_v16 = vld [vmem:[%s7656_s0 + $0x28] sm:$0xff]  ;;  %v136_v17 = vld [vmem:[%s7656_s0 + $0x338] sm:$0xff]  ;;  %v39_v18 = vld [vmem:[%s7656_s0 + $0x30] sm:$0xff] }
   0x7   :  { %4278 = vmatprep.mubr.msk.f32.mxu1 %vm181_vm1, %v131_v7  ;;  %v137_v19 = vld [vmem:[%s7656_s0 + $0x340] sm:$0xff]  ;;  %v40_v20 = vld [vmem:[%s7656_s0 + $0x38] sm:$0xff]  ;;  %v138_v21 = vld [vmem:[%s7656_s0 + $0x348] sm:$0xff] }
   0x8   :  { %v41_v22 = vld [vmem:[%s7656_s0 + $0x40] sm:$0xff]  ;;  %v139_v23 = vld [vmem:[%s7656_s0 + $0x350] sm:$0xff]  ;;  %v42_v24 = vld [vmem:[%s7656_s0 + $0x48] sm:$0xff] }
   0x9   :  { %4392 = vmatpush3.bf16.msk.msra.mxu0 %vm4388_vm3, %v4387_v6  ;;  %4482 = vmatpush3.bf16.msk.msra.mxu1 %vm4388_vm3, %v4387_v6  ;;  %v140_v25 = vld [vmem:[%s7656_s0 + $0x358] sm:$0xff]  ;;  %v43_v26 = vld [vmem:[%s7656_s0 + $0x50] sm:$0xff]  ;;  %v141_v27 = vld [vmem:[%s7656_s0 + $0x360] sm:$0xff] }
   0xa   :  { %v44_v28 = vld [vmem:[%s7656_s0 + $0x58] sm:$0xff]  ;;  %v142_v29 = vld [vmem:[%s7656_s0 + $0x368] sm:$0xff]  ;;  %v45_v30 = vld [vmem:[%s7656_s0 + $0x60] sm:$0xff] }
   0xb   :  { %v143_v31 = vld [vmem:[%s7656_s0 + $0x370] sm:$0xff]  ;;  %v46_v32 = vld [vmem:[%s7656_s0 + $0x68] sm:$0xff]  ;;  %v144_v33 = vld [vmem:[%s7656_s0 + $0x378] sm:$0xff] }
   0xc   :  { %4132 = vmatmul.mubr.msk.f32.vlgmr.msra.gmra.mrb[0].mxu0 %vm181_vm1, %v34_v8  ;;  %4279 = vmatmul.mubr.msk.f32.vlgmr.msra.gmra.mrb[0].mxu1 %vm181_vm1, %v132_v9  ;;  %v47_v34 = vld [vmem:[%s7656_s0 + $0x70] sm:$0xff]  ;;  %v145_v35 = vld [vmem:[%s7656_s0 + $0x380] sm:$0xff]  ;;  %v48_v36 = vld [vmem:[%s7656_s0 + $0x78] sm:$0xff] }
   0xd   :  { %4134 = vmatprep.mubr.msk.f32.mxu0 %vm181_vm1, %v35_v10  ;;  %4281 = vmatprep.mubr.msk.f32.mxu1 %vm181_vm1, %v133_v11  ;;  %v146_v37 = vld [vmem:[%s7656_s0 + $0x388] sm:$0xff]  ;;  %v49_v38 = vld [vmem:[%s7656_s0 + $0x80] sm:$0xff]  ;;  %v147_v39 = vld [vmem:[%s7656_s0 + $0x390] sm:$0xff] }
   0xe   :  { %v50_v40 = vld [vmem:[%s7656_s0 + $0x88] sm:$0xff]  ;;  %v148_v41 = vld [vmem:[%s7656_s0 + $0x398] sm:$0xff]  ;;  %v51_v42 = vld [vmem:[%s7656_s0 + $0x90] sm:$0xff] }
   0xf   :  { %v149_v43 = vld [vmem:[%s7656_s0 + $0x3a0] sm:$0xff]  ;;  %v52_v44 = vld [vmem:[%s7656_s0 + $0x98] sm:$0xff]  ;;  %v150_v45 = vld [vmem:[%s7656_s0 + $0x3a8] sm:$0xff] }
  0x10   :  { %4135 = vmatmul.mubr.msk.f32.gmra.mrb[2].mxu0 %vm181_vm1, %v36_v12  ;;  %4282 = vmatmul.mubr.msk.f32.gmra.mrb[2].mxu1 %vm181_vm1, %v134_v13  ;;  %v53_v46 = vld [vmem:[%s7656_s0 + $0xa0] sm:$0xff]  ;;  %v151_v47 = vld [vmem:[%s7656_s0 + $0x3b0] sm:$0xff] }
  0x11   :  { %4137 = vmatprep.mubr.msk.f32.mxu0 %vm181_vm1, %v37_v14  ;;  %4284 = vmatprep.mubr.msk.f32.mxu1 %vm181_vm1, %v135_v15 }
  0x14   :  { %4138 = vmatmul.mubr.msk.f32.gmra.mrb[4].mxu0 %vm181_vm1, %v38_v16  ;;  %4285 = vmatmul.mubr.msk.f32.gmra.mrb[4].mxu1 %vm181_vm1, %v136_v17 }
  0x15   :  { %4140 = vmatprep.mubr.msk.f32.mxu0 %vm181_vm1, %v39_v18  ;;  %4287 = vmatprep.mubr.msk.f32.mxu1 %vm181_vm1, %v137_v19 }
  0x18   :  { %4141 = vmatmul.mubr.msk.f32.gmra.mrb[6].mxu0 %vm181_vm1, %v40_v20  ;;  %4288 = vmatmul.mubr.msk.f32.gmra.mrb[6].mxu1 %vm181_vm1, %v138_v21 }
  0x19   :  { %4143 = vmatprep.mubr.msk.f32.mxu0 %vm181_vm1, %v41_v22  ;;  %4290 = vmatprep.mubr.msk.f32.mxu1 %vm181_vm1, %v139_v23 }
  0x1c   :  { %4144 = vmatmul.mubr.msk.f32.gmra.mrb[8].mxu0 %vm181_vm1, %v42_v24  ;;  %4291 = vmatmul.mubr.msk.f32.gmra.mrb[8].mxu1 %vm181_vm1, %v140_v25 }
  0x1d   :  { %4146 = vmatprep.mubr.msk.f32.mxu0 %vm181_vm1, %v43_v26  ;;  %4293 = vmatprep.mubr.msk.f32.mxu1 %vm181_vm1, %v141_v27 }
  0x20   :  { %4147 = vmatmul.mubr.msk.f32.gmra.mrb[10].mxu0 %vm181_vm1, %v44_v28  ;;  %4294 = vmatmul.mubr.msk.f32.gmra.mrb[10].mxu1 %vm181_vm1, %v142_v29 }
  0x21   :  { %4149 = vmatprep.mubr.msk.f32.mxu0 %vm181_vm1, %v45_v30  ;;  %4296 = vmatprep.mubr.msk.f32.mxu1 %vm181_vm1, %v143_v31 }
  0x24   :  { %4150 = vmatmul.mubr.msk.f32.gmra.mrb[12].mxu0 %vm181_vm1, %v46_v32  ;;  %4297 = vmatmul.mubr.msk.f32.gmra.mrb[12].mxu1 %vm181_vm1, %v144_v33 }
  0x25   :  { %4152 = vmatprep.mubr.msk.f32.mxu0 %vm181_vm1, %v47_v34  ;;  %4299 = vmatprep.mubr.msk.f32.mxu1 %vm181_vm1, %v145_v35 }
  0x28   :  { %4153 = vmatmul.mubr.msk.f32.gmra.mrb[14].mxu0 %vm181_vm1, %v48_v36  ;;  %4300 = vmatmul.mubr.msk.f32.gmra.mrb[14].mxu1 %vm181_vm1, %v146_v37 }
  0x29   :  { %4155 = vmatprep.mubr.msk.f32.mxu0 %vm181_vm1, %v49_v38  ;;  %4302 = vmatprep.mubr.msk.f32.mxu1 %vm181_vm1, %v147_v39 }
  0x2c   :  { %4156 = vmatmul.mubr.msk.f32.gmra.mrb[16].mxu0 %vm181_vm1, %v50_v40  ;;  %4303 = vmatmul.mubr.msk.f32.gmra.mrb[16].mxu1 %vm181_vm1, %v148_v41 }
  0x2d   :  { %4158 = vmatprep.mubr.msk.f32.mxu0 %vm181_vm1, %v51_v42  ;;  %4305 = vmatprep.mubr.msk.f32.mxu1 %vm181_vm1, %v149_v43 }
  0x2e   :  { %14 = vsyncpa [#allocation3], 0  ;;  %v54_v48 = vld [vmem:[%s7656_s0 + $0xa8] sm:$0xff]  ;;  %v152_v49 = vld [vmem:[%s7656_s0 + $0x3b8] sm:$0xff]  ;;  %s4632_s20 = smov 20   ;;  %s4633_s1 = smov 10  }
  0x2f   :  { %v55_v50 = vld [vmem:[%s7656_s0 + $0xb0] sm:$0xff]  ;;  %v153_v51 = vld [vmem:[%s7656_s0 + $0x3c0] sm:$0xff]  ;;  %v56_v52 = vld [vmem:[%s7656_s0 + $0xb8] sm:$0xff]  ;;  %s4634_s21 = smov 30   ;;  %s4635_s22 = smov 40   ;;  %vm1592_vm4 = vcmask 1046528  }
  0x30   :  { %4159 = vmatmul.mubr.msk.f32.gmra.mrb[18].mxu0 %vm181_vm1, %v52_v44  ;;  %4306 = vmatmul.mubr.msk.f32.gmra.mrb[18].mxu1 %vm181_vm1, %v150_v45  ;;  %v154_v53 = vld [vmem:[%s7656_s0 + $0x3c8] sm:$0xff]  ;;  %v57_v54 = vld [vmem:[%s7656_s0 + $0xc0] sm:$0xff]  ;;  %v155_v55 = vld [vmem:[%s7656_s0 + $0x3d0] sm:$0xff]  ;;  %vm1606_vm5 = vcmask 1044480   ;;  %vm1599_vm6 = vcmask 1045504   ;;  %vm1613_vm7 = vcmask 1043456  }
  0x31   :  { %4161 = vmatprep.mubr.msk.f32.mxu0 %vm181_vm1, %v53_v46  ;;  %4308 = vmatprep.mubr.msk.f32.mxu1 %vm181_vm1, %v151_v47  ;;  %v58_v56 = vld [vmem:[%s7656_s0 + $0xc8] sm:$0xff]  ;;  %v156_v57 = vld [vmem:[%s7656_s0 + $0x3d8] sm:$0xff]  ;;  %v59_v58 = vld [vmem:[%s7656_s0 + $0xd0] sm:$0xff]  ;;  %vm1620_vm8 = vcmask 80896   ;;  %vm1622_vm9 = vcmask 162816   ;;  %vm1624_vm10 = vcmask 244736  }
  0x32   :  { %v157_v59 = vld [vmem:[%s7656_s0 + $0x3e0] sm:$0xff]  ;;  %v60_v60 = vld [vmem:[%s7656_s0 + $0xd8] sm:$0xff]  ;;  %v158_v61 = vld [vmem:[%s7656_s0 + $0x3e8] sm:$0xff]  ;;  %vm1626_vm11 = vcmask 326656   ;;  %s4637_s25 = smov 100   ;;  %s4638_s26 = smov 22  }
  0x33   :  { %v61_v62 = vld [vmem:[%s7656_s0 + $0xe0] sm:$0xff]  ;;  %v159_v63 = vld [vmem:[%s7656_s0 + $0x3f0] sm:$0xff]  ;;  %v62_v0 = vld [vmem:[%s7656_s0 + $0xe8] sm:$0xff]  ;;  %s4639_s11 = smov 50   ;;  %vm2977_vm12 = vcmask 1041408   ;;  %vm2430_vm14 = vcmask 179200  }
  0x34   :  { %4162 = vmatmul.mubr.msk.f32.gmra.mrb[20].mxu0 %vm181_vm1, %v54_v48  ;;  %4309 = vmatmul.mubr.msk.f32.gmra.mrb[20].mxu1 %vm181_vm1, %v152_v49  ;;  %v160_v1 = vld [vmem:[%s7656_s0 + $0x3f8] sm:$0xff]  ;;  %v63_v2 = vld [vmem:[%s7656_s0 + $0xf0] sm:$0xff]  ;;  %v161_v3 = vld [vmem:[%s7656_s0 + $0x400] sm:$0xff]  ;;  %vm2432_vm15 = vcmask 588800   ;;  %vm2428_vm3 = vcmask 818176   ;;  %s4643_s16 = smov 120  }
  0x35   :  { %4164 = vmatprep.mubr.msk.f32.mxu0 %vm181_vm1, %v55_v50  ;;  %4311 = vmatprep.mubr.msk.f32.mxu1 %vm181_vm1, %v153_v51  ;;  %v64_v4 = vld [vmem:[%s7656_s0 + $0xf8] sm:$0xff]  ;;  %v162_v5 = vld [vmem:[%s7656_s0 + $0x408] sm:$0xff]  ;;  %v65_v6 = vld [vmem:[%s7656_s0 + $0x100] sm:$0xff]  ;;  %s4644_s23 = smov 32   ;;  %s4646_s29 = smov 92  }
  0x36   :  { %v163_v7 = vld [vmem:[%s7656_s0 + $0x410] sm:$0xff]  ;;  %v66_v8 = vld [vmem:[%s7656_s0 + $0x108] sm:$0xff]  ;;  %v164_v9 = vld [vmem:[%s7656_s0 + $0x418] sm:$0xff]  ;;  %s4647_s14 = smov 4   ;;  %s4649_s15 = smov 112  }
  0x37   :  { %v67_v10 = vld [vmem:[%s7656_s0 + $0x110] sm:$0xff]  ;;  %v165_v11 = vld [vmem:[%s7656_s0 + $0x420] sm:$0xff]  ;;  %v68_v12 = vld [vmem:[%s7656_s0 + $0x118] sm:$0xff] }
  0x38   :  { %4165 = vmatmul.mubr.msk.f32.gmra.mrb[22].mxu0 %vm181_vm1, %v56_v52  ;;  %4312 = vmatmul.mubr.msk.f32.gmra.mrb[22].mxu1 %vm181_vm1, %v154_v53  ;;  %v166_v13 = vld [vmem:[%s7656_s0 + $0x428] sm:$0xff]  ;;  %v69_v14 = vld [vmem:[%s7656_s0 + $0x120] sm:$0xff]  ;;  %v167_v15 = vld [vmem:[%s7656_s0 + $0x430] sm:$0xff] }
  0x39   :  { %4167 = vmatprep.mubr.msk.f32.mxu0 %vm181_vm1, %v57_v54  ;;  %4314 = vmatprep.mubr.msk.f32.mxu1 %vm181_vm1, %v155_v55  ;;  %v70_v16 = vld [vmem:[%s7656_s0 + $0x128] sm:$0xff]  ;;  %v168_v17 = vld [vmem:[%s7656_s0 + $0x438] sm:$0xff]  ;;  %v71_v18 = vld [vmem:[%s7656_s0 + $0x130] sm:$0xff] }
  0x3a   :  { %v169_v19 = vld [vmem:[%s7656_s0 + $0x440] sm:$0xff]  ;;  %v72_v20 = vld [vmem:[%s7656_s0 + $0x138] sm:$0xff]  ;;  %v170_v21 = vld [vmem:[%s7656_s0 + $0x448] sm:$0xff] }
  0x3b   :  { %v73_v22 = vld [vmem:[%s7656_s0 + $0x140] sm:$0xff]  ;;  %v171_v23 = vld [vmem:[%s7656_s0 + $0x450] sm:$0xff]  ;;  %v74_v24 = vld [vmem:[%s7656_s0 + $0x148] sm:$0xff] }
  0x3c   :  { %4168 = vmatmul.mubr.msk.f32.gmra.mrb[24].mxu0 %vm181_vm1, %v58_v56  ;;  %4315 = vmatmul.mubr.msk.f32.gmra.mrb[24].mxu1 %vm181_vm1, %v156_v57  ;;  %v172_v25 = vld [vmem:[%s7656_s0 + $0x458] sm:$0xff]  ;;  %v75_v26 = vld [vmem:[%s7656_s0 + $0x150] sm:$0xff]  ;;  %v173_v27 = vld [vmem:[%s7656_s0 + $0x460] sm:$0xff] }
  0x3d   :  { %4170 = vmatprep.mubr.msk.f32.mxu0 %vm181_vm1, %v59_v58  ;;  %4317 = vmatprep.mubr.msk.f32.mxu1 %vm181_vm1, %v157_v59  ;;  %v76_v28 = vld [vmem:[%s7656_s0 + $0x158] sm:$0xff]  ;;  %v174_v29 = vld [vmem:[%s7656_s0 + $0x468] sm:$0xff]  ;;  %v77_v30 = vld [vmem:[%s7656_s0 + $0x160] sm:$0xff] }
  0x3e   :  { %v175_v31 = vld [vmem:[%s7656_s0 + $0x470] sm:$0xff]  ;;  %v78_v32 = vld [vmem:[%s7656_s0 + $0x168] sm:$0xff]  ;;  %v176_v33 = vld [vmem:[%s7656_s0 + $0x478] sm:$0xff] }
  0x3f   :  { %v79_v34 = vld [vmem:[%s7656_s0 + $0x170] sm:$0xff]  ;;  %v80_v35 = vld [vmem:[%s7656_s0 + $0x178] sm:$0xff]  ;;  %v81_v36 = vld [vmem:[%s7656_s0 + $0x180] sm:$0xff] }
  0x40   :  { %4171 = vmatmul.mubr.msk.f32.gmra.mrb[26].mxu0 %vm181_vm1, %v60_v60  ;;  %4318 = vmatmul.mubr.msk.f32.gmra.mrb[26].mxu1 %vm181_vm1, %v158_v61  ;;  %v82_v37 = vld [vmem:[%s7656_s0 + $0x188] sm:$0xff]  ;;  %v83_v38 = vld [vmem:[%s7656_s0 + $0x190] sm:$0xff]  ;;  %v84_v39 = vld [vmem:[%s7656_s0 + $0x198] sm:$0xff] }
  0x41   :  { %4173 = vmatprep.mubr.msk.f32.mxu0 %vm181_vm1, %v61_v62  ;;  %4320 = vmatprep.mubr.msk.f32.mxu1 %vm181_vm1, %v159_v63  ;;  %v85_v40 = vld [vmem:[%s7656_s0 + $0x1a0] sm:$0xff]  ;;  %v86_v41 = vld [vmem:[%s7656_s0 + $0x1a8] sm:$0xff]  ;;  %v87_v42 = vld [vmem:[%s7656_s0 + $0x1b0] sm:$0xff] }
  0x42   :  { %v88_v43 = vld [vmem:[%s7656_s0 + $0x1b8] sm:$0xff]  ;;  %v89_v44 = vld [vmem:[%s7656_s0 + $0x1c0] sm:$0xff]  ;;  %v90_v45 = vld [vmem:[%s7656_s0 + $0x1c8] sm:$0xff] }
  0x43   :  { %v91_v46 = vld [vmem:[%s7656_s0 + $0x1d0] sm:$0xff]  ;;  %v92_v47 = vld [vmem:[%s7656_s0 + $0x1d8] sm:$0xff]  ;;  %v93_v48 = vld [vmem:[%s7656_s0 + $0x1e0] sm:$0xff] }
  0x44   :  { %4174 = vmatmul.mubr.msk.f32.gmra.mrb[28].mxu0 %vm181_vm1, %v62_v0  ;;  %4321 = vmatmul.mubr.msk.f32.gmra.mrb[28].mxu1 %vm181_vm1, %v160_v1  ;;  %v94_v49 = vld [vmem:[%s7656_s0 + $0x1e8] sm:$0xff]  ;;  %v95_v50 = vld [vmem:[%s7656_s0 + $0x1f0] sm:$0xff]  ;;  %v96_v51 = vld [vmem:[%s7656_s0 + $0x1f8] sm:$0xff] }
  0x45   :  { %4176 = vmatprep.mubr.msk.f32.mxu0 %vm181_vm1, %v63_v2  ;;  %4323 = vmatprep.mubr.msk.f32.mxu1 %vm181_vm1, %v161_v3  ;;  %v97_v52 = vld [vmem:[%s7656_s0 + $0x200] sm:$0xff]  ;;  %v98_v53 = vld [vmem:[%s7656_s0 + $0x208] sm:$0xff]  ;;  %v99_v54 = vld [vmem:[%s7656_s0 + $0x210] sm:$0xff] }
  0x46   :  { %v100_v55 = vld [vmem:[%s7656_s0 + $0x218] sm:$0xff]  ;;  %v101_v56 = vld [vmem:[%s7656_s0 + $0x220] sm:$0xff]  ;;  %v102_v57 = vld [vmem:[%s7656_s0 + $0x228] sm:$0xff] }
  0x47   :  { %v103_v58 = vld [vmem:[%s7656_s0 + $0x230] sm:$0xff]  ;;  %v104_v59 = vld [vmem:[%s7656_s0 + $0x238] sm:$0xff]  ;;  %v105_v60 = vld [vmem:[%s7656_s0 + $0x240] sm:$0xff] }
  0x48   :  { %4177 = vmatmul.mubr.msk.f32.gmra.mrb[30].mxu0 %vm181_vm1, %v64_v4  ;;  %4324 = vmatmul.mubr.msk.f32.gmra.mrb[30].mxu1 %vm181_vm1, %v162_v5  ;;  %v106_v61 = vld [vmem:[%s7656_s0 + $0x248] sm:$0xff]  ;;  %v107_v62 = vld [vmem:[%s7656_s0 + $0x250] sm:$0xff]  ;;  %v108_v63 = vld [vmem:[%s7656_s0 + $0x258] sm:$0xff] }
  0x49   :  { %4179 = vmatprep.mubr.msk.f32.mxu0 %vm181_vm1, %v65_v6  ;;  %4326 = vmatprep.mubr.msk.f32.mxu1 %vm181_vm1, %v163_v7  ;;  %v109_v0 = vld [vmem:[%s7656_s0 + $0x260] sm:$0xff]  ;;  %v110_v1 = vld [vmem:[%s7656_s0 + $0x268] sm:$0xff]  ;;  %v111_v2 = vld [vmem:[%s7656_s0 + $0x270] sm:$0xff] }
  0x4a   :  { %v112_v3 = vld [vmem:[%s7656_s0 + $0x278] sm:$0xff]  ;;  %v113_v4 = vld [vmem:[%s7656_s0 + $0x280] sm:$0xff]  ;;  %v114_v5 = vld [vmem:[%s7656_s0 + $0x288] sm:$0xff] }
  0x4b   :  { %v115_v6 = vld [vmem:[%s7656_s0 + $0x290] sm:$0xff]  ;;  %v116_v7 = vld [vmem:[%s7656_s0 + $0x298] sm:$0xff]  ;;  %vm4422_vm13 = vmpackc.low %vm2977_vm12, %vm4631_vm2  ;;  %vm2426_vm2 = vcmask 408576  }
  0x4c   :  { %4180 = vmatmul.mubr.msk.f32.gmra.mrb[32].mxu0 %vm181_vm1, %v66_v8  ;;  %4327 = vmatmul.mubr.msk.f32.gmra.mrb[32].mxu1 %vm181_vm1, %v164_v9  ;;  %v117_v8 = vld [vmem:[%s7656_s0 + $0x2a0] sm:$0xff]  ;;  %v118_v9 = vld [vmem:[%s7656_s0 + $0x2a8] sm:$0xff] }
  0x4d   :  { %4182 = vmatprep.mubr.msk.f32.mxu0 %vm181_vm1, %v67_v10  ;;  %4329 = vmatprep.mubr.msk.f32.mxu1 %vm181_vm1, %v165_v11  ;;  %v119_v10 = vld [vmem:[%s7656_s0 + $0x2b0] sm:$0xff]  ;;  %v120_v11 = vld [vmem:[%s7656_s0 + $0x2b8] sm:$0xff] }
  0x50   :  { %4183 = vmatmul.mubr.msk.f32.gmra.mrb[34].mxu0 %vm181_vm1, %v68_v12  ;;  %4330 = vmatmul.mubr.msk.f32.gmra.mrb[34].mxu1 %vm181_vm1, %v166_v13  ;;  %v121_v12 = vld [vmem:[%s7656_s0 + $0x2c0] sm:$0xff]  ;;  %v122_v13 = vld [vmem:[%s7656_s0 + $0x2c8] sm:$0xff] }
  0x51   :  { %4185 = vmatprep.mubr.msk.f32.mxu0 %vm181_vm1, %v69_v14  ;;  %4332 = vmatprep.mubr.msk.f32.mxu1 %vm181_vm1, %v167_v15  ;;  %v123_v14 = vld [vmem:[%s7656_s0 + $0x2d0] sm:$0xff]  ;;  %v124_v15 = vld [vmem:[%s7656_s0 + $0x2d8] sm:$0xff] }
  0x54   :  { %4186 = vmatmul.mubr.msk.f32.gmra.mrb[36].mxu0 %vm181_vm1, %v70_v16  ;;  %4333 = vmatmul.mubr.msk.f32.gmra.mrb[36].mxu1 %vm181_vm1, %v168_v17  ;;  %v125_v16 = vld [vmem:[%s7656_s0 + $0x2e0] sm:$0xff]  ;;  %v126_v17 = vld [vmem:[%s7656_s0 + $0x2e8] sm:$0xff] }
  0x55   :  { %4188 = vmatprep.mubr.msk.f32.mxu0 %vm181_vm1, %v71_v18  ;;  %4335 = vmatprep.mubr.msk.f32.mxu1 %vm181_vm1, %v169_v19  ;;  %v127_v18 = vld [vmem:[%s7656_s0 + $0x2f0] sm:$0xff]  ;;  %v128_v19 = vld [vmem:[%s7656_s0 + $0x2f8] sm:$0xff] }
  0x58   :  { %4189 = vmatmul.mubr.msk.f32.gmra.mrb[38].mxu0 %vm181_vm1, %v72_v20  ;;  %4336 = vmatmul.mubr.msk.f32.gmra.mrb[38].mxu1 %vm181_vm1, %v170_v21  ;;  %v129_v20 = vld [vmem:[%s7656_s0 + $0x300] sm:$0xff]  ;;  %v130_v21 = vld [vmem:[%s7656_s0 + $0x308] sm:$0xff] }
  0x59   :  { %4191 = vmatprep.mubr.msk.f32.mxu0 %vm181_vm1, %v73_v22  ;;  %4338 = vmatprep.mubr.msk.f32.mxu1 %vm181_vm1, %v171_v23 }
  0x5c   :  { %4192 = vmatmul.mubr.msk.f32.gmra.mrb[40].mxu0 %vm181_vm1, %v74_v24  ;;  %4339 = vmatmul.mubr.msk.f32.gmra.mrb[40].mxu1 %vm181_vm1, %v172_v25 }
  0x5d   :  { %4194 = vmatprep.mubr.msk.f32.mxu0 %vm181_vm1, %v75_v26  ;;  %4341 = vmatprep.mubr.msk.f32.mxu1 %vm181_vm1, %v173_v27 }
  0x60   :  { %4195 = vmatmul.mubr.msk.f32.gmra.mrb[42].mxu0 %vm181_vm1, %v76_v28  ;;  %4342 = vmatmul.mubr.msk.f32.gmra.mrb[42].mxu1 %vm181_vm1, %v174_v29 }
  0x61   :  { %4197 = vmatprep.mubr.msk.f32.mxu0 %vm181_vm1, %v77_v30  ;;  %4344 = vmatprep.mubr.msk.f32.mxu1 %vm181_vm1, %v175_v31 }
  0x64   :  { %4198 = vmatmul.mubr.msk.f32.gmra.mrb[44].mxu0 %vm181_vm1, %v78_v32  ;;  %4345 = vmatmul.mubr.msk.f32.gmra.mrb[44].mxu1 %vm181_vm1, %v176_v33 }
  0x65   :  { %4200 = vmatprep.mubr.msk.f32.mxu0 %vm181_vm1, %v79_v34 }
  0x68   :  { %4201 = vmatmul.mubr.msk.f32.gmra.mrb[46].mxu0 %vm181_vm1, %v80_v35 }
  0x69   :  { %4203 = vmatprep.mubr.msk.f32.mxu0 %vm181_vm1, %v81_v36 }
  0x6c   :  { %4204 = vmatmul.mubr.msk.f32.gmra.mrb[48].mxu0 %vm181_vm1, %v82_v37 }
  0x6d   :  { %4206 = vmatprep.mubr.msk.f32.mxu0 %vm181_vm1, %v83_v38 }
  0x70   :  { %4207 = vmatmul.mubr.msk.f32.gmra.mrb[50].mxu0 %vm181_vm1, %v84_v39 }
  0x71   :  { %4209 = vmatprep.mubr.msk.f32.mxu0 %vm181_vm1, %v85_v40 }
  0x74   :  { %4210 = vmatmul.mubr.msk.f32.gmra.mrb[52].mxu0 %vm181_vm1, %v86_v41 }
  0x75   :  { %4212 = vmatprep.mubr.msk.f32.mxu0 %vm181_vm1, %v87_v42 }
  0x78   :  { %4213 = vmatmul.mubr.msk.f32.gmra.mrb[54].mxu0 %vm181_vm1, %v88_v43 }
  0x79   :  { %4215 = vmatprep.mubr.msk.f32.mxu0 %vm181_vm1, %v89_v44 }
  0x7c   :  { %4216 = vmatmul.mubr.msk.f32.gmra.mrb[56].mxu0 %vm181_vm1, %v90_v45 }
  0x7d   :  { %4218 = vmatprep.mubr.msk.f32.mxu0 %vm181_vm1, %v91_v46 }
  0x80   :  { %4219 = vmatmul.mubr.msk.f32.gmra.mrb[58].mxu0 %vm181_vm1, %v92_v47 }
  0x81   :  { %4221 = vmatprep.mubr.msk.f32.mxu0 %vm181_vm1, %v93_v48 }
  0x84   :  { %4222 = vmatmul.mubr.msk.f32.gmra.mrb[60].mxu0 %vm181_vm1, %v94_v49 }
  0x85   :  { %4224 = vmatprep.mubr.msk.f32.mxu0 %vm181_vm1, %v95_v50 }
  0x88   :  { %4225 = vmatmul.mubr.msk.f32.gmra.mrb[62].mxu0 %vm181_vm1, %v96_v51 }
  0x89   :  { %4227 = vmatprep.mubr.msk.f32.mxu0 %vm181_vm1, %v97_v52 }
  0x8c   :  { %4228 = vmatmul.mubr.msk.f32.gmra.mrb[64].mxu0 %vm181_vm1, %v98_v53 }
  0x8d   :  { %4230 = vmatprep.mubr.msk.f32.mxu0 %vm181_vm1, %v99_v54 }
  0x90   :  { %4231 = vmatmul.mubr.msk.f32.gmra.mrb[66].mxu0 %vm181_vm1, %v100_v55 }
  0x91   :  { %4233 = vmatprep.mubr.msk.f32.mxu0 %vm181_vm1, %v101_v56 }
  0x94   :  { %4234 = vmatmul.mubr.msk.f32.gmra.mrb[68].mxu0 %vm181_vm1, %v102_v57 }
  0x95   :  { %4236 = vmatprep.mubr.msk.f32.mxu0 %vm181_vm1, %v103_v58 }
  0x98   :  { %4237 = vmatmul.mubr.msk.f32.gmra.mrb[70].mxu0 %vm181_vm1, %v104_v59 }
  0x99   :  { %4239 = vmatprep.mubr.msk.f32.mxu0 %vm181_vm1, %v105_v60 }
  0x9c   :  { %4240 = vmatmul.mubr.msk.f32.gmra.mrb[72].mxu0 %vm181_vm1, %v106_v61 }
  0x9d   :  { %4242 = vmatprep.mubr.msk.f32.mxu0 %vm181_vm1, %v107_v62 }
  0xa0   :  { %4243 = vmatmul.mubr.msk.f32.gmra.mrb[74].mxu0 %vm181_vm1, %v108_v63 }
  0xa1   :  { %4245 = vmatprep.mubr.msk.f32.mxu0 %vm181_vm1, %v109_v0 }
  0xa4   :  { %4246 = vmatmul.mubr.msk.f32.gmra.mrb[76].mxu0 %vm181_vm1, %v110_v1 }
  0xa5   :  { %4248 = vmatprep.mubr.msk.f32.mxu0 %vm181_vm1, %v111_v2 }
  0xa8   :  { %4249 = vmatmul.mubr.msk.f32.gmra.mrb[78].mxu0 %vm181_vm1, %v112_v3 }
  0xa9   :  { %4251 = vmatprep.mubr.msk.f32.mxu0 %vm181_vm1, %v113_v4 }
  0xac   :  { %4252 = vmatmul.mubr.msk.f32.gmra.mrb[80].mxu0 %vm181_vm1, %v114_v5 }
  0xad   :  { %4254 = vmatprep.mubr.msk.f32.mxu0 %vm181_vm1, %v115_v6 }
  0xb0   :  { %4255 = vmatmul.mubr.msk.f32.gmra.mrb[82].mxu0 %vm181_vm1, %v116_v7 }
  0xb1   :  { %4257 = vmatprep.mubr.msk.f32.mxu0 %vm181_vm1, %v117_v8 }
  0xb4   :  { %4258 = vmatmul.mubr.msk.f32.gmra.mrb[84].mxu0 %vm181_vm1, %v118_v9 }
  0xb5   :  { %4260 = vmatprep.mubr.msk.f32.mxu0 %vm181_vm1, %v119_v10 }
  0xb8   :  { %4261 = vmatmul.mubr.msk.f32.gmra.mrb[86].mxu0 %vm181_vm1, %v120_v11 }
  0xb9   :  { %4263 = vmatprep.mubr.msk.f32.mxu0 %vm181_vm1, %v121_v12 }
  0xbc   :  { %4264 = vmatmul.mubr.msk.f32.gmra.mrb[88].mxu0 %vm181_vm1, %v122_v13 }
  0xbd   :  { %4266 = vmatprep.mubr.msk.f32.mxu0 %vm181_vm1, %v123_v14 }
  0xc0   :  { %4267 = vmatmul.mubr.msk.f32.gmra.mrb[90].mxu0 %vm181_vm1, %v124_v15 }
  0xc1   :  { %4269 = vmatprep.mubr.msk.f32.mxu0 %vm181_vm1, %v125_v16 }
  0xc4   :  { %4270 = vmatmul.mubr.msk.f32.gmra.mrb[92].mxu0 %vm181_vm1, %v126_v17 }
  0xc5   :  { %4272 = vmatprep.mubr.msk.f32.mxu0 %vm181_vm1, %v127_v18 }
  0xc8   :  { %4273 = vmatmul.mubr.msk.f32.gmra.mrb[94].mxu0 %vm181_vm1, %v128_v19 }
  0xc9   :  { %4275 = vmatprep.mubr.msk.f32.mxu0 %vm181_vm1, %v129_v20 }
  0xcc   :  { %4276 = vmatmul.mubr.msk.f32.gmra.mrb[96].mxu0 %vm181_vm1, %v130_v21  ;;  %vm2936_vm1 = vcmask 998400  }
  0xdf   :  { %v5295_v22 = vpop.f32.mrb[0].mxu0  ;;  %v5297_v23 = vpop.f32.mrb[0].mxu1 }
  0xe0   :  { %v5299_v24 = vpop.f32.mrb[1].mxu0  ;;  %v5301_v25 = vpop.f32.mrb[1].mxu1 }
  0xe3   :  { %v5303_v26 = vpop.f32.mrb[2].mxu0  ;;  %v5305_v27 = vpop.f32.mrb[2].mxu1 }
  0xe4   :  { %7738 = vst [vmem:[#allocation5_spill] sm:$0xff] %v5303_v26  ;;  %v5307_v28 = vpop.f32.mrb[3].mxu0  ;;  %v5309_v29 = vpop.f32.mrb[3].mxu1 }
  0xe5   :  { %7739 = vst [vmem:[#allocation6_spill] sm:$0xff] %v5307_v28 }
  0xe7   :  { %v5311_v30 = vpop.f32.mrb[4].mxu0  ;;  %v5313_v31 = vpop.f32.mrb[4].mxu1 }
  0xe8   :  { %7740 = vst [vmem:[#allocation7_spill] sm:$0xff] %v5311_v30  ;;  %v5315_v32 = vpop.f32.mrb[5].mxu0  ;;  %v5317_v33 = vpop.f32.mrb[5].mxu1 }
  0xe9   :  { %7741 = vst [vmem:[#allocation8_spill] sm:$0xff] %v5315_v32 }
  0xeb   :  { %v5319_v34 = vpop.f32.mrb[6].mxu0  ;;  %v5321_v35 = vpop.f32.mrb[6].mxu1 }
  0xec   :  { %7742 = vst [vmem:[#allocation9_spill] sm:$0xff] %v5319_v34  ;;  %v5323_v36 = vpop.f32.mrb[7].mxu0  ;;  %v5325_v37 = vpop.f32.mrb[7].mxu1 }
  0xed   :  { %7743 = vst [vmem:[#allocation10_spill] sm:$0xff] %v5323_v36 }
  0xef   :  { %v5327_v38 = vpop.f32.mrb[8].mxu0  ;;  %v5329_v39 = vpop.f32.mrb[8].mxu1 }
  0xf0   :  { %7744 = vst [vmem:[#allocation11_spill] sm:$0xff] %v5327_v38  ;;  %v5331_v40 = vpop.f32.mrb[9].mxu0  ;;  %v5333_v41 = vpop.f32.mrb[9].mxu1 }
  0xf3   :  { %v5335_v42 = vpop.f32.mrb[10].mxu0  ;;  %v5337_v43 = vpop.f32.mrb[10].mxu1 }
  0xf4   :  { %v5339_v44 = vpop.f32.mrb[11].mxu0  ;;  %v5341_v45 = vpop.f32.mrb[11].mxu1 }
  0xf7   :  { %v5343_v46 = vpop.f32.mrb[12].mxu0  ;;  %v5345_v47 = vpop.f32.mrb[12].mxu1 }
  0xf8   :  { %v5347_v48 = vpop.f32.mrb[13].mxu0  ;;  %v5349_v49 = vpop.f32.mrb[13].mxu1 }
  0xf9   :  { %7745 = vst [vmem:[#allocation12_spill] sm:$0xff] %v5349_v49 }
  0xfb   :  { %v5351_v50 = vpop.f32.mrb[14].mxu0  ;;  %v5353_v51 = vpop.f32.mrb[14].mxu1 }
  0xfc   :  { %7746 = vst [vmem:[#allocation13_spill] sm:$0xff] %v5353_v51  ;;  %v5355_v52 = vpop.f32.mrb[15].mxu0  ;;  %v5357_v53 = vpop.f32.mrb[15].mxu1 }
  0xfd   :  { %7747 = vst [vmem:[#allocation14_spill] sm:$0xff] %v5357_v53 }
  0xff   :  { %v5359_v54 = vpop.f32.mrb[16].mxu0  ;;  %v5361_v55 = vpop.f32.mrb[16].mxu1 }
 0x100   :  { %7748 = vst [vmem:[#allocation15_spill] sm:$0xff] %v5361_v55  ;;  %v5363_v56 = vpop.f32.mrb[17].mxu0  ;;  %v5365_v57 = vpop.f32.mrb[17].mxu1 }
 0x101   :  { %7749 = vst [vmem:[#allocation16_spill] sm:$0xff] %v5365_v57 }
 0x103   :  { %v5367_v58 = vpop.f32.mrb[18].mxu0  ;;  %v5369_v59 = vpop.f32.mrb[18].mxu1 }
 0x104   :  { %7750 = vst [vmem:[#allocation17_spill] sm:$0xff] %v5369_v59  ;;  %v5371_v60 = vpop.f32.mrb[19].mxu0  ;;  %v5373_v61 = vpop.f32.mrb[19].mxu1 }
 0x105   :  { %7751 = vst [vmem:[#allocation18_spill] sm:$0xff] %v5373_v61 }
 0x107   :  { %v5375_v62 = vpop.f32.mrb[20].mxu0  ;;  %v5377_v63 = vpop.f32.mrb[20].mxu1 }
 0x108   :  { %7752 = vst [vmem:[#allocation19_spill] sm:$0xff] %v5375_v62  ;;  %7753 = vst [vmem:[#allocation20_spill] sm:$0xff] %v5377_v63  ;;  %v5379_v0 = vpop.f32.mrb[21].mxu0  ;;  %v5381_v1 = vpop.f32.mrb[21].mxu1 }
 0x109   :  { %7754 = vst [vmem:[#allocation21_spill] sm:$0xff] %v5379_v0  ;;  %7755 = vst [vmem:[#allocation22_spill] sm:$0xff] %v5381_v1 }
 0x10b   :  { %v5383_v2 = vpop.f32.mrb[22].mxu0  ;;  %v5385_v3 = vpop.f32.mrb[22].mxu1 }
 0x10c   :  { %7756 = vst [vmem:[#allocation23_spill] sm:$0xff] %v5385_v3  ;;  %v5387_v4 = vpop.f32.mrb[23].mxu0  ;;  %v5389_v5 = vpop.f32.mrb[23].mxu1 }
 0x10d   :  { %7757 = vst [vmem:[#allocation24_spill] sm:$0xff] %v5389_v5 }
 0x10f   :  { %v5391_v6 = vpop.f32.mrb[24].mxu0  ;;  %v5393_v7 = vpop.f32.mrb[24].mxu1 }
 0x110   :  { %7758 = vst [vmem:[#allocation25_spill] sm:$0xff] %v5393_v7  ;;  %v5395_v8 = vpop.f32.mrb[25].mxu0  ;;  %v5397_v9 = vpop.f32.mrb[25].mxu1 }
 0x111   :  { %7759 = vst [vmem:[#allocation26_spill] sm:$0xff] %v5397_v9 }
 0x113   :  { %v5399_v10 = vpop.f32.mrb[26].mxu0  ;;  %v5401_v11 = vpop.f32.mrb[26].mxu1 }
 0x114   :  { %7760 = vst [vmem:[#allocation27_spill] sm:$0xff] %v5401_v11  ;;  %v5403_v12 = vpop.f32.mrb[27].mxu0  ;;  %v5405_v13 = vpop.f32.mrb[27].mxu1 }
 0x115   :  { %7761 = vst [vmem:[#allocation28_spill] sm:$0xff] %v5405_v13 }
 0x117   :  { %v5407_v14 = vpop.f32.mrb[28].mxu0  ;;  %v5409_v15 = vpop.f32.mrb[28].mxu1 }
 0x118   :  { %7762 = vst [vmem:[#allocation29_spill] sm:$0xff] %v5409_v15  ;;  %v5411_v16 = vpop.f32.mrb[29].mxu0  ;;  %v5413_v17 = vpop.f32.mrb[29].mxu1 }
 0x119   :  { %7763 = vst [vmem:[#allocation30_spill] sm:$0xff] %v5413_v17 }
 0x11b   :  { %v5415_v18 = vpop.f32.mrb[30].mxu0  ;;  %v5417_v19 = vpop.f32.mrb[30].mxu1 }
 0x11c   :  { %7764 = vst [vmem:[#allocation31_spill] sm:$0xff] %v5417_v19  ;;  %v5419_v20 = vpop.f32.mrb[31].mxu0  ;;  %v5421_v21 = vpop.f32.mrb[31].mxu1 }
 0x11d   :  { %7765 = vst [vmem:[#allocation32_spill] sm:$0xff] %v5421_v21 }
 0x11f   :  { %v5423_v11 = vpop.f32.mrb[32].mxu0  ;;  %v5425_v9 = vpop.f32.mrb[32].mxu1 }
 0x120   :  { %7766 = vst [vmem:[#allocation33_spill] sm:$0xff] %v5425_v9  ;;  %v5427_v13 = vpop.f32.mrb[33].mxu0  ;;  %v5429_v7 = vpop.f32.mrb[33].mxu1 }
 0x121   :  { %7767 = vst [vmem:[#allocation34_spill] sm:$0xff] %v5429_v7 }
 0x123   :  { %v5431_v15 = vpop.f32.mrb[34].mxu0  ;;  %v5433_v5 = vpop.f32.mrb[34].mxu1 }
 0x124   :  { %7768 = vst [vmem:[#allocation35_spill] sm:$0xff] %v5433_v5  ;;  %v5435_v17 = vpop.f32.mrb[35].mxu0  ;;  %v5437_v3 = vpop.f32.mrb[35].mxu1 }
 0x125   :  { %7769 = vst [vmem:[#allocation36_spill] sm:$0xff] %v5437_v3 }
 0x127   :  { %v5439_v19 = vpop.f32.mrb[36].mxu0  ;;  %v5441_v1 = vpop.f32.mrb[36].mxu1 }
 0x128   :  { %v5447_v63 = vpop.f32.mrb[37].mxu0  ;;  %v5449_v7 = vpop.f32.mrb[37].mxu1 }
 0x12b   :  { %v5455_v61 = vpop.f32.mrb[38].mxu0  ;;  %v5457_v59 = vpop.f32.mrb[38].mxu1 }
 0x12c   :  { %7770 = vst [vmem:[#allocation37_spill] sm:$0xff] %v5455_v61  ;;  %v5463_v57 = vpop.f32.mrb[39].mxu0  ;;  %v5465_v55 = vpop.f32.mrb[39].mxu1 }
 0x12d   :  { %7771 = vst [vmem:[#allocation38_spill] sm:$0xff] %v5463_v57 }
 0x12f   :  { %v5471_v53 = vpop.f32.mrb[40].mxu0  ;;  %v5473_v51 = vpop.f32.mrb[40].mxu1 }
 0x130   :  { %7772 = vst [vmem:[#allocation39_spill] sm:$0xff] %v5471_v53  ;;  %v5479_v61 = vpop.f32.mrb[41].mxu0  ;;  %v5481_v26 = vpop.f32.mrb[41].mxu1 }
 0x131   :  { %7773 = vst [vmem:[#allocation40_spill] sm:$0xff] %v5479_v61 }
 0x133   :  { %v5487_v57 = vpop.f32.mrb[42].mxu0  ;;  %v5489_v28 = vpop.f32.mrb[42].mxu1 }
 0x134   :  { %7774 = vst [vmem:[#allocation41_spill] sm:$0xff] %v5487_v57  ;;  %v5495_v53 = vpop.f32.mrb[43].mxu0  ;;  %v5497_v30 = vpop.f32.mrb[43].mxu1 }
 0x135   :  { %7775 = vst [vmem:[#allocation42_spill] sm:$0xff] %v5495_v53 }
 0x137   :  { %v5503_v61 = vpop.f32.mrb[44].mxu0  ;;  %v5505_v32 = vpop.f32.mrb[44].mxu1 }
 0x138   :  { %7776 = vst [vmem:[#allocation43_spill] sm:$0xff] %v5503_v61  ;;  %v5511_v57 = vpop.f32.mrb[45].mxu0  ;;  %v5513_v34 = vpop.f32.mrb[45].mxu1  ;;  %v7794_v61 = vmax.f32 %v5301_v25, %v5449_v7 }
 0x13b   :  { %v5519_v53 = vpop.f32.mrb[46].mxu0 }
 0x13c   :  { %7777 = vst [vmem:[#allocation44_spill] sm:$0xff] %v5519_v53  ;;  %v5523_v49 = vpop.f32.mrb[47].mxu0 }
 0x13d   :  { %7778 = vst [vmem:[#allocation45_spill] sm:$0xff] %v5523_v49 }
 0x13f   :  { %v5527_v9 = vpop.f32.mrb[48].mxu0 }
 0x140   :  { %7779 = vst [vmem:[#allocation46_spill] sm:$0xff] %v5527_v9  ;;  %v5531_v38 = vpop.f32.mrb[49].mxu0 }
 0x141   :  { %7780 = vst [vmem:[#allocation47_spill] sm:$0xff] %v5531_v38 }
 0x143   :  { %v5535_v3 = vpop.f32.mrb[50].mxu0 }
 0x144   :  { %7781 = vst [vmem:[#allocation48_spill] sm:$0xff] %v5535_v3  ;;  %v5539_v53 = vpop.f32.mrb[51].mxu0 }
 0x145   :  { %7782 = vst [vmem:[#allocation49_spill] sm:$0xff] %v5539_v53 }
 0x147   :  { %v5543_v49 = vpop.f32.mrb[52].mxu0 }
 0x148   :  { %7783 = vst [vmem:[#allocation50_spill] sm:$0xff] %v5543_v49  ;;  %v5547_v9 = vpop.f32.mrb[53].mxu0 }
 0x149   :  { %7784 = vst [vmem:[#allocation51_spill] sm:$0xff] %v5547_v9 }
 0x14b   :  { %v5551_v38 = vpop.f32.mrb[54].mxu0 }
 0x14c   :  { %7785 = vst [vmem:[#allocation52_spill] sm:$0xff] %v5551_v38  ;;  %v5555_v3 = vpop.f32.mrb[55].mxu0 }
 0x14d   :  { %7786 = vst [vmem:[#allocation53_spill] sm:$0xff] %v5555_v3 }
 0x14f   :  { %v5559_v53 = vpop.f32.mrb[56].mxu0 }
 0x150   :  { %7787 = vst [vmem:[#allocation54_spill] sm:$0xff] %v5559_v53  ;;  %v5563_v49 = vpop.f32.mrb[57].mxu0 }
 0x151   :  { %7788 = vst [vmem:[#allocation55_spill] sm:$0xff] %v5563_v49 }
 0x153   :  { %v5567_v9 = vpop.f32.mrb[58].mxu0 }
 0x154   :  { %7789 = vst [vmem:[#allocation56_spill] sm:$0xff] %v5567_v9  ;;  %v5571_v38 = vpop.f32.mrb[59].mxu0  ;;  %v7793_v9 = vmax.f32 %v5297_v23, %v5441_v1  ;;  %v7795_v23 = vmax.f32 %v5305_v27, %v5457_v59 }
 0x155   :  { %7790 = vst [vmem:[#allocation57_spill] sm:$0xff] %v5571_v38  ;;  %v5591_v38 = vld [vmem:[%s7658_s2] ss:$0 sm:$0xff] }
 0x157   :  { %v5575_v3 = vpop.f32.mrb[60].mxu0 }
 0x158   :  { %7791 = vst [vmem:[#allocation58_spill] sm:$0xff] %v5575_v3  ;;  %v5579_v53 = vpop.f32.mrb[61].mxu0 }
 0x159   :  { %7792 = vst [vmem:[#allocation59_spill] sm:$0xff] %v5579_v53 }
 0x15b   :  { %v4226_v49 = vpop.f32.mrb[62].mxu0 }
 0x15c   :  { %v1430_v0 = vmax.f32 %v5399_v10, %v4226_v49  ;;  %v994_v62 = vpop.f32.mrb[63].mxu0 }
 0x15d   :  { %v1429_v36 = vmax.f32 %v5403_v12, %v994_v62 }
 0x15e   :  { %v1502_v21 = vmax.f32 %v1430_v0, %v7793_v9  ;;  %v7796_v9 = vmax.f32 %v5309_v29, %v5465_v55  ;;  %v7798_v29 = vmax.f32 %v5317_v33, %v5481_v26 }
 0x15f   :  { %v1501_v3 = vmax.f32 %v1429_v36, %v7794_v61  ;;  %v4229_v5 = vpop.f32.mrb[64].mxu0 }
 0x160   :  { %v1432_v53 = vmax.f32 %v5407_v14, %v4229_v5  ;;  %v1004_v49 = vpop.f32.mrb[65].mxu0 }
 0x161   :  { %v1544_v10 = vadd.f32 %v5591_v38, %v1501_v3  ;;  %v1431_v62 = vmax.f32 %v5411_v16, %v1004_v49 }
 0x162   :  { %v1504_v0 = vmax.f32 %v1432_v53, %v7795_v23  ;;  %v7797_v53 = vmax.f32 %v5313_v31, %v5473_v51 }
 0x163   :  { %v5602_v1 = vmax.f32 %v1544_v10, 0.0  ;;  %v1503_v12 = vmax.f32 %v1431_v62, %v7796_v9  ;;  %v4232_v25 = vpop.f32.mrb[66].mxu0  ;;  %v7799_v62 = vmax.f32 %v5321_v35, %v5489_v28 }
 0x164   :  { %v1434_v36 = vmax.f32 %v5415_v18, %v4232_v25  ;;  %v1014_v61 = vpop.f32.mrb[67].mxu0  ;;  %v1547_v5 = vadd.f32 %v5591_v38, %v1504_v0  ;;  %v1545_v18 = vadd.f32 %v5591_v38, %v1502_v21  ;;  %v7800_v21 = vmax.f32 %v5325_v37, %v5497_v30 }
 0x165   :  { %v1433_v3 = vmax.f32 %v5419_v20, %v1014_v61  ;;  %v7700_v7 = vrot.slane %v5602_v1, 2  ;;  %v7698_v14 = vrot.slane %v5602_v1, 1  ;;  %v1546_v27 = vadd.f32 %v5591_v38, %v1503_v12 }
 0x166   :  { %v1506_v59 = vmax.f32 %v1434_v36, %v7797_v53  ;;  %v5627_v20 = vmax.f32 %v1547_v5, 0.0  ;;  %v7699_v33 = vrot.slane %v5602_v1, 3  ;;  %v2189_v49 = vrot.slane %v5602_v1, 4 }
 0x167   :  { %v1505_v55 = vmax.f32 %v1433_v3, %v7798_v29  ;;  %2177 = vrot.lane.b32.xlu0 %v7700_v7, %s4632_s20  ;;  %2169 = vrot.lane.b32.xlu1 %v7698_v14, %s4633_s1  ;;  %v4235_v16 = vpop.f32.mrb[68].mxu0  ;;  %v5632_v10 = vmax.f32 %v1546_v27, 0.0  ;;  %v5648_v0 = vmax.f32 %v1545_v18, 0.0  ;;  %v7801_v12 = vmax.f32 %v5329_v39, %v5505_v32 }
 0x168   :  { %v1436_v31 = vmax.f32 %v5423_v11, %v4235_v16  ;;  %v1024_v51 = vpop.f32.mrb[69].mxu0  ;;  %v2256_v30 = vrot.slane %v5627_v20, 4  ;;  %v2232_v37 = vrot.slane %v5627_v20, 1  ;;  %v7802_v61 = vmax.f32 %v5333_v41, %v5513_v34 }
 0x169   :  { %v1435_v26 = vmax.f32 %v5427_v13, %v1024_v51  ;;  %v2204_v36 = vrot.slane %v5632_v10, 1  ;;  %v2203_v32 = vrot.slane %v5648_v0, 1  ;;  %v2240_v27 = vrot.slane %v5627_v20, 2 }
 0x16a   :  { %v5637_v23 = vmax.f32 %v1436_v31, %v7799_v62  ;;  %v7803_v34 = vmax.f32 %v5295_v22, %v5439_v19  ;;  %v2216_v29 = vrot.slane %v5632_v10, 3  ;;  %v7804_v16 = vmax.f32 %v5299_v24, %v5447_v63  ;;  %v7806_v63 = vld [vmem:[#allocation5_spill] sm:$0xff] }
 0x16b   :  { %v5642_v11 = vmax.f32 %v1435_v26, %v7800_v21  ;;  %2185 = vrot.lane.b32.xlu0 %v7699_v33, %s4634_s21  ;;  %2190 = vrot.lane.b32.xlu1 %v2189_v49, %s4635_s22  ;;  %v4238_v13 = vpop.f32.mrb[70].mxu0  ;;  %v2205_v53 = vsel %vm1592_vm4, %v2203_v32, %v2204_v36  ;;  %v2215_v19 = vrot.slane %v5648_v0, 3  ;;  %v1549_v31 = vadd.f32 %v5591_v38, %v1506_v59  ;;  %v7805_v26 = vld [vmem:[#allocation12_spill] sm:$0xff]  ;;  %v7807_v62 = vld [vmem:[#allocation37_spill] sm:$0xff] }
 0x16c   :  { %v1438_v28 = vmax.f32 %v5431_v15, %v4238_v13  ;;  %v1034_v35 = vpop.f32.mrb[71].mxu0  ;;  %v1548_v51 = vadd.f32 %v5591_v38, %v1505_v55  ;;  %v2248_v24 = vrot.slane %v5627_v20, 3  ;;  %v7808_v21 = vmax.f32 %v7806_v63, %v7807_v62  ;;  %v7812_v55 = vld [vmem:[#allocation13_spill] sm:$0xff]  ;;  %v7818_v63 = vld [vmem:[#allocation40_spill] sm:$0xff] }
 0x16d   :  { %v1437_v9 = vmax.f32 %v5435_v17, %v1034_v35  ;;  %v7809_v35 = vld [vmem:[#allocation6_spill] sm:$0xff] }
 0x16e   :  { %v5657_v25 = vmax.f32 %v1438_v28, %v7801_v12  ;;  %v2217_v28 = vsel %vm1606_vm5, %v2215_v19, %v2216_v29  ;;  %v5709_v32 = vmax.f32 %v1548_v51, 0.0  ;;  %v2233_v19 = vsel %vm1592_vm4, %v2204_v36, %v2232_v37 }
 0x16f   :  { %v5663_v5 = vmax.f32 %v1437_v9, %v7802_v61  ;;  %2257 = vrot.lane.b32.xlu0 %v2256_v30, %s4635_s22  ;;  %2236 = vrot.lane.b32.xlu1 %v2232_v37, %s4633_s1  ;;  %v4241_v15 = vpop.f32.mrb[72].mxu0  ;;  %v7810_v9 = vld [vmem:[#allocation38_spill] sm:$0xff] }
 0x170   :  { %v1440_v17 = vmax.f32 %v4241_v15, %v5337_v43  ;;  %v1044_v3 = vpop.f32.mrb[73].mxu0  ;;  %v7811_v30 = vmax.f32 %v7809_v35, %v7810_v9  ;;  %v2221_v9 = vrot.slane %v5648_v0, 4 }
 0x171   :  { %v1439_v39 = vmax.f32 %v1044_v3, %v5341_v45  ;;  %v5707_v3 = vmax.f32 %v1549_v31, 0.0 }
 0x172   :  { %v5674_v41 = vmax.f32 %v7803_v34, %v1440_v17  ;;  %v2209_v17 = vrot.slane %v5648_v0, 2 }
 0x173   :  { %v5681_v43 = vmax.f32 %v7804_v16, %v1439_v39  ;;  %2244 = vrot.lane.b32.xlu1 %v2240_v27, %s4632_s20  ;;  %2206 = vrot.lane.b32.xlu0 %v2205_v53, %s4633_s1  ;;  %v4244_v45 = vpop.f32.mrb[74].mxu0  ;;  %v7813_v39 = vld [vmem:[#allocation14_spill] sm:$0xff]  ;;  %v7814_v53 = vld [vmem:[#allocation7_spill] sm:$0xff] }
 0x174   :  { %v1442_v18 = vmax.f32 %v4244_v45, %v5345_v47  ;;  %v1054_v22 = vpop.f32.mrb[75].mxu0  ;;  %v2210_v47 = vrot.slane %v5632_v10, 2  ;;  %v7815_v16 = vld [vmem:[#allocation39_spill] sm:$0xff] }
 0x175   :  { %v1441_v49 = vmax.f32 %v1054_v22, %v7805_v26  ;;  %v7816_v45 = vmax.f32 %v7814_v53, %v7815_v16  ;;  %v2222_v26 = vrot.slane %v5632_v10, 4  ;;  %v7825_v53 = vld [vmem:[#allocation10_spill] sm:$0xff] }
 0x176   :  { %v5694_v13 = vmax.f32 %v7808_v21, %v1442_v18  ;;  %v2211_v22 = vsel %vm1599_vm6, %v2209_v17, %v2210_v47  ;;  %v7820_v21 = vld [vmem:[#allocation15_spill] sm:$0xff]  ;;  %v2241_v36 = vsel %vm1599_vm6, %v2210_v47, %v2240_v27  ;;  %v7826_v16 = vld [vmem:[#allocation42_spill] sm:$0xff]  ;;  %v1550_v47 = vadd.f32 %v5591_v38, %v5642_v11 }
 0x177   :  { %v5701_v12 = vmax.f32 %v7811_v30, %v1441_v49  ;;  %2252 = vrot.lane.b32.xlu1 %v2248_v24, %s4634_s21  ;;  %2218 = vrot.lane.b32.xlu0 %v2217_v28, %s4634_s21  ;;  %v4247_v59 = vpop.f32.mrb[76].mxu0  ;;  %v7817_v49 = vld [vmem:[#allocation8_spill] sm:$0xff]  ;;  %v2223_v17 = vsel %vm1613_vm7, %v2221_v9, %v2222_v26  ;;  %v7831_v9 = vld [vmem:[#allocation43_spill] sm:$0xff]  ;;  %v2282_v11 = vrot.slane %v5709_v32, 3 }
 0x178   :  { %v1444_v61 = vmax.f32 %v4247_v59, %v7812_v55  ;;  %v1064_v15 = vpop.f32.mrb[77].mxu0  ;;  %v7819_v62 = vmax.f32 %v7817_v49, %v7818_v63  ;;  %v7821_v30 = vld [vmem:[#allocation16_spill] sm:$0xff]  ;;  %v7822_v59 = vld [vmem:[#allocation9_spill] sm:$0xff]  ;;  %v7829_v63 = vld [vmem:[#allocation18_spill] sm:$0xff] }
 0x179   :  { %v1443_v34 = vmax.f32 %v1064_v15, %v7813_v39  ;;  %v7823_v55 = vld [vmem:[#allocation41_spill] sm:$0xff]  ;;  %v2270_v39 = vrot.slane %v5709_v32, 1 }
 0x17a   :  { %v5715_v18 = vmax.f32 %v7816_v45, %v1444_v61  ;;  %v7824_v61 = vmax.f32 %v7822_v59, %v7823_v55  ;;  %v7827_v45 = vmax.f32 %v7825_v53, %v7826_v16  ;;  %v2283_v59 = vrot.slane %v5707_v3, 3 }
 0x17b   :  { %v5723_v31 = vmax.f32 %v7819_v62, %v1443_v34  ;;  %2212 = vrot.lane.b32.xlu1 %v2211_v22, %s4632_s20  ;;  %2234 = vrot.lane.b32.xlu0 %v2233_v19, %s4633_s1  ;;  %v4250_v51 = vpop.f32.mrb[78].mxu0  ;;  %v2271_v34 = vrot.slane %v5707_v3, 1  ;;  %v7828_v19 = vld [vmem:[#allocation17_spill] sm:$0xff]  ;;  %v7833_v55 = vmax.f32 %v5331_v40, %v5511_v57  ;;  %v5769_v16 = vmax.f32 %v1550_v47, 0.0 }
 0x17c   :  { %v1446_v28 = vmax.f32 %v4250_v51, %v7820_v21  ;;  %v1074_v35 = vpop.f32.mrb[79].mxu0  ;;  %v2249_v51 = vsel %vm1606_vm5, %v2216_v29, %v2248_v24  ;;  %v2276_v21 = vrot.slane %v5709_v32, 2  ;;  %v7834_v24 = vld [vmem:[#allocation20_spill] sm:$0xff]  ;;  %v2284_v57 = vsel %vm1606_vm5, %v2282_v11, %v2283_v59 }
 0x17d   :  { %v1445_v37 = vmax.f32 %v1074_v35, %v7821_v30  ;;  %v7830_v35 = vld [vmem:[#allocation11_spill] sm:$0xff]  ;;  %7835 = vst [vmem:[#allocation12_spill] sm:$0xff] %v5769_v16  ;;  %v2323_v11 = vrot.slane %v5769_v16, 4 }
 0x17e   :  { %v5734_v15 = vmax.f32 %v7824_v61, %v1446_v28  ;;  %v2277_v28 = vrot.slane %v5707_v3, 2  ;;  %v7832_v30 = vmax.f32 %v7830_v35, %v7831_v9  ;;  %v7841_v35 = vld [vmem:[#allocation23_spill] sm:$0xff] }
 0x17f   :  { %v5742_v22 = vmax.f32 %v7827_v45, %v1445_v37  ;;  %2224 = vrot.lane.b32.xlu1 %v2223_v17, %s4635_s22  ;;  %2242 = vrot.lane.b32.xlu0 %v2241_v36, %s4632_s20  ;;  %v4253_v27 = vpop.f32.mrb[80].mxu0  ;;  %v2272_v36 = vsel %vm1592_vm4, %v2270_v39, %v2271_v34  ;;  %v7836_v39 = vld [vmem:[#allocation22_spill] sm:$0xff] }
 0x180   :  { %v1448_v49 = vmax.f32 %v4253_v27, %v7828_v19  ;;  %v1084_v26 = vpop.f32.mrb[81].mxu0  ;;  %v2278_v27 = vsel %vm1599_vm6, %v2276_v21, %v2277_v28  ;;  %v7837_v19 = vld [vmem:[#allocation44_spill] sm:$0xff] }
 0x181   :  { %v1447_v62 = vmax.f32 %v1084_v26, %v7829_v63  ;;  %v2288_v26 = vrot.slane %v5709_v32, 4  ;;  %v2289_v63 = vrot.slane %v5707_v3, 4 }
 0x182   :  { %v5756_v37 = vmax.f32 %v7832_v30, %v1448_v49  ;;  %v7838_v49 = vmax.f32 %v5335_v42, %v7837_v19  ;;  %v7842_v30 = vld [vmem:[#allocation24_spill] sm:$0xff]  ;;  %v7847_v19 = vld [vmem:[#allocation25_spill] sm:$0xff] }
 0x183   :  { %v5764_v61 = vmax.f32 %v7833_v55, %v1447_v62  ;;  %2250 = vrot.lane.b32.xlu0 %v2249_v51, %s4634_s21  ;;  %2273 = vrot.lane.b32.xlu1 %v2272_v36, %s4633_s1  ;;  %v4256_v29 = vpop.f32.mrb[82].mxu0  ;;  %v7839_v62 = vld [vmem:[#allocation45_spill] sm:$0xff]  ;;  %v7843_v55 = vld [vmem:[#allocation46_spill] sm:$0xff] }
 0x184   :  { %v1450_v17 = vmax.f32 %v4256_v29, %v7834_v24  ;;  %v1094_v53 = vpop.f32.mrb[83].mxu0  ;;  %v7840_v51 = vmax.f32 %v5339_v44, %v7839_v62  ;;  %v7844_v29 = vmax.f32 %v5343_v46, %v7843_v55  ;;  %v2290_v44 = vsel %vm1613_vm7, %v2288_v26, %v2289_v63  ;;  %v7848_v46 = vld [vmem:[#allocation26_spill] sm:$0xff] }
 0x185   :  { %v1449_v45 = vmax.f32 %v1094_v53, %v7836_v39  ;;  %v7845_v53 = vld [vmem:[#allocation47_spill] sm:$0xff] }
 0x186   :  { %v5776_v40 = vmax.f32 %v7838_v49, %v1450_v17  ;;  %v2299_v17 = vrot.slane %v5769_v16, 1  ;;  %v7846_v39 = vmax.f32 %v5347_v48, %v7845_v53  ;;  %v2307_v48 = vrot.slane %v5769_v16, 2 }
 0x187   :  { %v5784_v47 = vmax.f32 %v7840_v51, %v1449_v45  ;;  %2279 = vrot.lane.b32.xlu0 %v2278_v27, %s4632_s20  ;;  %2285 = vrot.lane.b32.xlu1 %v2284_v57, %s4634_s21  ;;  %v4259_v21 = vpop.f32.mrb[84].mxu0  ;;  %v7849_v51 = vld [vmem:[#allocation48_spill] sm:$0xff] }
 0x188   :  { %v1452_v42 = vmax.f32 %v4259_v21, %v7841_v35  ;;  %v1104_v9 = vpop.f32.mrb[85].mxu0  ;;  %v7850_v26 = vmax.f32 %v5351_v50, %v7849_v51  ;;  %v2300_v21 = vsel %vm1592_vm4, %v2271_v34, %v2299_v17  ;;  %v7851_v35 = vld [vmem:[#allocation49_spill] sm:$0xff]  ;;  %v1553_v50 = vadd.f32 %v5591_v38, %v5657_v25 }
 0x189   :  { %v1451_v36 = vmax.f32 %v1104_v9, %v7842_v30 }
 0x18a   :  { %v5794_v24 = vmax.f32 %v7844_v29, %v1452_v42  ;;  %v7852_v42 = vmax.f32 %v5355_v52, %v7851_v35  ;;  %v7854_v29 = vld [vmem:[#allocation28_spill] sm:$0xff]  ;;  %v7855_v52 = vld [vmem:[#allocation50_spill] sm:$0xff]  ;;  %v5844_v51 = vmax.f32 %v1553_v50, 0.0  ;;  %v7868_v50 = vld [vmem:[#allocation31_spill] sm:$0xff] }
 0x18b   :  { %v5801_v45 = vmax.f32 %v7846_v39, %v1451_v36  ;;  %2291 = vrot.lane.b32.xlu0 %v2290_v44, %s4635_s22  ;;  %2324 = vrot.lane.b32.xlu1 %v2323_v11, %s4635_s22  ;;  %v4262_v27 = vpop.f32.mrb[86].mxu0  ;;  %v7853_v36 = vld [vmem:[#allocation27_spill] sm:$0xff]  ;;  %v1552_v44 = vadd.f32 %v5591_v38, %v5663_v5  ;;  %v7856_v53 = vmax.f32 %v5359_v54, %v7855_v52  ;;  %v7859_v54 = vld [vmem:[#allocation29_spill] sm:$0xff] }
 0x18c   :  { %v1454_v49 = vmax.f32 %v4262_v27, %v7847_v19  ;;  %v1114_v57 = vpop.f32.mrb[87].mxu0  ;;  %v2315_v27 = vrot.slane %v5769_v16, 3  ;;  %v7857_v19 = vld [vmem:[#allocation51_spill] sm:$0xff]  ;;  %v1551_v5 = vadd.f32 %v5591_v38, %v5637_v23  ;;  %7860 = vst [vmem:[#allocation5_spill] sm:$0xff] %v5844_v51  ;;  %v2374_v52 = vrot.slane %v5844_v51, 2 }
 0x18d   :  { %v1453_v62 = vmax.f32 %v1114_v57, %v7848_v46 }
 0x18e   :  { %v5810_v63 = vmax.f32 %v7850_v26, %v1454_v49  ;;  %v7858_v49 = vmax.f32 %v5363_v56, %v7857_v19  ;;  %v7863_v56 = vld [vmem:[#allocation52_spill] sm:$0xff] }
 0x18f   :  { %v5817_v9 = vmax.f32 %v7852_v42, %v1453_v62  ;;  %2303 = vrot.lane.b32.xlu0 %v2299_v17, %s4633_s1  ;;  %2301 = vrot.lane.b32.xlu1 %v2300_v21, %s4633_s1  ;;  %v4265_v30 = vpop.f32.mrb[88].mxu0  ;;  %v2308_v17 = vsel %vm1599_vm6, %v2277_v28, %v2307_v48  ;;  %v7861_v28 = vld [vmem:[#allocation30_spill] sm:$0xff]  ;;  %v5847_v21 = vmax.f32 %v1552_v44, 0.0  ;;  %v7864_v35 = vmax.f32 %v5367_v58, %v7863_v56  ;;  %v7869_v58 = vld [vmem:[#allocation32_spill] sm:$0xff] }
 0x190   :  { %v1456_v11 = vmax.f32 %v4265_v30, %v7853_v36  ;;  %v1124_v55 = vpop.f32.mrb[89].mxu0  ;;  %v7865_v30 = vld [vmem:[#allocation53_spill] sm:$0xff] }
 0x191   :  { %v1455_v34 = vmax.f32 %v1124_v55, %v7854_v29  ;;  %7862 = vst [vmem:[#allocation37_spill] sm:$0xff] %v5847_v21  ;;  %v7866_v36 = vmax.f32 %v5371_v60, %v7865_v30  ;;  %v5862_v55 = vmax.f32 %v1551_v5, 0.0  ;;  %v7871_v60 = vld [vmem:[#allocation54_spill] sm:$0xff]  ;;  %v2382_v30 = vrot.slane %v5844_v51, 3 }
 0x192   :  { %v5830_v39 = vmax.f32 %v7856_v53, %v1456_v11  ;;  %v7870_v53 = vld [vmem:[#allocation19_spill] sm:$0xff] }
 0x193   :  { %v5837_v57 = vmax.f32 %v7858_v49, %v1455_v34  ;;  %2311 = vrot.lane.b32.xlu0 %v2307_v48, %s4632_s20  ;;  %2309 = vrot.lane.b32.xlu1 %v2308_v17, %s4632_s20  ;;  %v4268_v25 = vpop.f32.mrb[90].mxu0  ;;  %v2316_v48 = vsel %vm1606_vm5, %v2283_v59, %v2315_v27  ;;  %7867 = vst [vmem:[#allocation6_spill] sm:$0xff] %v5862_v55  ;;  %v2366_v59 = vrot.slane %v5844_v51, 1  ;;  %v7873_v49 = vld [vmem:[#allocation21_spill] sm:$0xff]  ;;  %v2337_v56 = vrot.slane %v5862_v55, 1 }
 0x194   :  { %v1458_v46 = vmax.f32 %v4268_v25, %v7859_v54  ;;  %v1134_v62 = vpop.f32.mrb[91].mxu0  ;;  %v7872_v17 = vmax.f32 %v7870_v53, %v7871_v60  ;;  %v7874_v25 = vld [vmem:[#allocation55_spill] sm:$0xff] }
 0x195   :  { %v1457_v26 = vmax.f32 %v1134_v62, %v7861_v28  ;;  %v7875_v5 = vmax.f32 %v7873_v49, %v7874_v25  ;;  %v7876_v62 = vld [vmem:[#allocation33_spill] sm:$0xff] }
 0x196   :  { %v5852_v42 = vmax.f32 %v7864_v35, %v1458_v46  ;;  %v7877_v35 = vld [vmem:[#allocation34_spill] sm:$0xff] }
 0x197   :  { %v5858_v23 = vmax.f32 %v7866_v36, %v1457_v26  ;;  %2319 = vrot.lane.b32.xlu0 %v2315_v27, %s4634_s21  ;;  %2317 = vrot.lane.b32.xlu1 %v2316_v48, %s4634_s21  ;;  %v4271_v11 = vpop.f32.mrb[92].mxu0  ;;  %v2338_v27 = vrot.slane %v5847_v21, 1  ;;  %v7878_v36 = vld [vmem:[#allocation56_spill] sm:$0xff] }
 0x198   :  { %v1460_v29 = vmax.f32 %v4271_v11, %v7868_v50  ;;  %v1144_v34 = vpop.f32.mrb[93].mxu0  ;;  %v7879_v11 = vmax.f32 %v5383_v2, %v7878_v36  ;;  %v2349_v2 = vrot.slane %v5862_v55, 3  ;;  %v7886_v36 = vld [vmem:[#allocation59_spill] sm:$0xff] }
 0x199   :  { %v1459_v44 = vmax.f32 %v1144_v34, %v7869_v58  ;;  %v2350_v34 = vrot.slane %v5847_v21, 3  ;;  %v7880_v58 = vld [vmem:[#allocation57_spill] sm:$0xff] }
 0x19a   :  { %v5871_v19 = vmax.f32 %v7872_v17, %v1460_v29  ;;  %v2339_v29 = vsel %vm1592_vm4, %v2337_v56, %v2338_v27  ;;  %v7882_v17 = vld [vmem:[#allocation35_spill] sm:$0xff] }
 0x19b   :  { %v5877_v54 = vmax.f32 %v7875_v5, %v1459_v44  ;;  %2378 = vrot.lane.b32.xlu0 %v2374_v52, %s4632_s20  ;;  %2370 = vrot.lane.b32.xlu1 %v2366_v59, %s4633_s1  ;;  %v4274_v46 = vpop.f32.mrb[94].mxu0  ;;  %v7881_v44 = vmax.f32 %v5387_v4, %v7880_v58  ;;  %v7883_v5 = vld [vmem:[#allocation36_spill] sm:$0xff]  ;;  %v7884_v4 = vld [vmem:[#allocation58_spill] sm:$0xff]  ;;  %v1523_v58 = vadd.f32 %v5591_v38, %v5715_v18 }
 0x19c   :  { %v1462_v28 = vmax.f32 %v4274_v46, %v7876_v62  ;;  %v1154_v26 = vpop.f32.mrb[95].mxu0  ;;  %v2390_v62 = vrot.slane %v5844_v51, 4  ;;  %v1522_v18 = vadd.f32 %v5591_v38, %v5723_v31 }
 0x19d   :  { %v1461_v48 = vmax.f32 %v1154_v26, %v7877_v35  ;;  %v7885_v26 = vmax.f32 %v5391_v6, %v7884_v4  ;;  %v2351_v35 = vsel %vm1606_vm5, %v2349_v2, %v2350_v34  ;;  %v2343_v6 = vrot.slane %v5862_v55, 2 }
 0x19e   :  { %v5888_v50 = vmax.f32 %v7879_v11, %v1462_v28  ;;  %v1520_v28 = vadd.f32 %v5591_v38, %v5701_v12  ;;  %v7887_v11 = vmax.f32 %v5395_v8, %v7886_v36  ;;  %v1519_v12 = vadd.f32 %v5591_v38, %v5674_v41 }
 0x19f   :  { %v5895_v53 = vmax.f32 %v7881_v44, %v1461_v48  ;;  %2386 = vrot.lane.b32.xlu1 %v2382_v30, %s4634_s21  ;;  %2340 = vrot.lane.b32.xlu0 %v2339_v29, %s4633_s1  ;;  %v4277_v60 = vpop.f32.mrb[96].mxu0  ;;  %v2344_v48 = vrot.slane %v5847_v21, 2  ;;  %v2367_v8 = vsel %vm1592_vm4, %v2338_v27, %v2366_v59  ;;  %v2355_v41 = vrot.slane %v5862_v55, 4 }
 0x1a0   :  { %v1464_v49 = vmax.f32 %v4277_v60, %v7882_v17  ;;  %v1164_v25 = vpop.f32.mrb[97].mxu0  ;;  %v5924_v44 = vmax.f32 %v1520_v28, 0.0  ;;  %v2356_v17 = vrot.slane %v5847_v21, 4  ;;  %v1521_v36 = vadd.f32 %v5591_v38, %v5694_v13 }
 0x1a1   :  { %v1463_v46 = vmax.f32 %v1164_v25, %v7883_v5  ;;  %v2345_v60 = vsel %vm1599_vm6, %v2343_v6, %v2344_v48  ;;  %v5934_v25 = vmax.f32 %v1523_v58, 0.0  ;;  %v2383_v5 = vsel %vm1606_vm5, %v2350_v34, %v2382_v30 }
 0x1a2   :  { %v5908_v56 = vmax.f32 %v7885_v26, %v1464_v49  ;;  %7888 = vst [vmem:[#allocation38_spill] sm:$0xff] %v5924_v44  ;;  %v5931_v49 = vmax.f32 %v1519_v12, 0.0  ;;  %v2357_v2 = vsel %vm1613_vm7, %v2355_v41, %v2356_v17  ;;  %v1629_v59 = vrot.slane %v5924_v44, 1 }
 0x1a3   :  { %v5915_v29 = vmax.f32 %v7887_v11, %v1463_v46  ;;  %2391 = vrot.lane.b32.xlu1 %v2390_v62, %s4635_s22  ;;  %2352 = vrot.lane.b32.xlu0 %v2351_v35, %s4634_s21  ;;  %v1696_v46 = vrot.slane %v5934_v25, 1  ;;  %v5945_v62 = vmax.f32 %v1522_v18, 0.0  ;;  %v2375_v28 = vsel %vm1599_vm6, %v2344_v48, %v2374_v52 }
 0x1a4   :  { %7889 = vst [vmem:[#allocation13_spill] sm:$0xff] %v5931_v49  ;;  %v7702_v27 = vrot.slane %v5931_v49, 1  ;;  %v1637_v30 = vrot.slane %v5924_v44, 2  ;;  %v7703_v34 = vrot.slane %v5931_v49, 2  ;;  %v1704_v26 = vrot.slane %v5934_v25, 2 }
 0x1a5   :  { %v1668_v52 = vrot.slane %v5945_v62, 1  ;;  %v1645_v48 = vrot.slane %v5924_v44, 3  ;;  %v7701_v11 = vrot.slane %v5931_v49, 3  ;;  %v5974_v17 = vmax.f32 %v1521_v36, 0.0 }
 0x1a6   :  { %v1630_v31 = vsel %vm1592_vm4, %v7702_v27, %v1629_v59  ;;  %v1638_v35 = vsel %vm1599_vm6, %v7703_v34, %v1637_v30 }
 0x1a7   :  { %2346 = vrot.lane.b32.xlu1 %v2345_v60, %s4632_s20  ;;  %2368 = vrot.lane.b32.xlu0 %v2367_v8, %s4633_s1  ;;  %v4507_v4 = vpack.i.bf16 %v1629_v59, %v1630_v31  ;;  %v4512_v12 = vpack.i.bf16 %v1637_v30, %v1638_v35  ;;  %v1697_v6 = vsel %vm1592_vm4, %v1668_v52, %v1696_v46  ;;  %v1680_v60 = vrot.slane %v5945_v62, 3 }
 0x1a8   :  { %v1646_v58 = vsel %vm1606_vm5, %v7701_v11, %v1645_v48  ;;  %v1712_v8 = vrot.slane %v5934_v25, 3  ;;  %v1667_v18 = vrot.slane %v5974_v17, 1  ;;  %v1720_v31 = vrot.slane %v5934_v25, 4 }
 0x1a9   :  { %v4517_v13 = vpack.i.bf16 %v1645_v48, %v1646_v58  ;;  %v1686_v35 = vrot.slane %v5945_v62, 4  ;;  %v1526_v58 = vadd.f32 %v5591_v38, %v5764_v61 }
 0x1aa   :  { %v1713_v41 = vsel %vm1606_vm5, %v1680_v60, %v1712_v8  ;;  %v1669_v59 = vsel %vm1592_vm4, %v1667_v18, %v1668_v52 }
 0x1ab   :  { %2358 = vrot.lane.b32.xlu1 %v2357_v2, %s4635_s22  ;;  %2384 = vrot.lane.b32.xlu0 %v2383_v5, %s4634_s21  ;;  %v1525_v2 = vadd.f32 %v5591_v38, %v5734_v15  ;;  %v1524_v5 = vadd.f32 %v5591_v38, %v5742_v22  ;;  %v1679_v22 = vrot.slane %v5974_v17, 3 }
 0x1ad   :  { %v5990_v30 = vmax.f32 %v1525_v2, 0.0  ;;  %v1681_v48 = vsel %vm1606_vm5, %v1679_v22, %v1680_v60  ;;  %v6016_v2 = vmax.f32 %v1526_v58, 0.0 }
 0x1af   :  { %2376 = vrot.lane.b32.xlu1 %v2375_v28, %s4632_s20  ;;  %1700 = vrot.lane.b32.xlu0 %v1696_v46, %s4633_s1  ;;  %v1674_v46 = vrot.slane %v5945_v62, 2  ;;  %v1673_v28 = vrot.slane %v5974_v17, 2  ;;  %7890 = vst [vmem:[#allocation14_spill] sm:$0xff] %v5990_v30  ;;  %v1753_v60 = vrot.slane %v5990_v30, 4  ;;  %v1735_v18 = vrot.slane %v5990_v30, 1  ;;  %7892 = vst [vmem:[#allocation39_spill] sm:$0xff] %v6016_v2 }
 0x1b0   :  { %v1787_v22 = vrot.slane %v6016_v2, 4 }
 0x1b1   :  { %v1675_v15 = vsel %vm1599_vm6, %v1673_v28, %v1674_v46  ;;  %v1705_v52 = vsel %vm1599_vm6, %v1674_v46, %v1704_v26  ;;  %v1741_v46 = vrot.slane %v5990_v30, 2  ;;  %v1763_v28 = vrot.slane %v6016_v2, 1 }
 0x1b3   :  { %4508 = vrot.lane.b32.xlu1 %v4507_v4, %s4633_s1  ;;  %1708 = vrot.lane.b32.xlu0 %v1704_v26, %s4632_s20  ;;  %v5992_v4 = vmax.f32 %v1524_v5, 0.0 }
 0x1b5   :  { %7891 = vst [vmem:[#allocation7_spill] sm:$0xff] %v5992_v4  ;;  %v1746_v36 = vrot.slane %v5992_v4, 3 }
 0x1b7   :  { %4513 = vrot.lane.b32.xlu1 %v4512_v12, %s4632_s20  ;;  %1698 = vrot.lane.b32.xlu0 %v1697_v6, %s4633_s1  ;;  %v1747_v12 = vrot.slane %v5990_v30, 3  ;;  %v1685_v6 = vrot.slane %v5974_v17, 4 }
 0x1b9   :  { %v1748_v26 = vsel %vm1606_vm5, %v1746_v36, %v1747_v12  ;;  %v1779_v36 = vrot.slane %v6016_v2, 3 }
 0x1bb   :  { %4518 = vrot.lane.b32.xlu1 %v4517_v13, %s4634_s21  ;;  %1714 = vrot.lane.b32.xlu0 %v1713_v41, %s4634_s21  ;;  %v1752_v13 = vrot.slane %v5992_v4, 4  ;;  %v1734_v41 = vrot.slane %v5992_v4, 1 }
 0x1bd   :  { %v1754_v61 = vsel %vm1613_vm7, %v1752_v13, %v1753_v60  ;;  %v1736_v5 = vsel %vm1592_vm4, %v1734_v41, %v1735_v18  ;;  %v1780_v41 = vsel %vm1606_vm5, %v1747_v12, %v1779_v36 }
 0x1bf   :  { %1716 = vrot.lane.b32.xlu1 %v1712_v8, %s4634_s21  ;;  %1670 = vrot.lane.b32.xlu0 %v1669_v59, %s4633_s1  ;;  %v1687_v8 = vsel %vm1613_vm7, %v1685_v6, %v1686_v35  ;;  %v1740_v59 = vrot.slane %v5992_v4, 2  ;;  %v1529_v35 = vadd.f32 %v5591_v38, %v5776_v40  ;;  %v1528_v6 = vadd.f32 %v5591_v38, %v5784_v47 }
 0x1c0   :  { %v1764_v47 = vsel %vm1592_vm4, %v1735_v18, %v1763_v28 }
 0x1c1   :  { %v6046_v13 = vmax.f32 %v1529_v35, 0.0  ;;  %v6052_v60 = vmax.f32 %v1528_v6, 0.0  ;;  %v1531_v6 = vadd.f32 %v5591_v38, %v5794_v24 }
 0x1c3   :  { %1721 = vrot.lane.b32.xlu1 %v1720_v31, %s4635_s22  ;;  %1676 = vrot.lane.b32.xlu0 %v1675_v15, %s4632_s20  ;;  %v1742_v31 = vsel %vm1599_vm6, %v1740_v59, %v1741_v46  ;;  %v1771_v15 = vrot.slane %v6016_v2, 2  ;;  %7893 = vst [vmem:[#allocation8_spill] sm:$0xff] %v6046_v13  ;;  %7894 = vst [vmem:[#allocation40_spill] sm:$0xff] %v6052_v60  ;;  %v1854_v59 = vrot.slane %v6046_v13, 4  ;;  %v1814_v35 = vrot.slane %v6052_v60, 3 }
 0x1c4   :  { %v6094_v24 = vmax.f32 %v1531_v6, 0.0  ;;  %v1820_v11 = vrot.slane %v6052_v60, 4 }
 0x1c5   :  { %v1772_v58 = vsel %vm1599_vm6, %v1741_v46, %v1771_v15  ;;  %v1830_v46 = vrot.slane %v6046_v13, 1 }
 0x1c6   :  { %7896 = vst [vmem:[#allocation16_spill] sm:$0xff] %v6094_v24  ;;  %v1887_v51 = vrot.slane %v6094_v24, 4 }
 0x1c7   :  { %1706 = vrot.lane.b32.xlu1 %v1705_v52, %s4632_s20  ;;  %1682 = vrot.lane.b32.xlu0 %v1681_v48, %s4634_s21 }
 0x1cb   :  { %1688 = vrot.lane.b32.xlu0 %v1687_v8, %s4635_s22  ;;  %1749 = vrot.lane.b32.xlu1 %v1748_v26, %s4634_s21  ;;  %v1527_v8 = vadd.f32 %v5591_v38, %v5756_v37 }
 0x1cf   :  { %1755 = vrot.lane.b32.xlu1 %v1754_v61, %s4635_s22  ;;  %1737 = vrot.lane.b32.xlu0 %v1736_v5, %s4633_s1  ;;  %v6058_v61 = vmax.f32 %v1527_v8, 0.0 }
 0x1d1   :  { %7895 = vst [vmem:[#allocation15_spill] sm:$0xff] %v6058_v61  ;;  %v1801_v12 = vrot.slane %v6058_v61, 1 }
 0x1d3   :  { %1743 = vrot.lane.b32.xlu0 %v1742_v31, %s4632_s20  ;;  %1767 = vrot.lane.b32.xlu1 %v1763_v28, %s4633_s1  ;;  %v1802_v31 = vrot.slane %v6052_v60, 1 }
 0x1d7   :  { %1775 = vrot.lane.b32.xlu0 %v1771_v15, %s4632_s20  ;;  %1788 = vrot.lane.b32.xlu1 %v1787_v22, %s4635_s22  ;;  %v1838_v15 = vrot.slane %v6046_v13, 2  ;;  %v1803_v22 = vsel %vm1592_vm4, %v1801_v12, %v1802_v31  ;;  %v1808_v12 = vrot.slane %v6052_v60, 2 }
 0x1d9   :  { %v6034_v52 = vpop.permute.xlu0 %2177  ;;  %v6036_v48 = vpop.permute.xlu1 %2169 }
 0x1db   :  { %1783 = vrot.lane.b32.xlu0 %v1779_v36, %s4634_s21  ;;  %1773 = vrot.lane.b32.xlu1 %v1772_v58, %s4632_s20  ;;  %v1813_v36 = vrot.slane %v6058_v61, 3 }
 0x1dd   :  { %v6048_v40 = vpop.permute.xlu0 %2185  ;;  %v6050_v26 = vpop.permute.xlu1 %2190 }
 0x1df   :  { %1781 = vrot.lane.b32.xlu1 %v1780_v41, %s4634_s21  ;;  %1765 = vrot.lane.b32.xlu0 %v1764_v47, %s4633_s1  ;;  %v1846_v41 = vrot.slane %v6046_v13, 3  ;;  %v1530_v47 = vadd.f32 %v5591_v38, %v5801_v45 }
 0x1e1   :  { %v6060_v5 = vpop.permute.xlu0 %2257  ;;  %v6062_v37 = vpop.permute.xlu1 %2236  ;;  %v6100_v7 = vmax.f32 %v1530_v47, 0.0  ;;  %v1839_v47 = vsel %vm1599_vm6, %v1808_v12, %v1838_v15  ;;  %v1847_v21 = vsel %vm1606_vm5, %v1814_v35, %v1846_v41 }
 0x1e3   :  { %1855 = vrot.lane.b32.xlu0 %v1854_v59, %s4635_s22  ;;  %1834 = vrot.lane.b32.xlu1 %v1830_v46, %s4633_s1  ;;  %v1815_v59 = vsel %vm1606_vm5, %v1813_v36, %v1814_v35  ;;  %7897 = vst [vmem:[#allocation9_spill] sm:$0xff] %v6100_v7  ;;  %v1831_v36 = vsel %vm1592_vm4, %v1802_v31, %v1830_v46  ;;  %v1869_v46 = vrot.slane %v6094_v24, 1 }
 0x1e4   :  { %v1532_v31 = vadd.f32 %v5591_v38, %v5817_v9 }
 0x1e5   :  { %v6070_v18 = vpop.permute.xlu1 %2244  ;;  %v6072_v28 = vpop.permute.xlu0 %2206 }
 0x1e6   :  { %v6132_v9 = vmax.f32 %v1532_v31, 0.0 }
 0x1e7   :  { %1842 = vrot.lane.b32.xlu1 %v1838_v15, %s4632_s20  ;;  %1804 = vrot.lane.b32.xlu0 %v1803_v22, %s4633_s1  ;;  %v1807_v22 = vrot.slane %v6058_v61, 2 }
 0x1e8   :  { %7898 = vst [vmem:[#allocation41_spill] sm:$0xff] %v6132_v9 }
 0x1e9   :  { %v6082_v58 = vpop.permute.xlu1 %2252  ;;  %v6084_v8 = vpop.permute.xlu0 %2218  ;;  %v1809_v45 = vsel %vm1599_vm6, %v1807_v22, %v1808_v12  ;;  %v1868_v22 = vrot.slane %v6100_v7, 1  ;;  %v1875_v12 = vrot.slane %v6094_v24, 2 }
 0x1eb   :  { %1850 = vrot.lane.b32.xlu1 %v1846_v41, %s4634_s21  ;;  %1816 = vrot.lane.b32.xlu0 %v1815_v59, %s4634_s21  ;;  %v1819_v59 = vrot.slane %v6058_v61, 4  ;;  %v1870_v15 = vsel %vm1592_vm4, %v1868_v22, %v1869_v46  ;;  %v1886_v22 = vrot.slane %v6100_v7, 4 }
 0x1ed   :  { %v6096_v14 = vpop.permute.xlu1 %2212  ;;  %v6098_v33 = vpop.permute.xlu0 %2234  ;;  %v1821_v34 = vsel %vm1613_vm7, %v1819_v59, %v1820_v11  ;;  %v1874_v11 = vrot.slane %v6100_v7, 2  ;;  %v1880_v59 = vrot.slane %v6100_v7, 3  ;;  %v1888_v55 = vsel %vm1613_vm7, %v1886_v22, %v1887_v51 }
 0x1ee   :  { %v1535_v51 = vadd.f32 %v5591_v38, %v5830_v39 }
 0x1ef   :  { %1810 = vrot.lane.b32.xlu1 %v1809_v45, %s4632_s20  ;;  %1832 = vrot.lane.b32.xlu0 %v1831_v36, %s4633_s1  ;;  %v1876_v35 = vsel %vm1599_vm6, %v1874_v11, %v1875_v12  ;;  %v1897_v11 = vrot.slane %v6132_v9, 1 }
 0x1f1   :  { %v6108_v6 = vpop.permute.xlu1 %2224  ;;  %v6110_v27 = vpop.permute.xlu0 %2242 }
 0x1f3   :  { %1822 = vrot.lane.b32.xlu1 %v1821_v34, %s4635_s22  ;;  %1840 = vrot.lane.b32.xlu0 %v1839_v47, %s4632_s20  ;;  %v1881_v34 = vrot.slane %v6094_v24, 3 }
 0x1f5   :  { %v6120_v45 = vpop.permute.xlu0 %2250  ;;  %v6122_v36 = vpop.permute.xlu1 %2273  ;;  %v1882_v41 = vsel %vm1606_vm5, %v1880_v59, %v1881_v34 }
 0x1f7   :  { %1848 = vrot.lane.b32.xlu0 %v1847_v21, %s4634_s21  ;;  %1871 = vrot.lane.b32.xlu1 %v1870_v15, %s4633_s1  ;;  %v1921_v15 = vrot.slane %v6132_v9, 4 }
 0x1f9   :  { %v6134_v47 = vpop.permute.xlu0 %2279  ;;  %v6136_v16 = vpop.permute.xlu1 %2285 }
 0x1fb   :  { %1877 = vrot.lane.b32.xlu0 %v1876_v35, %s4632_s20  ;;  %1883 = vrot.lane.b32.xlu1 %v1882_v41, %s4634_s21  ;;  %v1898_v35 = vsel %vm1592_vm4, %v1869_v46, %v1897_v11  ;;  %v1905_v41 = vrot.slane %v6132_v9, 2  ;;  %v1913_v46 = vrot.slane %v6132_v9, 3 }
 0x1fd   :  { %v6144_v21 = vpop.permute.xlu0 %2291  ;;  %v6146_v31 = vpop.permute.xlu1 %2324 }
 0x1ff   :  { %1889 = vrot.lane.b32.xlu0 %v1888_v55, %s4635_s22  ;;  %1922 = vrot.lane.b32.xlu1 %v1921_v15, %s4635_s22  ;;  %v1534_v15 = vadd.f32 %v5591_v38, %v5837_v57  ;;  %v1914_v57 = vsel %vm1606_vm5, %v1881_v34, %v1913_v46 }
 0x201   :  { %v6153_v59 = vpop.permute.xlu0 %2303  ;;  %v6155_v24 = vpop.permute.xlu1 %2301  ;;  %v6181_v2 = vmax.f32 %v1534_v15, 0.0 }
 0x202   :  { %7899 = vst [vmem:[#allocation10_spill] sm:$0xff] %v6153_v59  ;;  %v1906_v59 = vsel %vm1599_vm6, %v1875_v12, %v1905_v41 }
 0x203   :  { %1901 = vrot.lane.b32.xlu0 %v1897_v11, %s4633_s1  ;;  %1899 = vrot.lane.b32.xlu1 %v1898_v35, %s4633_s1  ;;  %v1533_v11 = vadd.f32 %v5591_v38, %v5810_v63  ;;  %v6175_v35 = vmax.f32 %v1535_v51, 0.0  ;;  %7903 = vst [vmem:[#allocation11_spill] sm:$0xff] %v6181_v2  ;;  %v1942_v61 = vrot.slane %v6181_v2, 2 }
 0x205   :  { %v6163_v22 = vpop.permute.xlu0 %2311  ;;  %v6165_v55 = vpop.permute.xlu1 %2309  ;;  %7901 = vst [vmem:[#allocation17_spill] sm:$0xff] %v6175_v35  ;;  %v6186_v12 = vmax.f32 %v1533_v11, 0.0  ;;  %v1988_v63 = vrot.slane %v6175_v35, 4  ;;  %v1964_v51 = vrot.slane %v6175_v35, 1  ;;  %v1972_v11 = vrot.slane %v6175_v35, 2 }
 0x206   :  { %7900 = vst [vmem:[#allocation42_spill] sm:$0xff] %v6163_v22 }
 0x207   :  { %1909 = vrot.lane.b32.xlu0 %v1905_v41, %s4632_s20  ;;  %1907 = vrot.lane.b32.xlu1 %v1906_v59, %s4632_s20  ;;  %7904 = vst [vmem:[#allocation43_spill] sm:$0xff] %v6186_v12  ;;  %v1935_v34 = vrot.slane %v6186_v12, 1 }
 0x209   :  { %v6177_v39 = vpop.permute.xlu0 %2319  ;;  %v6179_v22 = vpop.permute.xlu1 %2317 }
 0x20a   :  { %7902 = vst [vmem:[#allocation18_spill] sm:$0xff] %v6177_v39  ;;  %v1936_v39 = vrot.slane %v6181_v2, 1 }
 0x20b   :  { %1917 = vrot.lane.b32.xlu0 %v1913_v46, %s4634_s21  ;;  %1915 = vrot.lane.b32.xlu1 %v1914_v57, %s4634_s21  ;;  %v1537_v57 = vadd.f32 %v5591_v38, %v5852_v42  ;;  %v1980_v42 = vrot.slane %v6175_v35, 3  ;;  %v1954_v35 = vrot.slane %v6181_v2, 4 }
 0x20d   :  { %v6188_v59 = vpop.permute.xlu0 %2378  ;;  %v6190_v41 = vpop.permute.xlu1 %2370 }
 0x20e   :  { %7905 = vst [vmem:[#allocation20_spill] sm:$0xff] %v6188_v59  ;;  %7906 = vst [vmem:[#allocation22_spill] sm:$0xff] %v6190_v41  ;;  %v1536_v59 = vadd.f32 %v5591_v38, %v5858_v23  ;;  %v1937_v41 = vsel %vm1592_vm4, %v1935_v34, %v1936_v39  ;;  %v6219_v23 = vmax.f32 %v1537_v57, 0.0 }
 0x20f   :  { %1989 = vrot.lane.b32.xlu0 %v1988_v63, %s4635_s22  ;;  %1968 = vrot.lane.b32.xlu1 %v1964_v51, %s4633_s1  ;;  %v1948_v63 = vrot.slane %v6181_v2, 3 }
 0x210   :  { %7911 = vst [vmem:[#allocation46_spill] sm:$0xff] %v6219_v23  ;;  %v6221_v34 = vmax.f32 %v1536_v59, 0.0  ;;  %v1965_v59 = vsel %vm1592_vm4, %v1936_v39, %v1964_v51  ;;  %v1973_v51 = vsel %vm1599_vm6, %v1942_v61, %v1972_v11 }
 0x211   :  { %v6198_v15 = vpop.permute.xlu1 %2386  ;;  %v6200_v46 = vpop.permute.xlu0 %2340 }
 0x212   :  { %7907 = vst [vmem:[#allocation44_spill] sm:$0xff] %v6198_v15  ;;  %7908 = vst [vmem:[#allocation45_spill] sm:$0xff] %v6200_v46  ;;  %v1518_v15 = vadd.f32 %v5591_v38, %v5681_v43  ;;  %v1947_v46 = vrot.slane %v6186_v12, 3  ;;  %v2008_v13 = vrot.slane %v6221_v34, 2 }
 0x213   :  { %1976 = vrot.lane.b32.xlu1 %v1972_v11, %s4632_s20  ;;  %1938 = vrot.lane.b32.xlu0 %v1937_v41, %s4633_s1  ;;  %7912 = vst [vmem:[#allocation47_spill] sm:$0xff] %v6221_v34  ;;  %v1941_v41 = vrot.slane %v6186_v12, 2 }
 0x214   :  { %v1949_v60 = vsel %vm1606_vm5, %v1947_v46, %v1948_v63  ;;  %v6227_v43 = vmax.f32 %v1518_v15, 0.0 }
 0x215   :  { %v6214_v9 = vpop.permute.xlu1 %2391  ;;  %v6216_v7 = vpop.permute.xlu0 %2352  ;;  %v1943_v46 = vsel %vm1599_vm6, %v1941_v41, %v1942_v61 }
 0x216   :  { %7909 = vst [vmem:[#allocation23_spill] sm:$0xff] %v6214_v9  ;;  %7910 = vst [vmem:[#allocation24_spill] sm:$0xff] %v6216_v7  ;;  %v1538_v9 = vadd.f32 %v5591_v38, %v5877_v54  ;;  %v1953_v54 = vrot.slane %v6186_v12, 4  ;;  %v1600_v15 = vrot.slane %v6227_v43, 2 }
 0x217   :  { %1984 = vrot.lane.b32.xlu1 %v1980_v42, %s4634_s21  ;;  %1950 = vrot.lane.b32.xlu0 %v1949_v60, %s4634_s21  ;;  %7913 = vst [vmem:[#allocation25_spill] sm:$0xff] %v6227_v43  ;;  %v2009_v60 = vrot.slane %v6219_v23, 2 }
 0x218   :  { %v1955_v41 = vsel %vm1613_vm7, %v1953_v54, %v1954_v35 }
 0x219   :  { %v6232_v7 = vpop.permute.xlu1 %2346  ;;  %v6234_v57 = vpop.permute.xlu0 %2368  ;;  %v2010_v2 = vsel %vm1599_vm6, %v2008_v13, %v2009_v60  ;;  %v1981_v13 = vsel %vm1606_vm5, %v1948_v63, %v1980_v42  ;;  %v1607_v63 = vrot.slane %v6227_v43, 3  ;;  %v1541_v42 = vadd.f32 %v5591_v38, %v5888_v50 }
 0x21a   :  { %7914 = vst [vmem:[#allocation26_spill] sm:$0xff] %v6232_v7  ;;  %7915 = vst [vmem:[#allocation48_spill] sm:$0xff] %v6234_v57  ;;  %v6245_v7 = vmax.f32 %v1538_v9, 0.0  ;;  %v7919_v9 = vrot.slane %v5931_v49, 2 }
 0x21b   :  { %1944 = vrot.lane.b32.xlu1 %v1943_v46, %s4632_s20  ;;  %1966 = vrot.lane.b32.xlu0 %v1965_v59, %s4633_s1  ;;  %v2002_v46 = vrot.slane %v6221_v34, 1  ;;  %v2003_v59 = vrot.slane %v6219_v23, 1 }
 0x21c   :  { %7916 = vst [vmem:[#allocation49_spill] sm:$0xff] %v6245_v7  ;;  %v2055_v11 = vrot.slane %v6245_v7, 4  ;;  %v2031_v30 = vrot.slane %v6245_v7, 1 }
 0x21d   :  { %v6247_v57 = vpop.permute.xlu1 %2358  ;;  %v6249_v39 = vpop.permute.xlu0 %2384  ;;  %v2004_v54 = vsel %vm1592_vm4, %v2002_v46, %v2003_v59 }
 0x21e   :  { %7917 = vst [vmem:[#allocation27_spill] sm:$0xff] %v6247_v57  ;;  %7918 = vst [vmem:[#allocation28_spill] sm:$0xff] %v6249_v39  ;;  %v1602_v57 = vsel %vm1599_vm6, %v1600_v15, %v7919_v9  ;;  %v1593_v39 = vrot.slane %v6227_v43, 1  ;;  %v1653_v15 = vrot.slane %v5924_v44, 4  ;;  %v7921_v9 = vrot.slane %v5931_v49, 1 }
 0x21f   :  { %1956 = vrot.lane.b32.xlu1 %v1955_v41, %s4635_s22  ;;  %1974 = vrot.lane.b32.xlu0 %v1973_v51, %s4632_s20  ;;  %v4527_v35 = vpack.i.bf16 %v2010_v2, %v1602_v57  ;;  %v2014_v41 = vrot.slane %v6221_v34, 3  ;;  %v2015_v51 = vrot.slane %v6219_v23, 3  ;;  %v1540_v57 = vadd.f32 %v5591_v38, %v5895_v53 }
 0x220   :  { %v1595_v2 = vsel %vm1592_vm4, %v1593_v39, %v7921_v9  ;;  %v2032_v4 = vsel %vm1592_vm4, %v2003_v59, %v2031_v30  ;;  %v2020_v39 = vrot.slane %v6221_v34, 4  ;;  %v2021_v9 = vrot.slane %v6219_v23, 4 }
 0x221   :  { %v6262_v12 = vpop.permute.xlu1 %2376  ;;  %v6264_v61 = vpop.permute.xlu0 %1700  ;;  %v2016_v44 = vsel %vm1606_vm5, %v2014_v41, %v2015_v51  ;;  %v7923_v38 = vrot.slane %v5931_v49, 3  ;;  %v1614_v53 = vrot.slane %v6227_v43, 4  ;;  %v6304_v34 = vmax.f32 %v1540_v57, 0.0 }
 0x222   :  { %7920 = vst [vmem:[#allocation50_spill] sm:$0xff] %v6262_v12 }
 0x223   :  { %1982 = vrot.lane.b32.xlu0 %v1981_v13, %s4634_s21  ;;  %4528 = vrot.lane.b32.xlu1 %v4527_v35, %s4632_s20  ;;  %v4522_v13 = vpack.i.bf16 %v2004_v54, %v1595_v2  ;;  %v4542_v35 = vpack.i.bf16 %v2055_v11, %v1653_v15  ;;  %v1609_v50 = vsel %vm1606_vm5, %v1607_v63, %v7923_v38  ;;  %v1615_v11 = vrot.slane %v5931_v49, 4 }
 0x224   :  { %v6298_v54 = vmax.f32 %v1541_v42, 0.0  ;;  %v4532_v15 = vpack.i.bf16 %v2016_v44, %v1609_v50  ;;  %v4547_v2 = vpack.i.bf16 %v2031_v30, %v2032_v4  ;;  %v2070_v4 = vrot.slane %v6304_v34, 1 }
 0x225   :  { %v6283_v46 = vpop.permute.xlu1 %4508  ;;  %v6285_v12 = vpop.permute.xlu0 %1708  ;;  %v1616_v63 = vsel %vm1613_vm7, %v1614_v53, %v1615_v11 }
 0x226   :  { %7922 = vst [vmem:[#allocation51_spill] sm:$0xff] %v6283_v46  ;;  %7924 = vst [vmem:[#allocation29_spill] sm:$0xff] %v6298_v54  ;;  %v2106_v44 = vrot.slane %v6298_v54, 2  ;;  %v2098_v57 = vrot.slane %v6298_v54, 1 }
 0x227   :  { %4523 = vrot.lane.b32.xlu0 %v4522_v13, %s4633_s1  ;;  %4543 = vrot.lane.b32.xlu1 %v4542_v35, %s4635_s22  ;;  %v2022_v13 = vsel %vm1613_vm7, %v2020_v39, %v2021_v9  ;;  %v2039_v35 = vrot.slane %v6245_v7, 2  ;;  %v2047_v39 = vrot.slane %v6245_v7, 3  ;;  %v4606_v9 = vld [vmem:[%s7658_s2] ss:$0 sm:$0xff]  ;;  %s4636_s2 = smov 72  }
 0x228   :  { %v4537_v43 = vpack.i.bf16 %v2022_v13, %v1616_v63  ;;  %v1539_v50 = vadd.f32 %v4606_v9, %v5871_v19  ;;  %v1543_v53 = vadd.f32 %v4606_v9, %v5908_v56  ;;  %v2114_v63 = vrot.slane %v6298_v54, 3 }
 0x229   :  { %v6300_v41 = vpop.permute.xlu1 %4513  ;;  %v6302_v59 = vpop.permute.xlu0 %1698  ;;  %v2040_v30 = vsel %vm1599_vm6, %v2009_v60, %v2039_v35  ;;  %v2048_v13 = vsel %vm1606_vm5, %v2015_v51, %v2047_v39 }
 0x22a   :  { %7925 = vst [vmem:[#allocation30_spill] sm:$0xff] %v6300_v41  ;;  %v6337_v19 = vmax.f32 %v1539_v50, 0.0  ;;  %v4557_v7 = vpack.i.bf16 %v2047_v39, %v2048_v13  ;;  %v1542_v50 = vadd.f32 %v4606_v9, %v5915_v29  ;;  %v7931_v9 = vrot.slane %v5602_v1, 3 }
 0x22b   :  { %4533 = vrot.lane.b32.xlu0 %v4532_v15, %s4634_s21  ;;  %4548 = vrot.lane.b32.xlu1 %v4547_v2, %s4633_s1  ;;  %v4552_v15 = vpack.i.bf16 %v2039_v35, %v2040_v30  ;;  %v2099_v2 = vsel %vm1592_vm4, %v2070_v4, %v2098_v57  ;;  %v6343_v35 = vmax.f32 %v1543_v53, 0.0 }
 0x22c   :  { %7927 = vst [vmem:[#allocation53_spill] sm:$0xff] %v6337_v19  ;;  %v2069_v51 = vrot.slane %v6337_v19, 1  ;;  %v6362_v13 = vmax.f32 %v1542_v50, 0.0  ;;  %v2076_v50 = vrot.slane %v6304_v34, 2 }
 0x22d   :  { %v6311_v42 = vpop.permute.xlu1 %4518  ;;  %v6313_v38 = vpop.permute.xlu0 %1714  ;;  %v2143_v39 = vrot.slane %v6343_v35, 2  ;;  %v2149_v29 = vrot.slane %v6343_v35, 3  ;;  %v2137_v41 = vrot.slane %v6343_v35, 1 }
 0x22e   :  { %7926 = vst [vmem:[#allocation52_spill] sm:$0xff] %v6311_v42  ;;  %v2071_v49 = vsel %vm1592_vm4, %v2069_v51, %v2070_v4 }
 0x22f   :  { %4538 = vrot.lane.b32.xlu0 %v4537_v43, %s4635_s22  ;;  %2110 = vrot.lane.b32.xlu1 %v2106_v44, %s4632_s20  ;;  %v2082_v43 = vrot.slane %v6304_v34, 3  ;;  %v2182_v51 = vsel %vm1606_vm5, %v2149_v29, %v7931_v9  ;;  %v2142_v9 = vrot.slane %v6362_v13, 2 }
 0x231   :  { %v6327_v11 = vpop.permute.xlu1 %1716  ;;  %v6329_v60 = vpop.permute.xlu0 %1670  ;;  %v2115_v30 = vsel %vm1606_vm5, %v2082_v43, %v2114_v63 }
 0x233   :  { %4553 = vrot.lane.b32.xlu0 %v4552_v15, %s4632_s20  ;;  %2100 = vrot.lane.b32.xlu1 %v2099_v2, %s4633_s1 }
 0x235   :  { %v6339_v56 = vpop.permute.xlu1 %1721  ;;  %v6341_v23 = vpop.permute.xlu0 %1676 }
 0x237   :  { %4558 = vrot.lane.b32.xlu0 %v4557_v7, %s4634_s21  ;;  %2116 = vrot.lane.b32.xlu1 %v2115_v30, %s4634_s21  ;;  %v7929_v30 = vrot.slane %v5602_v1, 2 }
 0x239   :  { %v6349_v15 = vpop.permute.xlu1 %1706  ;;  %v6351_v2 = vpop.permute.xlu0 %1682  ;;  %v2174_v42 = vsel %vm1599_vm6, %v2143_v39, %v7929_v30  ;;  %v2136_v30 = vrot.slane %v6362_v13, 1 }
 0x23b   :  { %2102 = vrot.lane.b32.xlu0 %v2098_v57, %s4633_s1  ;;  %2072 = vrot.lane.b32.xlu1 %v2071_v49, %s4633_s1  ;;  %v2122_v49 = vrot.slane %v6298_v54, 4  ;;  %v2107_v54 = vsel %vm1599_vm6, %v2076_v50, %v2106_v44  ;;  %v2138_v46 = vsel %vm1592_vm4, %v2136_v30, %v2137_v41  ;;  %v2148_v44 = vrot.slane %v6362_v13, 3 }
 0x23d   :  { %v6358_v53 = vpop.permute.xlu0 %1688  ;;  %v6360_v7 = vpop.permute.xlu1 %1749 }
 0x23e   :  { %7928 = vst [vmem:[#allocation31_spill] sm:$0xff] %v6360_v7 }
 0x23f   :  { %2118 = vrot.lane.b32.xlu0 %v2114_v63, %s4634_s21  ;;  %2175 = vrot.lane.b32.xlu1 %v2174_v42, %s4632_s20 }
 0x241   :  { %v6370_v4 = vpop.permute.xlu1 %1755  ;;  %v6372_v57 = vpop.permute.xlu0 %1737 }
 0x242   :  { %7930 = vst [vmem:[#allocation32_spill] sm:$0xff] %v6370_v4  ;;  %v2075_v4 = vrot.slane %v6337_v19, 2 }
 0x243   :  { %2123 = vrot.lane.b32.xlu0 %v2122_v49, %s4635_s22  ;;  %2183 = vrot.lane.b32.xlu1 %v2182_v51, %s4634_s21 }
 0x244   :  { %v2077_v51 = vsel %vm1599_vm6, %v2075_v4, %v2076_v50  ;;  %v2150_v4 = vsel %vm1606_vm5, %v2148_v44, %v2149_v29  ;;  %v2155_v50 = vrot.slane %v6343_v35, 4 }
 0x245   :  { %v6383_v42 = vpop.permute.xlu0 %1743  ;;  %v6385_v63 = vpop.permute.xlu1 %1767 }
 0x246   :  { %7932 = vst [vmem:[#allocation19_spill] sm:$0xff] %v6385_v63  ;;  %v2144_v63 = vsel %vm1599_vm6, %v2142_v9, %v2143_v39  ;;  %v2154_v39 = vrot.slane %v6362_v13, 4  ;;  %v2087_v9 = vrot.slane %v6337_v19, 4  ;;  %vm3216_vm6 = vcmask 97280  }
 0x247   :  { %2108 = vrot.lane.b32.xlu0 %v2107_v54, %s4632_s20  ;;  %2139 = vrot.lane.b32.xlu1 %v2138_v46, %s4633_s1  ;;  %v2081_v54 = vrot.slane %v6337_v19, 3 }
 0x249   :  { %v6393_v7 = vpop.permute.xlu0 %1775  ;;  %v6395_v49 = vpop.permute.xlu1 %1788 }
 0x24a   :  { %7933 = vst [vmem:[#allocation54_spill] sm:$0xff] %v6393_v7  ;;  %7934 = vst [vmem:[#allocation21_spill] sm:$0xff] %v6395_v49  ;;  %v2088_v7 = vrot.slane %v6304_v34, 4  ;;  %v2083_v49 = vsel %vm1606_vm5, %v2081_v54, %v2082_v43  ;;  %v2156_v54 = vsel %vm1613_vm7, %v2154_v39, %v2155_v50  ;;  %vm3211_vm5 = vcmask 654336  }
 0x24b   :  { %2078 = vrot.lane.b32.xlu0 %v2077_v51, %s4632_s20  ;;  %2145 = vrot.lane.b32.xlu1 %v2144_v63, %s4632_s20  ;;  %v2194_v63 = vsel %vm1620_vm8, %v5602_v1, %v6036_v48 }
 0x24c   :  { %v2196_v29 = vsel %vm1622_vm9, %v2194_v63, %v6034_v52  ;;  %v2089_v44 = vsel %vm1613_vm7, %v2087_v9, %v2088_v7  ;;  %v7935_v7 = vrot.slane %v5602_v1, 1 }
 0x24d   :  { %v6403_v46 = vpop.permute.xlu0 %1783  ;;  %v6405_v30 = vpop.permute.xlu1 %1773  ;;  %v2198_v48 = vsel %vm1624_vm10, %v2196_v29, %v6048_v40 }
 0x24e   :  { %v2166_v40 = vsel %vm1592_vm4, %v2137_v41, %v7935_v7  ;;  %v6444_v39 = vsel %vm1626_vm11, %v2198_v48, %v6050_v26  ;;  %v2904_v7 = vld [vmem:[%s7659_s3] sm:$0xff]  ;;  %vm3209_vm4 = vcmask 490496  }
 0x24f   :  { %2084 = vrot.lane.b32.xlu0 %v2083_v49, %s4634_s21  ;;  %2151 = vrot.lane.b32.xlu1 %v2150_v4, %s4634_s21  ;;  %v2261_v49 = vsel %vm1620_vm8, %v5627_v20, %v6062_v37  ;;  %v2227_v20 = vsel %vm1620_vm8, %v5648_v0, %v6072_v28 }
 0x250   :  { %v2263_v52 = vsel %vm1622_vm9, %v2261_v49, %v6070_v18  ;;  %v2228_v18 = vsel %vm1622_vm9, %v2227_v20, %v6096_v14  ;;  %v2327_v20 = vsel %vm1620_vm8, %v5707_v3, %v6155_v24 }
 0x251   :  { %v6418_v51 = vpop.permute.xlu1 %1781  ;;  %v6420_v43 = vpop.permute.xlu0 %1765  ;;  %v2265_v50 = vsel %vm1624_vm10, %v2263_v52, %v6082_v58  ;;  %v2260_v58 = vsel %vm1620_vm8, %v5632_v10, %v6098_v33  ;;  %v2229_v33 = vsel %vm1624_vm10, %v2228_v18, %v6084_v8 }
 0x252   :  { %v6465_v41 = vsel %vm1626_vm11, %v2265_v50, %v6060_v5  ;;  %v2262_v63 = vsel %vm1622_vm9, %v2260_v58, %v6110_v27  ;;  %v6483_v27 = vsel %vm1626_vm11, %v2229_v33, %v6108_v6 }
 0x253   :  { %2090 = vrot.lane.b32.xlu0 %v2089_v44, %s4635_s22  ;;  %2157 = vrot.lane.b32.xlu1 %v2156_v54, %s4635_s22  ;;  %7936 = vst [vmem:[#allocation55_spill] sm:$0xff] %v6465_v41  ;;  %v2264_v14 = vsel %vm1624_vm10, %v2262_v63, %v6120_v45  ;;  %v7733_v8 = vrot.slane %v6483_v27, 4  ;;  %v2725_v6 = vrot.slane %v6465_v41, 4 }
 0x254   :  { %v6491_v28 = vsel %vm1626_vm11, %v2264_v14, %v6060_v5  ;;  %v2294_v5 = vsel %vm1620_vm8, %v5709_v32, %v6122_v36  ;;  %v2920_v32 = vld [vmem:[%s7659_s3 + $0x80] sm:$0xff]  ;;  %v2921_v36 = vld [vmem:[%s7659_s3 + $0x88] sm:$0xff]  ;;  %v2329_v14 = vsel %vm1622_vm9, %v2327_v20, %v6165_v55 }
 0x255   :  { %v6433_v4 = vpop.permute.xlu0 %1855  ;;  %v6435_v19 = vpop.permute.xlu1 %1834  ;;  %v2724_v29 = vrot.slane %v6491_v28, 4  ;;  %v2295_v48 = vsel %vm1622_vm9, %v2294_v5, %v6134_v47  ;;  %v1724_v47 = vsel %vm1620_vm8, %v5945_v62, %v6302_v59  ;;  %v4393_v52 = vpack.c.bf16 %v2921_v36, %v2920_v32  ;;  %v2906_v36 = vld [vmem:[%s7659_s3 + $0x10] sm:$0xff] }
 0x256   :  { %v2296_v50 = vsel %vm1624_vm10, %v2295_v48, %v6136_v16  ;;  %v1726_v18 = vsel %vm1622_vm9, %v1724_v47, %v6349_v15  ;;  %v2331_v16 = vsel %vm1624_vm10, %v2329_v14, %v6179_v22  ;;  %v1725_v22 = vsel %vm1620_vm8, %v5934_v25, %v6264_v61  ;;  %v7937_v48 = vld [vmem:[#allocation7_spill] sm:$0xff]  ;;  %v7939_v14 = vld [vmem:[#allocation32_spill] sm:$0xff] }
 0x257   :  { %2167 = vrot.lane.b32.xlu0 %v2166_v40, %s4633_s1  ;;  %2657 = vrot.lane.b32.xlu1 %v6444_v39, %s4636_s2  ;;  %v6515_v49 = vsel %vm1613_vm7, %v2724_v29, %v2725_v6  ;;  %v2905_v40 = vld [vmem:[%s7659_s3 + $0x8] sm:$0xff]  ;;  %v6549_v63 = vsel %vm1626_vm11, %v2296_v50, %v6144_v21  ;;  %v1728_v3 = vsel %vm1624_vm10, %v1726_v18, %v6313_v38  ;;  %v2907_v47 = vld [vmem:[%s7659_s3 + $0x18] sm:$0xff]  ;;  %s4645_s1 = smov 52  }
 0x258   :  { %v4395_v58 = vpack.c.bf16 %v2905_v40, %v2904_v7  ;;  %4394 = vmatprep.subr.bf16.mxu1 %v4393_v52  ;;  %v7734_v24 = vrot.slane %v6549_v63, 4  ;;  %v6571_v55 = vsel %vm1626_vm11, %v2331_v16, %v6146_v31  ;;  %v1727_v33 = vsel %vm1622_vm9, %v1725_v22, %v6285_v12 }
 0x259   :  { %v6454_v1 = vpop.permute.xlu1 %1842  ;;  %v6456_v37 = vpop.permute.xlu0 %1804  ;;  %v1691_v38 = vsel %vm1620_vm8, %v5974_v17, %v6329_v60  ;;  %v6580_v29 = vsel %vm1626_vm11, %v1728_v3, %v6339_v56  ;;  %v1729_v25 = vsel %vm1624_vm10, %v1727_v33, %v6327_v11  ;;  %v4399_v40 = vpack.c.bf16 %v2907_v47, %v2906_v36  ;;  %v7940_v3 = vld [vmem:[#allocation14_spill] sm:$0xff]  ;;  %v2927_v36 = vld [vmem:[%s7659_s3 + $0xb8] sm:$0xff] }
 0x25a   :  { %4396 = vmatpush3.bf16.msra.mxu1 %v4395_v58  ;;  %v1692_v12 = vsel %vm1622_vm9, %v1691_v38, %v6341_v23  ;;  %v6599_v6 = vsel %vm1626_vm11, %v1729_v25, %v6339_v56  ;;  %v2416_v11 = vrot.slane %v6580_v29, 4  ;;  %v1758_v23 = vsel %vm1620_vm8, %v7937_v48, %v6372_v57  ;;  %v2922_v56 = vld [vmem:[%s7659_s3 + $0x90] sm:$0xff] }
 0x25b   :  { %2706 = vrot.lane.b32.xlu0 %v6465_v41, %s4636_s2  ;;  %2694 = vrot.lane.b32.xlu1 %v6444_v39, %s4637_s25  ;;  %v1693_v17 = vsel %vm1624_vm10, %v1692_v12, %v6351_v2  ;;  %v2923_v2 = vld [vmem:[%s7659_s3 + $0x98] sm:$0xff]  ;;  %v2417_v32 = vrot.slane %v6599_v6, 4  ;;  %v1791_v22 = vsel %vm1620_vm8, %v7940_v3, %v6420_v43  ;;  %v2924_v12 = vld [vmem:[%s7659_s3 + $0xa0] sm:$0xff] }
 0x25c   :  { %v6603_v5 = vsel %vm1626_vm11, %v1693_v17, %v6358_v53  ;;  %v1759_v53 = vsel %vm1622_vm9, %v1758_v23, %v6383_v42  ;;  %v4397_v57 = vpack.c.bf16 %v2923_v2, %v2922_v56  ;;  %v7938_v42 = vld [vmem:[#allocation31_spill] sm:$0xff]  ;;  %v2925_v17 = vld [vmem:[%s7659_s3 + $0xa8] sm:$0xff]  ;;  %v2908_v43 = vld [vmem:[%s7659_s3 + $0x20] sm:$0xff] }
 0x25d   :  { %v6477_v10 = vpop.permute.xlu1 %1850  ;;  %v6479_v0 = vpop.permute.xlu0 %1816  ;;  %v2418_v50 = vsel %vm1613_vm7, %v2416_v11, %v2417_v32  ;;  %v1760_v20 = vsel %vm1624_vm10, %v1759_v53, %v7938_v42  ;;  %v1793_v11 = vsel %vm1622_vm9, %v1791_v22, %v6405_v30  ;;  %v4401_v48 = vpack.c.bf16 %v2925_v17, %v2924_v12  ;;  %v2909_v23 = vld [vmem:[%s7659_s3 + $0x28] sm:$0xff]  ;;  %v2910_v42 = vld [vmem:[%s7659_s3 + $0x30] sm:$0xff]  ;;  %v2928_v22 = vld [vmem:[%s7659_s3 + $0xc0] sm:$0xff] }
 0x25e   :  { %4398 = vmatprep.subr.bf16.mxu1 %v4397_v57  ;;  %v6644_v16 = vsel %vm1626_vm11, %v1760_v20, %v7939_v14  ;;  %v4403_v32 = vpack.c.bf16 %v2909_v23, %v2908_v43  ;;  %v1795_v30 = vsel %vm1624_vm10, %v1793_v11, %v6418_v51  ;;  %v2926_v57 = vld [vmem:[%s7659_s3 + $0xb0] sm:$0xff]  ;;  %v2911_v51 = vld [vmem:[%s7659_s3 + $0x38] sm:$0xff]  ;;  %v7941_v20 = vld [vmem:[#allocation21_spill] sm:$0xff] }
 0x25f   :  { %2743 = vrot.lane.b32.xlu0 %v6465_v41, %s4637_s25  ;;  %2682 = vrot.lane.b32.xlu1 %v6483_v27, %s4636_s2  ;;  %v7736_v33 = vrot.slane %v6644_v16, 4  ;;  %v4405_v47 = vpack.c.bf16 %v2927_v36, %v2926_v57  ;;  %v6699_v14 = vsel %vm1626_vm11, %v1795_v30, %v7941_v20  ;;  %v4407_v3 = vpack.c.bf16 %v2911_v51, %v2910_v42  ;;  %v2929_v12 = vld [vmem:[%s7659_s3 + $0xc8] sm:$0xff]  ;;  %v7942_v43 = vld [vmem:[#allocation8_spill] sm:$0xff]  ;;  %v7943_v42 = vld [vmem:[#allocation15_spill] sm:$0xff] }
 0x260   :  { %4400 = vmatpush3.bf16.msra.mxu1 %v4399_v40  ;;  %v4409_v17 = vpack.c.bf16 %v2929_v12, %v2928_v22  ;;  %v1859_v11 = vsel %vm1620_vm8, %v7942_v43, %v6435_v19  ;;  %v2913_v30 = vld [vmem:[%s7659_s3 + $0x48] sm:$0xff]  ;;  %v2931_v36 = vld [vmem:[%s7659_s3 + $0xd8] sm:$0xff]  ;;  %v1825_v51 = vsel %vm1620_vm8, %v7943_v42, %v6456_v37  ;;  %v2914_v22 = vld [vmem:[%s7659_s3 + $0x50] sm:$0xff] }
 0x261   :  { %v6494_v45 = vpop.permute.xlu1 %1810  ;;  %v6496_v9 = vpop.permute.xlu0 %1832  ;;  %v4567_v53 = vpack.i.bf16 %v7736_v33, %v2418_v50  ;;  %4402 = vmatprep.subr.bf16.mxu1 %v4401_v48  ;;  %v2915_v12 = vld [vmem:[%s7659_s3 + $0x58] sm:$0xff] }
 0x262   :  { %v1826_v37 = vsel %vm1622_vm9, %v1825_v51, %v6494_v45  ;;  %v7944_v43 = vld [vmem:[#allocation40_spill] sm:$0xff]  ;;  %v7945_v51 = vld [vmem:[#allocation51_spill] sm:$0xff] }
 0x263   :  { %2699 = vrot.lane.b32.xlu0 %v7733_v8, %s4638_s26  ;;  %2704 = vrot.lane.b32.xlu1 %v6491_v28, %s4636_s2  ;;  %v2919_v41 = vld [vmem:[%s7659_s3 + $0x78] sm:$0xff] }
 0x264   :  { %4404 = vmatpush3.bf16.msra.mxu1 %v4403_v32  ;;  %v2912_v32 = vld [vmem:[%s7659_s3 + $0x40] sm:$0xff] }
 0x265   :  { %v6508_v44 = vpop.permute.xlu1 %1822  ;;  %v6510_v54 = vpop.permute.xlu0 %1840  ;;  %4406 = vmatprep.subr.bf16.mxu1 %v4405_v47  ;;  %v4411_v19 = vpack.c.bf16 %v2913_v30, %v2912_v32  ;;  %v4415_v32 = vpack.c.bf16 %v2915_v12, %v2914_v22  ;;  %v2933_v30 = vld [vmem:[%s7659_s3 + $0xe8] sm:$0xff]  ;;  %v4510_v22 = vunpack.i.l.bf16 %v7945_v51  ;;  %v4511_v12 = vunpack.i.h.bf16 %v7945_v51  ;;  %v2918_v51 = vld [vmem:[%s7659_s3 + $0x70] sm:$0xff] }
 0x267   :  { %2727 = vrot.lane.b32.xlu0 %v6515_v49, %s4638_s26  ;;  %2721 = vrot.lane.b32.xlu1 %v6483_v27, %s4637_s25 }
 0x268   :  { %4408 = vmatpush3.bf16.msra.mxu1 %v4407_v3 }
 0x269   :  { %v6543_v62 = vpop.permute.xlu0 %1848  ;;  %v6545_v59 = vpop.permute.xlu1 %1871  ;;  %4410 = vmatprep.subr.bf16.mxu1 %v4409_v17  ;;  %v2932_v17 = vld [vmem:[%s7659_s3 + $0xe0] sm:$0xff] }
 0x26a   :  { %v4417_v45 = vpack.c.bf16 %v2933_v30, %v2932_v17  ;;  %v7946_v17 = vld [vmem:[#allocation30_spill] sm:$0xff]  ;;  %v7947_v30 = vld [vmem:[#allocation52_spill] sm:$0xff] }
 0x26b   :  { %2731 = vrot.lane.b32.xlu0 %v6549_v63, %s4636_s2  ;;  %2741 = vrot.lane.b32.xlu1 %v6491_v28, %s4637_s25 }
 0x26c   :  { %4412 = vmatpush3.bf16.msra.mxu1 %v4411_v19 }
 0x26d   :  { %v6562_v21 = vpop.permute.xlu0 %1877  ;;  %v6564_v15 = vpop.permute.xlu1 %1883 }
 0x26f   :  { %2753 = vrot.lane.b32.xlu0 %v6571_v55, %s4636_s2  ;;  %2748 = vrot.lane.b32.xlu1 %v7734_v24, %s4638_s26 }
 0x271   :  { %v6593_v61 = vpop.permute.xlu0 %1889  ;;  %v6595_v60 = vpop.permute.xlu1 %1922 }
 0x273   :  { %2440 = vrot.lane.b32.xlu0 %v6599_v6, %s4637_s25  ;;  %2411 = vrot.lane.b32.xlu1 %v6603_v5, %s4637_s25 }
 0x275   :  { %v6628_v52 = vpop.permute.xlu0 %1901  ;;  %v6630_v7 = vpop.permute.xlu1 %1899 }
 0x277   :  { %2419 = vrot.lane.b32.xlu0 %v2418_v50, %s4638_s26  ;;  %2438 = vrot.lane.b32.xlu1 %v6580_v29, %s4637_s25 }
 0x279   :  { %v6638_v18 = vpop.permute.xlu0 %1909  ;;  %v6640_v58 = vpop.permute.xlu1 %1907 }
 0x27b   :  { %2423 = vrot.lane.b32.xlu0 %v6644_v16, %s4636_s2 }
 0x27d   :  { %v6652_v38 = vpop.permute.xlu0 %1917  ;;  %v6654_v25 = vpop.permute.xlu1 %1915 }
 0x27f   :  { %2467 = vrot.lane.b32.xlu0 %v6644_v16, %s4637_s25 }
 0x281   :  { %v6672_v56 = vpop.permute.xlu0 %1989  ;;  %v6674_v2 = vpop.permute.xlu1 %1968 }
 0x283   :  { %4568 = vrot.lane.b32.xlu0 %v4567_v53, %s4639_s11  ;;  %v1861_v53 = vsel %vm1622_vm9, %v1859_v11, %v6454_v1  ;;  %v2930_v1 = vld [vmem:[%s7659_s3 + $0xd0] sm:$0xff]  ;;  %v1858_v11 = vsel %vm1620_vm8, %v7944_v43, %v6496_v9 }
 0x284   :  { %v1863_v57 = vsel %vm1624_vm10, %v1861_v53, %v6477_v10  ;;  %v4413_v47 = vpack.c.bf16 %v2931_v36, %v2930_v1  ;;  %v1860_v19 = vsel %vm1622_vm9, %v1858_v11, %v6510_v54  ;;  %v2917_v54 = vld [vmem:[%s7659_s3 + $0x68] sm:$0xff] }
 0x285   :  { %v6687_v40 = vpop.permute.xlu1 %1976  ;;  %v6689_v50 = vpop.permute.xlu0 %1938  ;;  %v6757_v53 = vsel %vm1626_vm11, %v1863_v57, %v6433_v4  ;;  %v1862_v9 = vsel %vm1624_vm10, %v1860_v19, %v6543_v62  ;;  %v1827_v57 = vsel %vm1624_vm10, %v1826_v37, %v6479_v0  ;;  %v4515_v37 = vunpack.i.l.bf16 %v7946_v17 }
 0x286   :  { %4414 = vmatprep.subr.bf16.mxu1 %v4413_v47  ;;  %v2916_v47 = vld [vmem:[%s7659_s3 + $0x60] sm:$0xff]  ;;  %v6782_v42 = vsel %vm1626_vm11, %v1827_v57, %v6508_v44  ;;  %v6786_v0 = vsel %vm1626_vm11, %v1862_v9, %v6433_v4  ;;  %v4521_v19 = vunpack.i.h.bf16 %v7947_v30 }
 0x287   :  { %2450 = vrot.lane.b32.xlu0 %v6699_v14, %s4636_s2  ;;  %4416 = vmatpush3.bf16.msra.mxu1 %v4415_v32  ;;  %v4419_v62 = vpack.c.bf16 %v2917_v54, %v2916_v47  ;;  %v7735_v43 = vrot.slane %v6782_v42, 4  ;;  %v4516_v32 = vunpack.i.h.bf16 %v7946_v17  ;;  %v2519_v4 = vrot.slane %v6786_v0, 4  ;;  %v7948_v9 = vld [vmem:[#allocation13_spill] sm:$0xff]  ;;  %v2934_v54 = vld [vmem:[%s7659_s3 + $0xf0] sm:$0xff] }
 0x288   :  { %4418 = vmatprep.subr.bf16.mxu1 %v4417_v45  ;;  %v4520_v45 = vunpack.i.l.bf16 %v7947_v30  ;;  %v1657_v57 = vsel %vm1620_vm8, %v7948_v9, %v4510_v22  ;;  %v2520_v47 = vrot.slane %v6757_v53, 4  ;;  %v7949_v17 = vld [vmem:[#allocation38_spill] sm:$0xff]  ;;  %v7950_v9 = vld [vmem:[#allocation9_spill] sm:$0xff] }
 0x289   :  { %v6712_v48 = vpop.permute.xlu1 %1984  ;;  %v6714_v23 = vpop.permute.xlu0 %1950  ;;  %v1658_v30 = vsel %vm1620_vm8, %v7949_v17, %v4511_v12  ;;  %v1659_v22 = vsel %vm1622_vm9, %v1657_v57, %v4515_v37  ;;  %v1892_v8 = vsel %vm1620_vm8, %v7950_v9, %v6545_v59 }
 0x28a   :  { %v1660_v12 = vsel %vm1622_vm9, %v1658_v30, %v4516_v32  ;;  %v1893_v37 = vsel %vm1622_vm9, %v1892_v8, %v6562_v21  ;;  %v2521_v59 = vsel %vm1613_vm7, %v2519_v4, %v2520_v47  ;;  %v1661_v17 = vsel %vm1624_vm10, %v1659_v22, %v4520_v45 }
 0x28b   :  { %2487 = vrot.lane.b32.xlu0 %v6699_v14, %s4637_s25  ;;  %4420 = vmatpush3.bf16.msra.mxu1 %v4419_v62  ;;  %v2935_v62 = vld [vmem:[%s7659_s3 + $0xf8] sm:$0x3]  ;;  %v1894_v8 = vsel %vm1624_vm10, %v1893_v37, %v6564_v15  ;;  %s4640_s3 = smov 60  }
 0x28c   :  { %v4421_v33 = vpack.c.bf16 %v2935_v62, %v2934_v54  ;;  %v1662_v54 = vsel %vm1624_vm10, %v1660_v12, %v4521_v19  ;;  %v4424_v62 = vpack.c.bf16 %v2919_v41, %v2918_v51  ;;  %v6856_v41 = vsel %vm1626_vm11, %v1894_v8, %v6593_v61  ;;  %v7951_v61 = vld [vmem:[#allocation19_spill] sm:$0xff] }
 0x28d   :  { %v6737_v3 = vpop.permute.xlu1 %1944  ;;  %v6739_v10 = vpop.permute.xlu0 %1966  ;;  %v2542_v47 = vrot.slane %v6856_v41, 4  ;;  %v7952_v12 = vld [vmem:[#allocation39_spill] sm:$0xff] }
 0x28e   :  { %4423 = vmatprep.subr.msk.bf16.mxu1 %vm4422_vm13, %v4421_v33  ;;  %v2434_v33 = vrot.slane %v6603_v5, 4  ;;  %v1792_v37 = vsel %vm1620_vm8, %v7952_v12, %v7951_v61  ;;  %vm3227_vm13 = vcmask 31744  }
 0x28f   :  { %2501 = vrot.lane.b32.xlu0 %v6757_v53, %s4636_s2  ;;  %4425 = vmatpush3.bf16.msra.mxu1 %v4424_v62 }
 0x291   :  { %v6770_v1 = vpop.permute.xlu1 %1956  ;;  %v6772_v36 = vpop.permute.xlu0 %1974 }
 0x293   :  { %2538 = vrot.lane.b32.xlu0 %v6757_v53, %s4637_s25 }
 0x295   :  { %v6794_v11 = vpop.permute.xlu0 %1982  ;;  %v6796_v44 = vpop.permute.xlu1 %4528 }
 0x297   :  { %2494 = vrot.lane.b32.xlu0 %v7735_v43, %s4638_s26 }
 0x299   :  { %v6823_v24 = vpop.permute.xlu0 %4523  ;;  %v6825_v43 = vpop.permute.xlu1 %4543 }
 0x29a   :  { %v4545_v57 = vunpack.i.l.bf16 %v6825_v43 }
 0x29b   :  { %2522 = vrot.lane.b32.xlu0 %v2521_v59, %s4638_s26 }
 0x29c   :  { %v6841_v9 = vsel %vm1626_vm11, %v1661_v17, %v4545_v57  ;;  %v6844_v32 = vsel %vm1626_vm11, %v1662_v54, %v4545_v57  ;;  %v7953_v57 = vld [vmem:[#allocation16_spill] sm:$0xff]  ;;  %v4577_v54 = vpack.i.bf16 %v2542_v47, %v2521_v59 }
 0x29d   :  { %v2404_v21 = vrot.slane %v6841_v9, 4  ;;  %v2405_v4 = vrot.slane %v6844_v32, 4  ;;  %v6850_v45 = vpop.permute.xlu0 %4533  ;;  %v6852_v19 = vpop.permute.xlu1 %4548  ;;  %v1925_v17 = vsel %vm1620_vm8, %v7953_v57, %v6630_v7  ;;  %v7955_v7 = vrot.slane %v6644_v16, 4 }
 0x29f   :  { %2526 = vrot.lane.b32.xlu0 %v6856_v41, %s4636_s2  ;;  %v2406_v15 = vsel %vm1613_vm7, %v2404_v21, %v2405_v4  ;;  %v7954_v21 = vld [vmem:[#allocation54_spill] sm:$0xff] }
 0x2a0   :  { %v4562_v22 = vpack.i.bf16 %v2434_v33, %v2406_v15  ;;  %v1794_v4 = vsel %vm1622_vm9, %v1792_v37, %v7954_v21  ;;  %v1927_v33 = vsel %vm1622_vm9, %v1925_v17, %v6640_v58  ;;  %v7957_v37 = vld [vmem:[#allocation43_spill] sm:$0xff]  ;;  %v2470_v21 = vrot.slane %v6699_v14, 4 }
 0x2a1   :  { %v6863_v51 = vpop.permute.xlu0 %4538  ;;  %v2111_v30 = vpop.permute.xlu1 %2110  ;;  %v1796_v15 = vsel %vm1624_vm10, %v1794_v4, %v6403_v46  ;;  %v7956_v46 = vld [vmem:[#allocation17_spill] sm:$0xff]  ;;  %v1959_v57 = vsel %vm1620_vm8, %v7957_v37, %v6689_v50 }
 0x2a2   :  { %4563 = vrot.lane.b32.xlu1 %v4562_v22, %s4639_s11  ;;  %v1929_v22 = vsel %vm1624_vm10, %v1927_v33, %v6654_v25  ;;  %v6894_v12 = vsel %vm1626_vm11, %v1796_v15, %v7941_v20  ;;  %v1993_v25 = vsel %vm1620_vm8, %v7956_v46, %v6674_v2  ;;  %v1960_v4 = vsel %vm1622_vm9, %v1959_v57, %v6737_v3  ;;  %v7958_v46 = vld [vmem:[#allocation29_spill] sm:$0xff] }
 0x2a3   :  { %2565 = vrot.lane.b32.xlu0 %v6856_v41, %s4637_s25  ;;  %v6898_v58 = vsel %vm1626_vm11, %v1929_v22, %v6595_v60  ;;  %v2471_v2 = vrot.slane %v6894_v12, 4  ;;  %v1961_v50 = vsel %vm1624_vm10, %v1960_v4, %v6714_v23 }
 0x2a4   :  { %v6928_v22 = vsel %vm1626_vm11, %v1961_v50, %v6770_v1 }
 0x2a5   :  { %v6876_v62 = vpop.permute.xlu0 %4553  ;;  %v2101_v8 = vpop.permute.xlu1 %2100  ;;  %v2472_v3 = vsel %vm1613_vm7, %v2470_v21, %v2471_v2 }
 0x2a6   :  { %2445 = vrot.lane.b32.xlu1 %v7955_v7, %s4638_s26  ;;  %v2591_v7 = vrot.slane %v6928_v22, 4  ;;  %v2126_v57 = vsel %vm1620_vm8, %v6304_v34, %v2101_v8 }
 0x2a7   :  { %4578 = vrot.lane.b32.xlu0 %v4577_v54, %s4639_s11  ;;  %v1995_v54 = vsel %vm1622_vm9, %v1993_v25, %v6687_v40 }
 0x2a8   :  { %v1997_v33 = vsel %vm1624_vm10, %v1995_v54, %v6712_v48 }
 0x2a9   :  { %v6890_v59 = vpop.permute.xlu0 %4558  ;;  %v2117_v61 = vpop.permute.xlu1 %2116  ;;  %v1999_v48 = vsel %vm1626_vm11, %v1997_v33, %v6672_v56 }
 0x2aa   :  { %2452 = vrot.lane.b32.xlu1 %v6894_v12, %s4636_s2 }
 0x2ab   :  { %2548 = vrot.lane.b32.xlu0 %v6898_v58, %s4636_s2 }
 0x2ad   :  { %v2103_v20 = vpop.permute.xlu0 %2102  ;;  %v6910_v17 = vpop.permute.xlu1 %2072 }
 0x2ae   :  { %2489 = vrot.lane.b32.xlu1 %v6894_v12, %s4637_s25  ;;  %v2127_v23 = vsel %vm1620_vm8, %v7958_v46, %v2103_v20  ;;  %v7959_v46 = vrot.slane %v6782_v42, 4 }
 0x2af   :  { %2585 = vrot.lane.b32.xlu0 %v6898_v58, %s4637_s25  ;;  %v2129_v1 = vsel %vm1622_vm9, %v2127_v23, %v2111_v30 }
 0x2b0   :  { %v4572_v23 = vpack.i.bf16 %v7959_v46, %v2472_v3 }
 0x2b1   :  { %v2119_v40 = vpop.permute.xlu0 %2118  ;;  %v2176_v15 = vpop.permute.xlu1 %2175 }
 0x2b2   :  { %2473 = vrot.lane.b32.xlu1 %v2472_v3, %s4638_s26  ;;  %v2131_v54 = vsel %vm1624_vm10, %v2129_v1, %v2119_v40 }
 0x2b3   :  { %2599 = vrot.lane.b32.xlu0 %v1999_v48, %s4636_s2 }
 0x2b5   :  { %v2124_v25 = vpop.permute.xlu0 %2123  ;;  %v2184_v37 = vpop.permute.xlu1 %2183 }
 0x2b6   :  { %2477 = vrot.lane.b32.xlu1 %v6782_v42, %s4636_s2  ;;  %v6947_v20 = vsel %vm1626_vm11, %v2131_v54, %v2124_v25 }
 0x2b7   :  { %2592 = vrot.lane.b32.xlu0 %v2591_v7, %s4638_s26  ;;  %v2626_v34 = vrot.slane %v6947_v20, 4 }
 0x2b9   :  { %v2109_v21 = vpop.permute.xlu0 %2108  ;;  %v2140_v4 = vpop.permute.xlu1 %2139 }
 0x2ba   :  { %v2128_v33 = vsel %vm1622_vm9, %v2126_v57, %v2109_v21  ;;  %2499 = vrot.lane.b32.xlu1 %v6786_v0, %s4636_s2  ;;  %v7960_v57 = vld [vmem:[#allocation41_spill] sm:$0xff] }
 0x2bb   :  { %v2130_v2 = vsel %vm1624_vm10, %v2128_v33, %v2117_v61  ;;  %2645 = vrot.lane.b32.xlu0 %v6947_v20, %s4637_s25  ;;  %v1926_v54 = vsel %vm1620_vm8, %v7960_v57, %v6628_v52 }
 0x2bc   :  { %v6955_v30 = vsel %vm1626_vm11, %v2130_v2, %v2124_v25  ;;  %v1928_v2 = vsel %vm1622_vm9, %v1926_v54, %v6638_v18 }
 0x2bd   :  { %v6958_v8 = vpop.permute.xlu0 %2078  ;;  %v2146_v50 = vpop.permute.xlu1 %2145  ;;  %v2625_v40 = vrot.slane %v6955_v30, 4  ;;  %v1930_v3 = vsel %vm1624_vm10, %v1928_v2, %v6652_v38  ;;  %v4556_v2 = vunpack.i.h.bf16 %v6876_v62 }
 0x2be   :  { %2516 = vrot.lane.b32.xlu1 %v6782_v42, %s4637_s25 }
 0x2bf   :  { %v2627_v61 = vsel %vm1613_vm7, %v2625_v40, %v2626_v34 }
 0x2c0   :  { %2628 = vrot.lane.b32.xlu0 %v2627_v61, %s4638_s26 }
 0x2c1   :  { %v6965_v48 = vpop.permute.xlu0 %2084  ;;  %v2152_v7 = vpop.permute.xlu1 %2151 }
 0x2c2   :  { %2536 = vrot.lane.b32.xlu1 %v6786_v0, %s4637_s25 }
 0x2c5   :  { %v6971_v25 = vpop.permute.xlu0 %2090  ;;  %v2158_v1 = vpop.permute.xlu1 %2157 }
 0x2c6   :  { %4573 = vrot.lane.b32.xlu1 %v4572_v23, %s4639_s11 }
 0x2c9   :  { %v2168_v21 = vpop.permute.xlu0 %2167  ;;  %v6977_v33 = vpop.permute.xlu1 %2657 }
 0x2ca   :  { %v2193_v34 = vsel %vm1620_vm8, %v6343_v35, %v2168_v21  ;;  %2543 = vrot.lane.b32.xlu1 %v2542_v47, %s4638_s26  ;;  %v1932_v35 = vsel %vm1626_vm11, %v1930_v3, %v6595_v60  ;;  %v2568_v47 = vrot.slane %v6898_v58, 4 }
 0x2cb   :  { %v2195_v40 = vsel %vm1622_vm9, %v2193_v34, %v2176_v15  ;;  %v2160_v15 = vsel %vm1620_vm8, %v6362_v13, %v2140_v4  ;;  %v4551_v13 = vunpack.i.h.bf16 %v6852_v19  ;;  %v4550_v4 = vunpack.i.l.bf16 %v6852_v19 }
 0x2cc   :  { %v2197_v52 = vsel %vm1624_vm10, %v2195_v40, %v2184_v37  ;;  %v2569_v37 = vrot.slane %v1932_v35, 4  ;;  %v4555_v34 = vunpack.i.l.bf16 %v6876_v62  ;;  %v4560_v19 = vunpack.i.l.bf16 %v6890_v59  ;;  %v7962_v62 = vld [vmem:[#allocation49_spill] sm:$0xff] }
 0x2cd   :  { %v6990_v46 = vpop.permute.xlu0 %2706  ;;  %v6992_v23 = vpop.permute.xlu1 %2694  ;;  %v6996_v18 = vsel %vm1626_vm11, %v2197_v52, %v6050_v26  ;;  %v2161_v26 = vsel %vm1622_vm9, %v2160_v15, %v2146_v50  ;;  %v7963_v15 = vld [vmem:[#allocation46_spill] sm:$0xff] }
 0x2ce   :  { %2655 = vrot.lane.b32.xlu0 %v6996_v18, %s4636_s2  ;;  %2550 = vrot.lane.b32.xlu1 %v1932_v35, %s4636_s2  ;;  %v2162_v60 = vsel %vm1624_vm10, %v2161_v26, %v2152_v7  ;;  %v2570_v58 = vsel %vm1613_vm7, %v2568_v47, %v2569_v37  ;;  %v7961_v7 = vld [vmem:[#allocation11_spill] sm:$0xff]  ;;  %v2060_v47 = vsel %vm1620_vm8, %v7962_v62, %v4551_v13 }
 0x2cf   :  { %v7016_v57 = vsel %vm1626_vm11, %v2162_v60, %v2158_v1  ;;  %v1992_v1 = vsel %vm1620_vm8, %v7961_v7, %v6739_v10  ;;  %v2059_v37 = vsel %vm1620_vm8, %v7963_v15, %v4550_v4  ;;  %v2062_v26 = vsel %vm1622_vm9, %v2060_v47, %v4556_v2 }
 0x2d0   :  { %v2649_v50 = vrot.slane %v7016_v57, 4  ;;  %v1994_v52 = vsel %vm1622_vm9, %v1992_v1, %v6772_v36  ;;  %v4546_v7 = vunpack.i.h.bf16 %v6825_v43  ;;  %v7964_v1 = vld [vmem:[#allocation53_spill] sm:$0xff] }
 0x2d1   :  { %v7003_v38 = vpop.permute.xlu0 %2743  ;;  %v7005_v41 = vpop.permute.xlu1 %2682  ;;  %v1996_v10 = vsel %vm1624_vm10, %v1994_v52, %v6794_v11  ;;  %v2093_v2 = vsel %vm1620_vm8, %v7964_v1, %v6910_v17  ;;  %v7971_v1 = vld [vmem:[#allocation22_spill] sm:$0xff] }
 0x2d2   :  { %2692 = vrot.lane.b32.xlu0 %v6996_v18, %s4637_s25  ;;  %2587 = vrot.lane.b32.xlu1 %v1932_v35, %s4637_s25  ;;  %v4561_v35 = vunpack.i.h.bf16 %v6890_v59  ;;  %v4587_v36 = vpack.i.bf16 %v2649_v50, %v2627_v61  ;;  %v2061_v59 = vsel %vm1622_vm9, %v2059_v37, %v4555_v34  ;;  %v1998_v61 = vsel %vm1626_vm11, %v1996_v10, %v6672_v56  ;;  %v7966_v10 = vld [vmem:[#allocation6_spill] sm:$0xff] }
 0x2d3   :  { %v2094_v34 = vsel %vm1622_vm9, %v2093_v2, %v6958_v8  ;;  %v7972_v2 = vld [vmem:[#allocation5_spill] sm:$0xff] }
 0x2d4   :  { %v2064_v13 = vsel %vm1624_vm10, %v2062_v26, %v4561_v35  ;;  %v2095_v56 = vsel %vm1624_vm10, %v2094_v34, %v6965_v48  ;;  %v7965_v48 = vld [vmem:[#allocation45_spill] sm:$0xff]  ;;  %v2395_v34 = vsel %vm1620_vm8, %v7972_v2, %v7971_v1  ;;  %v2675_v1 = vrot.slane %v6996_v18, 4 }
 0x2d5   :  { %v7018_v54 = vpop.permute.xlu0 %2699  ;;  %v7020_v21 = vpop.permute.xlu1 %2704  ;;  %v7077_v52 = vsel %vm1626_vm11, %v2064_v13, %v4546_v7  ;;  %v7085_v17 = vsel %vm1626_vm11, %v2095_v56, %v6971_v25  ;;  %v2361_v62 = vsel %vm1620_vm8, %v7966_v10, %v7965_v48  ;;  %v7967_v25 = vrot.slane %v6549_v63, 4  ;;  %v7974_v48 = vld [vmem:[#allocation12_spill] sm:$0xff] }
 0x2d6   :  { %2632 = vrot.lane.b32.xlu0 %v7016_v57, %s4636_s2  ;;  %2571 = vrot.lane.b32.xlu1 %v2570_v58, %s4638_s26  ;;  %v2063_v58 = vsel %vm1624_vm10, %v2061_v59, %v4560_v19  ;;  %v2614_v37 = vrot.slane %v7077_v52, 4  ;;  %v2639_v26 = vrot.slane %v7085_v17, 4 }
 0x2d7   :  { %v4592_v47 = vpack.i.bf16 %v7967_v25, %v6515_v49 }
 0x2d9   :  { %v2728_v3 = vpop.permute.xlu0 %2727  ;;  %v7034_v40 = vpop.permute.xlu1 %2721 }
 0x2da   :  { %2672 = vrot.lane.b32.xlu0 %v7016_v57, %s4637_s25  ;;  %2575 = vrot.lane.b32.xlu1 %v6928_v22, %s4636_s2  ;;  %v2736_v11 = vsel %vm2430_vm14, %v7034_v40, %v2728_v3  ;;  %v7074_v3 = vsel %vm1626_vm11, %v2063_v58, %v4546_v7  ;;  %v7970_v58 = vld [vmem:[#allocation27_spill] sm:$0xff] }
 0x2db   :  { %v2613_v15 = vrot.slane %v7074_v3, 4 }
 0x2dd   :  { %v2732_v60 = vpop.permute.xlu0 %2731  ;;  %v7056_v22 = vpop.permute.xlu1 %2741  ;;  %v2615_v49 = vsel %vm1613_vm7, %v2613_v15, %v2614_v37 }
 0x2de   :  { %v7061_v4 = vsel %vm2432_vm15, %v2736_v11, %v2732_v60  ;;  %4588 = vrot.lane.b32.xlu0 %v4587_v36, %s4639_s11  ;;  %2597 = vrot.lane.b32.xlu1 %v1998_v61, %s4636_s2  ;;  %v7968_v36 = vld [vmem:[#allocation26_spill] sm:$0xff]  ;;  %v7969_v60 = vld [vmem:[#allocation24_spill] sm:$0xff]  ;;  %v4582_v61 = vpack.i.bf16 %v2639_v26, %v2615_v49 }
 0x2df   :  { %v2362_v59 = vsel %vm1622_vm9, %v2361_v62, %v7968_v36  ;;  %v7976_v36 = vld [vmem:[#allocation18_spill] sm:$0xff]  ;;  %v7977_v26 = vld [vmem:[#allocation20_spill] sm:$0xff] }
 0x2e1   :  { %v2754_v35 = vpop.permute.xlu0 %2753  ;;  %v7081_v43 = vpop.permute.xlu1 %2748 }
 0x2e2   :  { %v2763_v8 = vsel %vm2430_vm14, %v7056_v22, %v7081_v43  ;;  %2770 = vrot.lane.b32.xlu0 %v6549_v63, %s4637_s25  ;;  %2620 = vrot.lane.b32.xlu1 %v7085_v17, %s4637_s25  ;;  %v2363_v63 = vsel %vm1624_vm10, %v2362_v59, %v7969_v60  ;;  %v2397_v60 = vsel %vm1622_vm9, %v2395_v34, %v7977_v26 }
 0x2e3   :  { %v7093_v19 = vsel %vm2432_vm15, %v2763_v8, %v2754_v35  ;;  %v2364_v13 = vsel %vm1626_vm11, %v2363_v63, %v7970_v58  ;;  %v7973_v8 = vld [vmem:[#allocation10_spill] sm:$0xff]  ;;  %v7978_v63 = vld [vmem:[#allocation44_spill] sm:$0xff] }
 0x2e4   :  { %v2796_v56 = vrot.slane %v2364_v13, 4  ;;  %v2328_v10 = vsel %vm1620_vm8, %v7974_v48, %v7973_v8  ;;  %v2399_v49 = vsel %vm1624_vm10, %v2397_v60, %v7978_v63  ;;  %v7984_v63 = vld [vmem:[#allocation28_spill] sm:$0xff] }
 0x2e5   :  { %v7108_v11 = vpop.permute.xlu0 %2440  ;;  %v7124_v35 = vpop.permute.xlu1 %2411 }
 0x2e6   :  { %4593 = vrot.lane.b32.xlu0 %v4592_v47, %s4639_s11  ;;  %2643 = vrot.lane.b32.xlu1 %v6955_v30, %s4637_s25  ;;  %v7975_v47 = vld [vmem:[#allocation42_spill] sm:$0xff] }
 0x2e7   :  { %v2330_v15 = vsel %vm1622_vm9, %v2328_v10, %v7975_v47 }
 0x2e8   :  { %v2332_v59 = vsel %vm1624_vm10, %v2330_v15, %v7976_v36 }
 0x2e9   :  { %v2420_v7 = vpop.permute.xlu0 %2419  ;;  %v2334_v2 = vsel %vm1626_vm11, %v2332_v59, %v6146_v31  ;;  %v7980_v31 = vrot.slane %v6483_v27, 4  ;;  %v7983_v59 = vld [vmem:[#allocation50_spill] sm:$0xff] }
 0x2ea   :  { %2790 = vrot.lane.b32.xlu0 %v6571_v55, %s4637_s25  ;;  %4583 = vrot.lane.b32.xlu1 %v4582_v61, %s4639_s11  ;;  %v2431_v62 = vsel %vm2430_vm14, %v7124_v35, %v2420_v7  ;;  %v7979_v61 = vld [vmem:[#allocation23_spill] sm:$0xff]  ;;  %v2774_v8 = vrot.slane %v2334_v2, 4 }
 0x2eb   :  { %v2401_v7 = vsel %vm1626_vm11, %v2399_v49, %v7979_v61 }
 0x2ed   :  { %v2424_v25 = vpop.permute.xlu0 %2423 }
 0x2ee   :  { %v2433_v37 = vsel %vm2432_vm15, %v2431_v62, %v2424_v25  ;;  %2797 = vrot.lane.b32.xlu0 %v2796_v56, %s4638_s26  ;;  %2650 = vrot.lane.b32.xlu1 %v2649_v50, %s4638_s26  ;;  %v2676_v50 = vrot.slane %v6444_v39, 4  ;;  %v2773_v56 = vrot.slane %v6571_v55, 4  ;;  %v7981_v55 = vld [vmem:[#allocation48_spill] sm:$0xff] }
 0x2ef   :  { %3822 = vmatprep.mubr.msk.f32.mxu1 %vm2936_vm1, %v2433_v37  ;;  %v7982_v37 = vld [vmem:[#allocation37_spill] sm:$0xff] }
 0x2f0   :  { %v2677_v48 = vsel %vm1613_vm7, %v2675_v1, %v2676_v50  ;;  %v2775_v62 = vsel %vm1613_vm7, %v2773_v56, %v2774_v8  ;;  %v2394_v36 = vsel %vm1620_vm8, %v7982_v37, %v7981_v55  ;;  %v2439_v56 = vpop.permute.xlu1 %2438 }
 0x2f1   :  { %v7145_v58 = vpop.permute.xlu0 %2467  ;;  %v4597_v25 = vpack.i.bf16 %v7980_v31, %v2677_v48  ;;  %v2396_v26 = vsel %vm1622_vm9, %v2394_v36, %v7983_v59  ;;  %v4535_v31 = vunpack.i.l.bf16 %v6850_v45 }
 0x2f2   :  { %2804 = vrot.lane.b32.xlu0 %v2401_v7, %s4636_s2  ;;  %2755 = vrot.lane.b32.xlu1 %v2334_v2, %s4636_s2  ;;  %v2398_v49 = vsel %vm1624_vm10, %v2396_v26, %v7984_v63 }
 0x2f3   :  { %v2400_v1 = vsel %vm1626_vm11, %v2398_v49, %v7979_v61 }
 0x2f5   :  { %v7155_v34 = vpop.permute.xlu0 %4568 }
 0x2f6   :  { %2678 = vrot.lane.b32.xlu1 %v2677_v48, %s4638_s26  ;;  %v7985_v48 = vld [vmem:[#allocation25_spill] sm:$0xff] }
 0x2f9   :  { %v2451_v10 = vpop.permute.xlu0 %2450 }
 0x2fa   :  { %2776 = vrot.lane.b32.xlu1 %v2775_v62, %s4638_s26  ;;  %s4641_s26 = smov 80  }
 0x2fd   :  { %v7164_v47 = vpop.permute.xlu0 %2487 }
 0x2fe   :  { %4598 = vrot.lane.b32.xlu1 %v4597_v25, %s4639_s11  ;;  %v4540_v25 = vunpack.i.l.bf16 %v6863_v51  ;;  %s4642_s11 = smov 12  }
 0x301   :  { %v7167_v15 = vpop.permute.xlu0 %2501 }
 0x302   :  { %2780 = vrot.lane.b32.xlu1 %v2364_v13, %s4636_s2  ;;  %v4525_v13 = vunpack.i.l.bf16 %v6823_v24 }
 0x304   :  { %v1621_v62 = vsel %vm1620_vm8, %v7985_v48, %v4525_v13 }
 0x305   :  { %v7175_v60 = vpop.permute.xlu0 %2538 }
 0x306   :  { %2792 = vrot.lane.b32.xlu1 %v2334_v2, %s4637_s25  ;;  %v4530_v2 = vunpack.i.l.bf16 %v6796_v44 }
 0x308   :  { %v1623_v61 = vsel %vm1622_vm9, %v1621_v62, %v4530_v2 }
 0x309   :  { %v2495_v7 = vpop.permute.xlu0 %2494  ;;  %v1625_v37 = vsel %vm1624_vm10, %v1623_v61, %v4535_v31 }
 0x30a   :  { %2802 = vrot.lane.b32.xlu1 %v2400_v1, %s4636_s2  ;;  %v1627_v26 = vsel %vm1626_vm11, %v1625_v37, %v4540_v25 }
 0x30d   :  { %v7183_v50 = vpop.permute.xlu0 %2522 }
 0x311   :  { %v7186_v8 = vpop.permute.xlu0 %2526 }
 0x314   :  { %v4564_v55 = vpop.permute.xlu1 %4563 }
 0x315   :  { %v4566_v36 = vunpack.i.h.bf16 %v4564_v55  ;;  %v4565_v59 = vunpack.i.l.bf16 %v4564_v55  ;;  %v7196_v63 = vpop.permute.xlu0 %2565 }
 0x317   :  { %v2456_v49 = vsel %vm2426_vm2, %v6841_v9, %v4566_v36  ;;  %v2457_v1 = vsel %vm2426_vm2, %v6844_v32, %v4566_v36  ;;  %v2427_v13 = vsel %vm2426_vm2, %v1627_v26, %v4565_v59 }
 0x318   :  { %v2446_v48 = vpop.permute.xlu1 %2445  ;;  %v2429_v62 = vsel %vm2428_vm3, %v2427_v13, %v7124_v35  ;;  %v2458_v2 = vsel %vm2428_vm3, %v2456_v49, %v2439_v56  ;;  %v2459_v25 = vsel %vm2428_vm3, %v2457_v1, %v7108_v11 }
 0x319   :  { %v2460_v31 = vsel %vm2430_vm14, %v2439_v56, %v2446_v48  ;;  %3046 = vmatmul.mubr.f32.vlgmr.msra.gmra.mrb[46].mxu1 %v2429_v62  ;;  %v2461_v9 = vsel %vm2430_vm14, %v7108_v11, %v2446_v48  ;;  %v7212_v32 = vpop.permute.xlu0 %4578  ;;  %v2820_v36 = vrot.slane %v2458_v2, 4  ;;  %v2821_v35 = vrot.slane %v2459_v25, 4 }
 0x31a   :  { %v2462_v61 = vsel %vm2432_vm15, %v2460_v31, %v2451_v10  ;;  %v4570_v11 = vunpack.i.l.bf16 %v7155_v34  ;;  %v4571_v48 = vunpack.i.h.bf16 %v7155_v34 }
 0x31b   :  { %v2823_v59 = vrot.slane %v2462_v61, 4  ;;  %v2822_v49 = vsel %vm1613_vm7, %v2820_v36, %v2821_v35 }
 0x31c   :  { %v2453_v55 = vpop.permute.xlu1 %2452  ;;  %v2480_v62 = vsel %vm2426_vm2, %v6603_v5, %v4570_v11  ;;  %v2505_v34 = vsel %vm2426_vm2, %v6580_v29, %v4571_v48 }
 0x31d   :  { %v2463_v37 = vsel %vm2432_vm15, %v2461_v9, %v2453_v55  ;;  %v2549_v10 = vpop.permute.xlu0 %2548  ;;  %v2506_v9 = vsel %vm2426_vm2, %v6599_v6, %v4571_v48  ;;  %v2481_v5 = vsel %vm2428_vm3, %v2480_v62, %v7145_v58  ;;  %v2507_v35 = vsel %vm2428_vm3, %v2505_v34, %v7164_v47 }
 0x31e   :  { %v2824_v26 = vrot.slane %v2463_v37, 4  ;;  %v2509_v6 = vsel %vm2430_vm14, %v7164_v47, %v2495_v7  ;;  %v2831_v11 = vrot.slane %v2507_v35, 4 }
 0x320   :  { %v2490_v13 = vpop.permute.xlu1 %2489  ;;  %v2825_v56 = vsel %vm1613_vm7, %v2823_v59, %v2824_v26 }
 0x321   :  { %3823 = vmatprep.mubr.msk.f32.mxu1 %vm2936_vm1, %v2825_v56  ;;  %v2510_v31 = vsel %vm2430_vm14, %v2490_v13, %v2495_v7  ;;  %v7223_v2 = vpop.permute.xlu0 %2585  ;;  %v2508_v37 = vsel %vm2428_vm3, %v2506_v9, %v2490_v13 }
 0x322   :  { %3051 = vmatmul.mubr.f32.gmra.mrb[48].mxu1 %v2822_v49  ;;  %v2512_v36 = vsel %vm2432_vm15, %v2510_v31, %v7167_v15  ;;  %v2832_v26 = vrot.slane %v2508_v37, 4 }
 0x323   :  { %v2835_v56 = vrot.slane %v2512_v36, 4 }
 0x324   :  { %v2474_v1 = vpop.permute.xlu1 %2473  ;;  %v2833_v48 = vsel %vm1613_vm7, %v2831_v11, %v2832_v26 }
 0x325   :  { %v2482_v25 = vsel %vm2430_vm14, %v7145_v58, %v2474_v1  ;;  %v2600_v49 = vpop.permute.xlu0 %2599 }
 0x328   :  { %v2478_v61 = vpop.permute.xlu1 %2477 }
 0x329   :  { %v2483_v55 = vsel %vm2432_vm15, %v2482_v25, %v2478_v61  ;;  %v2593_v7 = vpop.permute.xlu0 %2592 }
 0x32a   :  { %3824 = vmatprep.mubr.msk.f32.mxu1 %vm2936_vm1, %v2483_v55 }
 0x32b   :  { %3056 = vmatmul.mubr.f32.gmra.mrb[50].mxu1 %v2481_v5 }
 0x32c   :  { %v2500_v59 = vpop.permute.xlu1 %2499 }
 0x32d   :  { %v2511_v13 = vsel %vm2432_vm15, %v2509_v6, %v2500_v59  ;;  %v7251_v9 = vpop.permute.xlu0 %2645 }
 0x32e   :  { %v2834_v58 = vrot.slane %v2511_v13, 4 }
 0x330   :  { %v2517_v1 = vpop.permute.xlu1 %2516  ;;  %v2836_v29 = vsel %vm1613_vm7, %v2834_v58, %v2835_v56 }
 0x331   :  { %v2531_v15 = vsel %vm2430_vm14, %v2517_v1, %v7183_v50  ;;  %3825 = vmatprep.mubr.msk.f32.mxu1 %vm2936_vm1, %v2836_v29 }
 0x332   :  { %3061 = vmatmul.mubr.f32.gmra.mrb[52].mxu1 %v2833_v48  ;;  %v2532_v47 = vsel %vm2432_vm15, %v2531_v15, %v7186_v8  ;;  %v4580_v15 = vunpack.i.l.bf16 %v7212_v32  ;;  %v4581_v48 = vunpack.i.h.bf16 %v7212_v32 }
 0x333   :  { %3826 = vmatprep.mubr.msk.f32.mxu1 %vm2936_vm1, %v2532_v47 }
 0x334   :  { %v2537_v62 = vpop.permute.xlu1 %2536 }
 0x338   :  { %v4574_v31 = vpop.permute.xlu1 %4573 }
 0x339   :  { %v4576_v25 = vunpack.i.h.bf16 %v4574_v31  ;;  %v4575_v61 = vunpack.i.l.bf16 %v4574_v31 }
 0x33b   :  { %v2554_v50 = vsel %vm2426_vm2, %v6699_v14, %v4576_v25  ;;  %v2555_v55 = vsel %vm2426_vm2, %v6894_v12, %v4576_v25  ;;  %v2529_v37 = vsel %vm2426_vm2, %v6644_v16, %v4575_v61  ;;  %v2629_v14 = vpop.permute.xlu0 %2628 }
 0x33c   :  { %v2544_v5 = vpop.permute.xlu1 %2543  ;;  %v2530_v8 = vsel %vm2428_vm3, %v2529_v37, %v2517_v1  ;;  %v2556_v36 = vsel %vm2428_vm3, %v2554_v50, %v2537_v62  ;;  %v2557_v35 = vsel %vm2428_vm3, %v2555_v55, %v7175_v60  ;;  %v2604_v50 = vsel %vm2426_vm2, %v6757_v53, %v4581_v48 }
 0x33d   :  { %v2558_v34 = vsel %vm2430_vm14, %v2537_v62, %v2544_v5  ;;  %3066 = vmatmul.mubr.f32.gmra.mrb[54].mxu1 %v2530_v8  ;;  %v2559_v12 = vsel %vm2430_vm14, %v7175_v60, %v2544_v5  ;;  %v2842_v26 = vrot.slane %v2556_v36, 4  ;;  %v2843_v13 = vrot.slane %v2557_v35, 4 }
 0x33e   :  { %v2560_v6 = vsel %vm2432_vm15, %v2558_v34, %v2549_v10  ;;  %v2578_v62 = vsel %vm2426_vm2, %v6782_v42, %v4580_v15  ;;  %v2603_v42 = vsel %vm2426_vm2, %v6786_v0, %v4581_v48  ;;  %v2607_v53 = vsel %vm2430_vm14, %v7223_v2, %v2593_v7 }
 0x33f   :  { %v2845_v56 = vrot.slane %v2560_v6, 4  ;;  %v2844_v10 = vsel %vm1613_vm7, %v2842_v26, %v2843_v13  ;;  %v2579_v32 = vsel %vm2428_vm3, %v2578_v62, %v7196_v63  ;;  %v2605_v8 = vsel %vm2428_vm3, %v2603_v42, %v7223_v2 }
 0x340   :  { %v2551_v59 = vpop.permute.xlu1 %2550  ;;  %v7268_v11 = vpop.permute.xlu0 %2655 }
 0x341   :  { %v2561_v16 = vsel %vm2432_vm15, %v2559_v12, %v2551_v59 }
 0x342   :  { %v2846_v58 = vrot.slane %v2561_v16, 4 }
 0x344   :  { %v2588_v1 = vpop.permute.xlu1 %2587  ;;  %v2847_v29 = vsel %vm1613_vm7, %v2845_v56, %v2846_v58  ;;  %v7275_v47 = vpop.permute.xlu0 %2692  ;;  %v7986_v58 = vld [vmem:[#allocation47_spill] sm:$0xff] }
 0x345   :  { %3827 = vmatprep.mubr.msk.f32.mxu1 %vm2936_vm1, %v2847_v29  ;;  %v2608_v31 = vsel %vm2430_vm14, %v2588_v1, %v2593_v7  ;;  %v2606_v37 = vsel %vm2428_vm3, %v2604_v50, %v2588_v1  ;;  %v4536_v29 = vunpack.i.h.bf16 %v6850_v45 }
 0x346   :  { %3071 = vmatmul.mubr.f32.gmra.mrb[56].mxu1 %v2844_v10  ;;  %v2610_v5 = vsel %vm2432_vm15, %v2608_v31, %v2600_v49  ;;  %v2854_v35 = vrot.slane %v2606_v37, 4  ;;  %v4526_v49 = vunpack.i.h.bf16 %v6823_v24  ;;  %v4531_v24 = vunpack.i.h.bf16 %v6796_v44 }
 0x347   :  { %v2857_v12 = vrot.slane %v2610_v5, 4 }
 0x348   :  { %v2572_v60 = vpop.permute.xlu1 %2571  ;;  %v2633_v34 = vpop.permute.xlu0 %2632  ;;  %v2026_v1 = vsel %vm1620_vm8, %v7986_v58, %v4526_v49  ;;  %vm3218_vm8 = vcmask 261120  }
 0x349   :  { %v2580_v25 = vsel %vm2430_vm14, %v7196_v63, %v2572_v60  ;;  %v2853_v63 = vrot.slane %v2605_v8, 4  ;;  %v2027_v10 = vsel %vm1622_vm9, %v2026_v1, %v4531_v24 }
 0x34a   :  { %v2028_v48 = vsel %vm1624_vm10, %v2027_v10, %v4536_v29  ;;  %vm3220_vm10 = vcmask 424960  }
 0x34b   :  { %v2855_v13 = vsel %vm1613_vm7, %v2853_v63, %v2854_v35 }
 0x34c   :  { %v2576_v61 = vpop.permute.xlu1 %2575  ;;  %v2673_v2 = vpop.permute.xlu0 %2672 }
 0x34d   :  { %v2581_v55 = vsel %vm2432_vm15, %v2580_v25, %v2576_v61 }
 0x34e   :  { %3828 = vmatprep.mubr.msk.f32.mxu1 %vm2936_vm1, %v2581_v55 }
 0x34f   :  { %3076 = vmatmul.mubr.f32.gmra.mrb[58].mxu1 %v2579_v32  ;;  %v2714_v32 = vsel %vm2430_vm14, %v7275_v47, %v7018_v54 }
 0x350   :  { %v2598_v36 = vpop.permute.xlu1 %2597  ;;  %v4589_v15 = vpop.permute.xlu0 %4588 }
 0x351   :  { %v2609_v6 = vsel %vm2432_vm15, %v2607_v53, %v2598_v36  ;;  %v4591_v42 = vunpack.i.h.bf16 %v4589_v15  ;;  %v4590_v63 = vunpack.i.l.bf16 %v4589_v15 }
 0x352   :  { %v2856_v59 = vrot.slane %v2609_v6, 4 }
 0x354   :  { %v2621_v16 = vpop.permute.xlu1 %2620  ;;  %v2858_v0 = vsel %vm1613_vm7, %v2856_v59, %v2857_v12  ;;  %v7327_v5 = vpop.permute.xlu0 %2770  ;;  %v2715_v12 = vsel %vm2430_vm14, %v6992_v23, %v7018_v54  ;;  %v2716_v59 = vsel %vm2432_vm15, %v2714_v32, %v7020_v21  ;;  %v2889_v54 = vrot.slane %v7093_v19, 4  ;;  %v7987_v32 = vld [vmem:[#allocation55_spill] sm:$0xff] }
 0x355   :  { %v2637_v26 = vsel %vm2430_vm14, %v2621_v16, %v2629_v14  ;;  %3829 = vmatprep.mubr.msk.f32.mxu1 %vm2936_vm1, %v2858_v0  ;;  %v4541_v14 = vunpack.i.h.bf16 %v6863_v51  ;;  %v2717_v21 = vsel %vm2432_vm15, %v2715_v12, %v6990_v46 }
 0x356   :  { %3081 = vmatmul.mubr.f32.gmra.mrb[60].mxu1 %v2855_v13  ;;  %v2638_v7 = vsel %vm2432_vm15, %v2637_v26, %v2633_v34  ;;  %v2878_v13 = vrot.slane %v2716_v59, 4  ;;  %v2879_v29 = vrot.slane %v2717_v21, 4 }
 0x357   :  { %3830 = vmatprep.mubr.msk.f32.mxu1 %vm2936_vm1, %v2638_v7  ;;  %v2029_v25 = vsel %vm1626_vm11, %v2028_v48, %v4541_v14 }
 0x358   :  { %v2644_v56 = vpop.permute.xlu1 %2643 }
 0x35c   :  { %v4584_v60 = vpop.permute.xlu1 %4583 }
 0x35d   :  { %v4586_v62 = vunpack.i.h.bf16 %v4584_v60  ;;  %v4585_v31 = vunpack.i.l.bf16 %v4584_v60 }
 0x35f   :  { %v2661_v61 = vsel %vm2426_vm2, %v7074_v3, %v4586_v62  ;;  %v2662_v45 = vsel %vm2426_vm2, %v7077_v52, %v4586_v62  ;;  %v2635_v44 = vsel %vm2426_vm2, %v2029_v25, %v4585_v31 }
 0x360   :  { %v2651_v50 = vpop.permute.xlu1 %2650  ;;  %v2636_v51 = vsel %vm2428_vm3, %v2635_v44, %v2621_v16  ;;  %v2663_v55 = vsel %vm2428_vm3, %v2661_v61, %v2644_v56  ;;  %v2664_v37 = vsel %vm2428_vm3, %v2662_v45, %v7251_v9  ;;  %v2711_v16 = vsel %vm2426_vm2, %v6947_v20, %v4591_v42 }
 0x361   :  { %v2665_v3 = vsel %vm2430_vm14, %v2644_v56, %v2651_v50  ;;  %v2666_v52 = vsel %vm2430_vm14, %v7251_v9, %v2651_v50  ;;  %3086 = vmatmul.mubr.f32.gmra.mrb[62].mxu1 %v2636_v51  ;;  %v2864_v34 = vrot.slane %v2663_v55, 4  ;;  %v2865_v36 = vrot.slane %v2664_v37, 4 }
 0x362   :  { %v2667_v8 = vsel %vm2432_vm15, %v2665_v3, %v7268_v11  ;;  %v2668_v53 = vsel %vm2432_vm15, %v2666_v52, %v6977_v33  ;;  %v2764_v9 = vsel %vm2430_vm14, %v7003_v38, %v7081_v43  ;;  %v2710_v33 = vsel %vm2426_vm2, %v6955_v30, %v4591_v42  ;;  %v4594_v30 = vpop.permute.xlu0 %4593 }
 0x363   :  { %v2867_v35 = vrot.slane %v2667_v8, 4  ;;  %v2868_v6 = vrot.slane %v2668_v53, 4  ;;  %v2866_v43 = vsel %vm1613_vm7, %v2864_v34, %v2865_v36  ;;  %v2685_v20 = vsel %vm2426_vm2, %v7085_v17, %v4590_v63 }
 0x364   :  { %v2756_v11 = vpop.permute.xlu1 %2755  ;;  %v2712_v56 = vsel %vm2428_vm3, %v2710_v33, %v7275_v47  ;;  %v2713_v19 = vsel %vm2428_vm3, %v2711_v16, %v6992_v23  ;;  %v2686_v24 = vsel %vm2428_vm3, %v2685_v20, %v2673_v2  ;;  %v2880_v47 = vsel %vm1613_vm7, %v2878_v13, %v2879_v29 }
 0x365   :  { %v2766_v0 = vsel %vm2432_vm15, %v2764_v9, %v2756_v11  ;;  %v2869_v49 = vsel %vm1613_vm7, %v2867_v35, %v2868_v6  ;;  %v2875_v14 = vrot.slane %v2712_v56, 4  ;;  %v2876_v17 = vrot.slane %v2713_v19, 4 }
 0x366   :  { %v2890_v26 = vrot.slane %v2766_v0, 4  ;;  %3831 = vmatprep.mubr.msk.f32.mxu1 %vm2936_vm1, %v2869_v49  ;;  %v2791_v23 = vpop.permute.xlu0 %2790  ;;  %v4596_v25 = vunpack.i.h.bf16 %v4594_v30  ;;  %v4595_v51 = vunpack.i.l.bf16 %v4594_v30 }
 0x367   :  { %3091 = vmatmul.mubr.f32.gmra.mrb[64].mxu1 %v2866_v43  ;;  %v2877_v15 = vsel %vm1613_vm7, %v2875_v14, %v2876_v17 }
 0x368   :  { %v2679_v7 = vpop.permute.xlu1 %2678  ;;  %v2891_v58 = vsel %vm1613_vm7, %v2889_v54, %v2890_v26  ;;  %v2783_v3 = vsel %vm2426_vm2, %v6483_v27, %v4595_v51  ;;  %v3365_v51 = vld [vmem:[%s7661_s5 + $0x8] sm:$0xff] }
 0x369   :  { %v2687_v1 = vsel %vm2430_vm14, %v2673_v2, %v2679_v7  ;;  %v2784_v35 = vsel %vm2428_vm3, %v2783_v3, %v7327_v5 }
 0x36a   :  { %v2688_v46 = vsel %vm2432_vm15, %v2687_v1, %v7005_v41  ;;  %v2798_v61 = vpop.permute.xlu0 %2797 }
 0x36b   :  { %3832 = vmatprep.mubr.msk.f32.mxu1 %vm2936_vm1, %v2688_v46  ;;  %v2812_v34 = vsel %vm2430_vm14, %v2791_v23, %v2798_v61 }
 0x36c   :  { %v2777_v10 = vpop.permute.xlu1 %2776  ;;  %3096 = vmatmul.mubr.f32.gmra.mrb[66].mxu1 %v2686_v24 }
 0x36d   :  { %3833 = vmatprep.mubr.msk.f32.mxu1 %vm2936_vm1, %v2880_v47 }
 0x36e   :  { %v2805_v52 = vpop.permute.xlu0 %2804 }
 0x370   :  { %v4599_v60 = vpop.permute.xlu1 %4598  ;;  %3101 = vmatmul.mubr.f32.gmra.mrb[68].mxu1 %v2877_v15 }
 0x371   :  { %v4601_v48 = vunpack.i.h.bf16 %v4599_v60  ;;  %v4600_v62 = vunpack.i.l.bf16 %v4599_v60  ;;  %3834 = vmatprep.mubr.msk.f32.mxu1 %vm2936_vm1, %v7061_v4 }
 0x373   :  { %v2759_v41 = vsel %vm2426_vm2, %v6996_v18, %v4601_v48  ;;  %v2760_v2 = vsel %vm2426_vm2, %v6444_v39, %v4601_v48  ;;  %v2734_v31 = vsel %vm2426_vm2, %v7016_v57, %v4600_v62  ;;  %v2808_v57 = vsel %vm2426_vm2, %v6491_v28, %v4596_v25 }
 0x374   :  { %v2781_v45 = vpop.permute.xlu1 %2780  ;;  %v2735_v44 = vsel %vm2428_vm3, %v2734_v31, %v7034_v40  ;;  %v2761_v50 = vsel %vm2428_vm3, %v2759_v41, %v7056_v22  ;;  %v2762_v4 = vsel %vm2428_vm3, %v2760_v2, %v7003_v38  ;;  %v2785_v40 = vsel %vm2430_vm14, %v7327_v5, %v2777_v10 }
 0x375   :  { %3106 = vmatmul.mubr.f32.gmra.mrb[70].mxu1 %v2735_v44  ;;  %v2886_v18 = vrot.slane %v2761_v50, 4  ;;  %v2887_v55 = vrot.slane %v2762_v4, 4  ;;  %v2786_v22 = vsel %vm2432_vm15, %v2785_v40, %v2781_v45  ;;  %v2809_v38 = vsel %vm2426_vm2, %v7987_v32, %v4596_v25  ;;  %v3381_v45 = vld [vmem:[%s7661_s5 + $0x88] sm:$0xff]  ;;  %v3364_v44 = vld [vmem:[%s7661_s5] sm:$0xff]  ;;  %v3366_v40 = vld [vmem:[%s7661_s5 + $0x10] sm:$0xff] }
 0x376   :  { %3835 = vmatprep.mubr.msk.f32.mxu1 %vm2936_vm1, %v2891_v58  ;;  %v2810_v53 = vsel %vm2428_vm3, %v2808_v57, %v2791_v23  ;;  %v3383_v57 = vld [vmem:[%s7661_s5 + $0x98] sm:$0xff] }
 0x377   :  { %v2888_v39 = vsel %vm1613_vm7, %v2886_v18, %v2887_v55  ;;  %v2897_v59 = vrot.slane %v2810_v53, 4  ;;  %v3382_v18 = vld [vmem:[%s7661_s5 + $0x90] sm:$0xff] }
 0x378   :  { %v2793_v37 = vpop.permute.xlu1 %2792  ;;  %v4430_v32 = vpack.c.bf16 %v3383_v57, %v3382_v18 }
 0x379   :  { %v2813_v42 = vsel %vm2430_vm14, %v2793_v37, %v2798_v61  ;;  %3111 = vmatmul.mubr.f32.gmra.mrb[72].mxu1 %v2888_v39  ;;  %v2811_v8 = vsel %vm2428_vm3, %v2809_v38, %v2793_v37  ;;  %v3380_v61 = vld [vmem:[%s7661_s5 + $0x80] sm:$0xff]  ;;  %v4428_v39 = vpack.c.bf16 %v3365_v51, %v3364_v44  ;;  %v3367_v37 = vld [vmem:[%s7661_s5 + $0x18] sm:$0xff]  ;;  %vm3231_vm14 = vcmask 359424  }
 0x37a   :  { %3836 = vmatprep.mubr.msk.f32.mxu1 %vm2936_vm1, %v2786_v22  ;;  %v2815_v28 = vsel %vm2432_vm15, %v2813_v42, %v2805_v52  ;;  %v2898_v6 = vrot.slane %v2811_v8, 4  ;;  %v4426_v4 = vpack.c.bf16 %v3381_v45, %v3380_v61  ;;  %v3384_v38 = vld [vmem:[%s7661_s5 + $0xa0] sm:$0xff]  ;;  %v3385_v42 = vld [vmem:[%s7661_s5 + $0xa8] sm:$0xff]  ;;  %v4432_v3 = vpack.c.bf16 %v3367_v37, %v3366_v40  ;;  %v3374_v61 = vld [vmem:[%s7661_s5 + $0x50] sm:$0xff] }
 0x37b   :  { %v2901_v27 = vrot.slane %v2815_v28, 4  ;;  %v4434_v52 = vpack.c.bf16 %v3385_v42, %v3384_v38  ;;  %v3368_v8 = vld [vmem:[%s7661_s5 + $0x20] sm:$0xff]  ;;  %v3369_v28 = vld [vmem:[%s7661_s5 + $0x28] sm:$0xff] }
 0x37c   :  { %v2803_v36 = vpop.permute.xlu1 %2802  ;;  %v2899_v11 = vsel %vm1613_vm7, %v2897_v59, %v2898_v6  ;;  %4427 = vmatprep.subr.bf16.mxu1 %v4426_v4 }
 0x37d   :  { %v2814_v12 = vsel %vm2432_vm15, %v2812_v34, %v2803_v36  ;;  %3116 = vmatmul.mubr.f32.gmra.mrb[74].mxu1 %v2784_v35  ;;  %v4436_v35 = vpack.c.bf16 %v3369_v28, %v3368_v8 }
 0x37e   :  { %v2900_v9 = vrot.slane %v2814_v12, 4  ;;  %4429 = vmatpush3.bf16.msra.mxu1 %v4428_v39 }
 0x37f   :  { %4431 = vmatprep.subr.bf16.mxu1 %v4430_v32 }
 0x380   :  { %v2902_v63 = vsel %vm1613_vm7, %v2900_v9, %v2901_v27  ;;  %vm3214_vm7 = vcmask 982016  }
 0x381   :  { %3837 = vmatprep.mubr.msk.f32.mxu1 %vm2936_vm1, %v2902_v63  ;;  %vm4652_vm1 = vmmov 0  }
 0x382   :  { %3121 = vmatmul.mubr.f32.gmra.mrb[76].mxu1 %v2899_v11  ;;  %v3386_v11 = vld [vmem:[%s7661_s5 + $0xb0] sm:$0xff] }
 0x383   :  { %4433 = vmatpush3.bf16.msra.mxu1 %v4432_v3 }
 0x384   :  { %4435 = vmatprep.subr.bf16.mxu1 %v4434_v52 }
 0x387   :  { %4437 = vmatpush3.bf16.msra.mxu1 %v4436_v35 }
 0x3ec   :  { %v4023_v33 = vpop.f32.mrb[46].mxu1 }
 0x3ed   :  { %v4024_v16 = vpop.f32.mrb[47].mxu1 }
 0x3ee   :  { %v4025_v0 = vadd.f32 %v4024_v16, %v4023_v33  ;;  %v3387_v33 = vld [vmem:[%s7661_s5 + $0xb8] sm:$0xff]  ;;  %v3370_v16 = vld [vmem:[%s7661_s5 + $0x30] sm:$0xff] }
 0x3f5   :  { %v4026_v49 = vpop.f32.mrb[48].mxu1 }
 0x3f6   :  { %v4027_v54 = vpop.f32.mrb[49].mxu1 }
 0x3f7   :  { %v4028_v5 = vadd.f32 %v4027_v54, %v4026_v49  ;;  %v4438_v49 = vpack.c.bf16 %v3387_v33, %v3386_v11  ;;  %v3371_v54 = vld [vmem:[%s7661_s5 + $0x38] sm:$0xff] }
 0x3f9   :  { %v3126_v26 = vmax.f32 %v4025_v0, %v4028_v5  ;;  %4439 = vmatprep.subr.bf16.mxu1 %v4438_v49 }
 0x3fb   :  { %v3128_v43 = vrot.slane %v3126_v26, 1 }
 0x3fd   :  { %v7404_v21 = vmax.f32 %v3126_v26, %v3128_v43  ;;  %v4440_v26 = vpack.c.bf16 %v3371_v54, %v3370_v16  ;;  %v3394_v16 = vld [vmem:[%s7661_s5 + $0xf0] sm:$0xff] }
 0x3fe   :  { %v4029_v13 = vpop.f32.mrb[50].mxu1 }
 0x3ff   :  { %v4030_v30 = vpop.f32.mrb[51].mxu1  ;;  %v3147_v7 = vrot.slane %v7404_v21, 2  ;;  %v3151_v56 = vrot.slane %v7404_v21, 4  ;;  %v3155_v29 = vrot.slane %v7404_v21, 6  ;;  %4441 = vmatpush3.bf16.msra.mxu1 %v4440_v26  ;;  %v3379_v26 = vld [vmem:[%s7661_s5 + $0x78] sm:$0xff] }
 0x400   :  { %v4031_v20 = vadd.f32 %v4030_v30, %v4029_v13 }
 0x401   :  { %3148 = vrot.lane.b32.xlu1 %v3147_v7, %s4632_s20 }
 0x405   :  { %v4032_v19 = vpop.f32.mrb[52].mxu1  ;;  %3152 = vrot.lane.b32.xlu1 %v3151_v56, %s4635_s22 }
 0x406   :  { %v4033_v58 = vpop.f32.mrb[53].mxu1 }
 0x407   :  { %v4034_v1 = vadd.f32 %v4033_v58, %v4032_v19  ;;  %v3388_v19 = vld [vmem:[%s7661_s5 + $0xc0] sm:$0xff]  ;;  %v3389_v58 = vld [vmem:[%s7661_s5 + $0xc8] sm:$0xff] }
 0x409   :  { %v3131_v46 = vmax.f32 %v4031_v20, %v4034_v1  ;;  %3156 = vrot.lane.b32.xlu1 %v3155_v29, %s4640_s3  ;;  %v3372_v1 = vld [vmem:[%s7661_s5 + $0x40] sm:$0xff] }
 0x40b   :  { %v3133_v24 = vrot.slane %v3131_v46, 1 }
 0x40d   :  { %v7412_v14 = vmax.f32 %v3131_v46, %v3133_v24  ;;  %v4442_v46 = vpack.c.bf16 %v3389_v58, %v3388_v19  ;;  %v3373_v24 = vld [vmem:[%s7661_s5 + $0x48] sm:$0xff]  ;;  %v4648_v58 = vmov 0.0|0.0  }
 0x40f   :  { %3160 = vrot.lane.b32.xlu1 %v7412_v14, %s4641_s26  ;;  %v3171_v17 = vrot.slane %v7412_v14, 6  ;;  %v3167_v23 = vrot.slane %v7412_v14, 4  ;;  %4443 = vmatprep.subr.bf16.mxu1 %v4442_v46  ;;  %v3163_v49 = vrot.slane %v7412_v14, 2 }
 0x410   :  { %v4035_v10 = vpop.f32.mrb[54].mxu1 }
 0x411   :  { %v4036_v47 = vpop.f32.mrb[55].mxu1  ;;  %3172 = vrot.lane.b32.xlu0 %v3171_v17, %s4642_s11 }
 0x412   :  { %v4037_v15 = vadd.f32 %v4036_v47, %v4035_v10  ;;  %v4444_v10 = vpack.c.bf16 %v3373_v24, %v3372_v1 }
 0x413   :  { %3168 = vrot.lane.b32.xlu1 %v3167_v23, %s4643_s16 }
 0x414   :  { %4445 = vmatpush3.bf16.msra.mxu1 %v4444_v10 }
 0x419   :  { %v4038_v60 = vpop.f32.mrb[56].mxu1 }
 0x41a   :  { %v4039_v48 = vpop.f32.mrb[57].mxu1 }
 0x41b   :  { %v4040_v62 = vadd.f32 %v4039_v48, %v4038_v60 }
 0x41d   :  { %v3136_v41 = vmax.f32 %v4037_v15, %v4040_v62 }
 0x41f   :  { %v3138_v2 = vrot.slane %v3136_v41, 1 }
 0x421   :  { %v3140_v31 = vmax.f32 %v3136_v41, %v3138_v2 }
 0x422   :  { %v4041_v25 = vpop.f32.mrb[58].mxu1 }
 0x423   :  { %v4042_v50 = vpop.f32.mrb[59].mxu1  ;;  %3176 = vrot.lane.b32.xlu0 %v3140_v31, %s4644_s23  ;;  %v3179_v22 = vrot.slane %v3140_v31, 2  ;;  %v3183_v34 = vrot.slane %v3140_v31, 4  ;;  %v3187_v27 = vrot.slane %v3140_v31, 6  ;;  %v3390_v31 = vld [vmem:[%s7661_s5 + $0xd0] sm:$0xff] }
 0x424   :  { %v4043_v55 = vadd.f32 %v4042_v50, %v4041_v25  ;;  %v3391_v25 = vld [vmem:[%s7661_s5 + $0xd8] sm:$0xff] }
 0x425   :  { %v4446_v44 = vpack.c.bf16 %v3391_v25, %v3390_v31  ;;  %v3375_v50 = vld [vmem:[%s7661_s5 + $0x58] sm:$0xff] }
 0x426   :  { %v4448_v51 = vpack.c.bf16 %v3375_v50, %v3374_v61 }
 0x427   :  { %3180 = vrot.lane.b32.xlu0 %v3179_v22, %s4645_s1  ;;  %4447 = vmatprep.subr.bf16.mxu1 %v4446_v44 }
 0x428   :  { %4449 = vmatpush3.bf16.msra.mxu1 %v4448_v51 }
 0x429   :  { %v4044_v53 = vpop.f32.mrb[60].mxu1 }
 0x42a   :  { %v4045_v36 = vpop.f32.mrb[61].mxu1 }
 0x42b   :  { %v4046_v6 = vadd.f32 %v4045_v36, %v4044_v53  ;;  %3184 = vrot.lane.b32.xlu0 %v3183_v34, %s4636_s2  ;;  %v3392_v53 = vld [vmem:[%s7661_s5 + $0xe0] sm:$0xff]  ;;  %v3393_v34 = vld [vmem:[%s7661_s5 + $0xe8] sm:$0xff] }
 0x42c   :  { %v4450_v35 = vpack.c.bf16 %v3393_v34, %v3392_v53 }
 0x42d   :  { %v7459_v12 = vmax.f32 %v4043_v55, %v4046_v6  ;;  %v3376_v6 = vld [vmem:[%s7661_s5 + $0x60] sm:$0xff] }
 0x42e   :  { %4451 = vmatprep.subr.bf16.mxu1 %v4450_v35 }
 0x42f   :  { %3188 = vrot.lane.b32.xlu0 %v3187_v27, %s4646_s29  ;;  %v3377_v27 = vld [vmem:[%s7661_s5 + $0x68] sm:$0xff] }
 0x430   :  { %v4452_v11 = vpack.c.bf16 %v3377_v27, %v3376_v6 }
 0x432   :  { %4453 = vmatpush3.bf16.msra.mxu1 %v4452_v11 }
 0x434   :  { %v4047_v9 = vpop.f32.mrb[62].mxu1 }
 0x435   :  { %v4048_v59 = vpop.f32.mrb[63].mxu1 }
 0x436   :  { %v4049_v63 = vadd.f32 %v4048_v59, %v4047_v9  ;;  %v3143_v9 = vrot.slane %v7459_v12, 1 }
 0x43a   :  { %v4050_v0 = vpop.f32.mrb[64].mxu1 }
 0x43b   :  { %v4051_v5 = vpop.f32.mrb[65].mxu1 }
 0x43c   :  { %v4052_v43 = vadd.f32 %v4051_v5, %v4050_v0  ;;  %v3395_v0 = vld [vmem:[%s7661_s5 + $0xf8] sm:$0xff]  ;;  %v3378_v5 = vld [vmem:[%s7661_s5 + $0x70] sm:$0xff] }
 0x43d   :  { %v4454_v54 = vpack.c.bf16 %v3395_v0, %v3394_v16 }
 0x43e   :  { %v3233_v13 = vmax.f32 %v4049_v63, %v4052_v43  ;;  %v3145_v43 = vmax.f32 %v7459_v12, %v3143_v9  ;;  %v3341_v9 = vld [vmem:[%s7660_s4] sm:$0x7] }
 0x43f   :  { %v4053_v30 = vpop.f32.mrb[66].mxu1  ;;  %4455 = vmatprep.subr.bf16.mxu1 %v4454_v54 }
 0x440   :  { %v3235_v7 = vrot.slane %v3233_v13, 1  ;;  %v4054_v20 = vpop.f32.mrb[67].mxu1  ;;  %v3199_v12 = vrot.slane %v3145_v43, 4  ;;  %v3203_v24 = vrot.slane %v3145_v43, 6 }
 0x441   :  { %v4055_v56 = vadd.f32 %v4054_v20, %v4053_v30 }
 0x442   :  { %v7483_v29 = vmax.f32 %v3233_v13, %v3235_v7  ;;  %v4456_v7 = vpack.c.bf16 %v3379_v26, %v3378_v5 }
 0x443   :  { %v4056_v17 = vpop.f32.mrb[68].mxu1 }
 0x444   :  { %v4057_v47 = vpop.f32.mrb[69].mxu1  ;;  %v3254_v23 = vrot.slane %v7483_v29, 2  ;;  %v3258_v62 = vrot.slane %v7483_v29, 4  ;;  %v3262_v55 = vrot.slane %v7483_v29, 6  ;;  %4457 = vmatpush3.bf16.msra.mxu1 %v4456_v7 }
 0x445   :  { %v4058_v15 = vadd.f32 %v4057_v47, %v4056_v17  ;;  %4458 = vmatprep.subr.bf16.mxu1 %v4648_v58 }
 0x446   :  { %3255 = vrot.lane.b32.xlu1 %v3254_v23, %s4632_s20 }
 0x447   :  { %v3238_v60 = vmax.f32 %v4055_v56, %v4058_v15  ;;  %v3195_v56 = vrot.slane %v3145_v43, 2 }
 0x448   :  { %v4059_v48 = vpop.f32.mrb[70].mxu1 }
 0x449   :  { %v3240_v41 = vrot.slane %v3238_v60, 1  ;;  %v4060_v2 = vpop.f32.mrb[71].mxu1 }
 0x44a   :  { %v4061_v45 = vadd.f32 %v4060_v2, %v4059_v48  ;;  %3259 = vrot.lane.b32.xlu1 %v3258_v62, %s4635_s22 }
 0x44b   :  { %v3242_v4 = vmax.f32 %v3238_v60, %v3240_v41 }
 0x44c   :  { %v4062_v18 = vpop.f32.mrb[72].mxu1 }
 0x44d   :  { %v4063_v39 = vpop.f32.mrb[73].mxu1  ;;  %v3278_v57 = vrot.slane %v3242_v4, 6  ;;  %v3274_v52 = vrot.slane %v3242_v4, 4  ;;  %v3270_v63 = vrot.slane %v3242_v4, 2 }
 0x44e   :  { %v4064_v40 = vadd.f32 %v4063_v39, %v4062_v18  ;;  %3263 = vrot.lane.b32.xlu1 %v3262_v55, %s4640_s3  ;;  %v3343_v55 = vlaneseq }
 0x44f   :  { %3279 = vrot.lane.b32.xlu0 %v3278_v57, %s4642_s11 }
 0x450   :  { %v3243_v37 = vmax.f32 %v4061_v45, %v4064_v40  ;;  %v4065_v22 = vpop.f32.mrb[74].mxu1 }
 0x451   :  { %v4066_v32 = vpop.f32.mrb[75].mxu1 }
 0x452   :  { %v3245_v38 = vrot.slane %v3243_v37, 1  ;;  %v4067_v42 = vadd.f32 %v4066_v32, %v4065_v22  ;;  %3267 = vrot.lane.b32.xlu1 %v3242_v4, %s4641_s26 }
 0x454   :  { %v3247_v3 = vmax.f32 %v3243_v37, %v3245_v38 }
 0x455   :  { %v4068_v8 = vpop.f32.mrb[76].mxu1 }
 0x456   :  { %v4069_v28 = vpop.f32.mrb[77].mxu1  ;;  %3283 = vrot.lane.b32.xlu0 %v3247_v3, %s4644_s23  ;;  %3275 = vrot.lane.b32.xlu1 %v3274_v52, %s4643_s16  ;;  %v3286_v59 = vrot.slane %v3247_v3, 2  ;;  %v3290_v30 = vrot.slane %v3247_v3, 4  ;;  %v3294_v20 = vrot.slane %v3247_v3, 6  ;;  %v7550_v3 = vshrl.u32 %v3343_v55, 7 }
 0x457   :  { %v4070_v36 = vadd.f32 %v4069_v28, %v4068_v8 }
 0x458   :  { %v3345_v6 = vsub.s32 0, %v7550_v3 }
 0x459   :  { %v3248_v33 = vmax.f32 %v4067_v42, %v4070_v36 }
 0x45a   :  { %3287 = vrot.lane.b32.xlu0 %v3286_v59, %s4645_s1  ;;  %3271 = vrot.lane.b32.xlu1 %v3270_v63, %s4637_s25  ;;  %v3349_v59 = vsub.s32 1, %v7550_v3 }
 0x45b   :  { %v3250_v13 = vrot.slane %v3248_v33, 1 }
 0x45c   :  { %v3350_v7 = vrot.slane %v3341_v9, %v3349_v59 }
 0x45d   :  { %v3252_v14 = vmax.f32 %v3248_v33, %v3250_v13 }
 0x45e   :  { %3291 = vrot.lane.b32.xlu0 %v3290_v30, %s4636_s2  ;;  %3164 = vrot.lane.b32.xlu1 %v3163_v49, %s4637_s25  ;;  %s4650_s2 = smov 24   ;;  %s4651_s25 = smov 44  }
 0x45f   :  { %v3302_v19 = vrot.slane %v3252_v14, 2  ;;  %v3306_v1 = vrot.slane %v3252_v14, 4  ;;  %v3310_v46 = vrot.slane %v3252_v14, 6 }
 0x462   :  { %3295 = vrot.lane.b32.xlu0 %v3294_v20, %s4646_s29  ;;  %3196 = vrot.lane.b32.xlu1 %v3195_v56, %s4647_s14 }
 0x466   :  { %3299 = vrot.lane.b32.xlu0 %v3252_v14, %s4649_s15  ;;  %3303 = vrot.lane.b32.xlu1 %v3302_v19, %s4647_s14 }
 0x46a   :  { %3192 = vrot.lane.b32.xlu0 %v3145_v43, %s4649_s15  ;;  %3200 = vrot.lane.b32.xlu1 %v3199_v12, %s4650_s2  ;;  %v3346_v43 = vrot.slane %v3341_v9, %v3345_v6  ;;  %v3561_v6 = vld [vmem:[%s7663_s7 + $0x28] sm:$0xff] }
 0x46e   :  { %3307 = vrot.lane.b32.xlu0 %v3306_v1, %s4650_s2 }
 0x472   :  { %3311 = vrot.lane.b32.xlu0 %v3310_v46, %s4651_s25  ;;  %v3396_v46 = vld [vmem:[%s7661_s5 + $0x100] sm:$0xff] }
 0x473   :  { %v3149_v17 = vpop.permute.xlu1 %3148 }
 0x474   :  { %v3207_v37 = vsel %vm1622_vm9, %v7404_v21, %v3149_v17 }
 0x476   :  { %3204 = vrot.lane.b32.xlu0 %v3203_v24, %s4651_s25  ;;  %v3397_v24 = vld [vmem:[%s7661_s5 + $0x108] sm:$0xff] }
 0x477   :  { %v3153_v10 = vpop.permute.xlu1 %3152 }
 0x478   :  { %v3208_v32 = vsel %vm1626_vm11, %v3207_v37, %v3153_v10 }
 0x47b   :  { %v3157_v47 = vpop.permute.xlu1 %3156 }
 0x47c   :  { %v3210_v8 = vsel %vm3209_vm4, %v3208_v32, %v3157_v47  ;;  %v3402_v32 = vld [vmem:[%s7661_s5 + $0x130] sm:$0xff] }
 0x481   :  { %v3161_v15 = vpop.permute.xlu1 %3160 }
 0x482   :  { %v3212_v28 = vsel %vm3211_vm5, %v3210_v8, %v3161_v15  ;;  %v4459_v15 = vpack.c.bf16 %v3397_v24, %v3396_v46 }
 0x483   :  { %v3173_v23 = vpop.permute.xlu0 %3172 }
 0x485   :  { %v3169_v48 = vpop.permute.xlu1 %3168 }
 0x486   :  { %v3217_v63 = vsel %vm3216_vm6, %v3169_v48, %v3173_v23 }
 0x495   :  { %v3177_v60 = vpop.permute.xlu0 %3176 }
 0x496   :  { %v3219_v0 = vsel %vm3218_vm8, %v3217_v63, %v3177_v60 }
 0x499   :  { %v3181_v62 = vpop.permute.xlu0 %3180 }
 0x49a   :  { %v3221_v26 = vsel %vm3220_vm10, %v3219_v0, %v3181_v62  ;;  %v3399_v62 = vld [vmem:[%s7661_s5 + $0x118] sm:$0xff] }
 0x49d   :  { %v3185_v2 = vpop.permute.xlu0 %3184 }
 0x49e   :  { %v3222_v13 = vsel %vm2432_vm15, %v3221_v26, %v3185_v2 }
 0x4a1   :  { %v3189_v25 = vpop.permute.xlu0 %3188 }
 0x4b8   :  { %v3256_v41 = vpop.permute.xlu1 %3255 }
 0x4b9   :  { %v3314_v39 = vsel %vm1622_vm9, %v7483_v29, %v3256_v41  ;;  %vm3225_vm9 = vcmask 916480  }
 0x4bc   :  { %v3260_v31 = vpop.permute.xlu1 %3259 }
 0x4bd   :  { %v3315_v57 = vsel %vm1626_vm11, %v3314_v39, %v3260_v31  ;;  %vm3223_vm11 = vcmask 752640  }
 0x4be   :  { %v3224_v14 = vsel %vm3223_vm11, %v3222_v13, %v3189_v25 }
 0x4c0   :  { %v3264_v61 = vpop.permute.xlu1 %3263 }
 0x4c1   :  { %v3280_v45 = vpop.permute.xlu0 %3279  ;;  %v3316_v22 = vsel %vm3209_vm4, %v3315_v57, %v3264_v61 }
 0x4c4   :  { %v3268_v44 = vpop.permute.xlu1 %3267 }
 0x4c5   :  { %v3317_v38 = vsel %vm3211_vm5, %v3316_v22, %v3268_v44  ;;  %v4653_v44 = vmov 0.0  }
 0x4c8   :  { %v3284_v50 = vpop.permute.xlu0 %3283  ;;  %v3276_v4 = vpop.permute.xlu1 %3275 }
 0x4c9   :  { %v3320_v42 = vsel %vm3216_vm6, %v3276_v4, %v3280_v45 }
 0x4ca   :  { %v3321_v21 = vsel %vm3218_vm8, %v3320_v42, %v3284_v50 }
 0x4cc   :  { %v3288_v51 = vpop.permute.xlu0 %3287  ;;  %v3272_v18 = vpop.permute.xlu1 %3271 }
 0x4cd   :  { %v3318_v29 = vsel %vm2428_vm3, %v3317_v38, %v3272_v18  ;;  %v3322_v36 = vsel %vm3220_vm10, %v3321_v21, %v3288_v51  ;;  %v3400_v51 = vld [vmem:[%s7661_s5 + $0x120] sm:$0xff]  ;;  %v3401_v18 = vld [vmem:[%s7661_s5 + $0x128] sm:$0xff]  ;;  %v3403_v38 = vld [vmem:[%s7661_s5 + $0x138] sm:$0xff] }
 0x4ce   :  { %v3319_v35 = vsel %vm3214_vm7, %v3318_v29, %v3276_v4  ;;  %v3353_v4 = vsub.s32 2, %v7550_v3  ;;  %v4465_v37 = vpack.c.bf16 %v3401_v18, %v3400_v51  ;;  %v4468_v3 = vpack.c.bf16 %v3403_v38, %v3402_v32  ;;  %v3556_v29 = vld [vmem:[%s7663_s7] sm:$0xff] }
 0x4cf   :  { %v3332_v49 = vrot.slane %v3319_v35, 7  ;;  %v3560_v35 = vld [vmem:[%s7663_s7 + $0x20] sm:$0xff] }
 0x4d0   :  { %v3292_v40 = vpop.permute.xlu0 %3291  ;;  %v3165_v52 = vpop.permute.xlu1 %3164  ;;  %v3354_v22 = vrot.slane %v3341_v9, %v3353_v4  ;;  %v3562_v9 = vld [vmem:[%s7663_s7 + $0x30] sm:$0x3] }
 0x4d1   :  { %v3213_v34 = vsel %vm2428_vm3, %v3212_v28, %v3165_v52  ;;  %v3323_v27 = vsel %vm2432_vm15, %v3322_v36, %v3292_v40  ;;  %vm3229_vm15 = vcmask 195584   ;;  %vm3411_vm3 = vcmask 523264   ;;  %v3557_v28 = vld [vmem:[%s7663_s7 + $0x8] sm:$0xff] }
 0x4d2   :  { %v3215_v11 = vsel %vm3214_vm7, %v3213_v34, %v3169_v48  ;;  %v3398_v48 = vld [vmem:[%s7661_s5 + $0x110] sm:$0xff]  ;;  %v4471_v21 = vpack.c.bf16 %v3557_v28, %v3556_v29  ;;  %v3559_v34 = vld [vmem:[%s7663_s7 + $0x18] sm:$0xff] }
 0x4d3   :  { %v3338_v30 = vsel %vm614_vm0, %v3215_v11, %v3332_v49  ;;  %v4462_v45 = vpack.c.bf16 %v3399_v62, %v3398_v48  ;;  %v3838_v11 = vld [vmem:[%s7662_s6] ss:$0 sm:$0xff]  ;;  %s4654_s6 = smov [#allocation2]  }
 0x4d4   :  { %v3296_v53 = vpop.permute.xlu0 %3295  ;;  %v3197_v54 = vpop.permute.xlu1 %3196  ;;  %v3358_v12 = vadd.f32 %v3346_v43, %v3338_v30 }
 0x4d5   :  { %v3324_v33 = vsel %vm3223_vm11, %v3323_v27, %v3296_v53  ;;  %v3558_v53 = vld [vmem:[%s7663_s7 + $0x10] sm:$0xff]  ;;  %v4477_v27 = vpack.c.bf16 %v3561_v6, %v3560_v35  ;;  %s3667_s7 = sshll.u32 %s4654_s6, 4  ;;  %s3668_s7 = int_to_ptr.vmem [resolvable:$true] %s3667_s7 }
 0x4d6   :  { %v3361_v60 = vmax.f32 %v3358_v12, 0.0  ;;  %v4474_v36 = vpack.c.bf16 %v3559_v34, %v3558_v53  ;;  %p4612_p1 = scmp.lt.s32.totalorder %s3668_s7, %s3668_s7 }
 0x4d8   :  { %v3300_v16 = vpop.permute.xlu0 %3299  ;;  %v3304_v17 = vpop.permute.xlu1 %3303 }
 0x4d9   :  { %v3325_v5 = vsel %vm3225_vm9, %v3324_v33, %v3300_v16  ;;  %v3326_v41 = vsel %vm3227_vm13, %v3300_v16, %v3304_v17 }
 0x4da   :  { %v3333_v20 = vrot.slane %v3325_v5, 7  ;;  %v3840_v5 = vld [vmem:[%s7664_s8] ss:$0 sm:$0xff]  ;;  %s4607_s8 = scalar_lea.vmem %s3668_s7, 32 }
 0x4db   :  { %p4608_p0 = scmp.ne.s32.totalorder %s3668_s7, %s4607_s8  ;;  %p4613_p2 = scmp.lt.s32.totalorder %s4607_s8, %s4607_s8 }
 0x4dc   :  { %v3193_v56 = vpop.permute.xlu0 %3192  ;;  %v3201_v25 = vpop.permute.xlu1 %3200 }
 0x4dd   :  { %v3226_v19 = vsel %vm3225_vm9, %v3224_v14, %v3193_v56  ;;  %v3228_v31 = vsel %vm3227_vm13, %v3193_v56, %v3197_v54  ;;  %p4614_p3 = por %p4613_p2, %p4612_p1 }
 0x4de   :  { %v3339_v1 = vsel %vm614_vm0, %v3226_v19, %v3333_v20  ;;  %v3230_v55 = vsel %vm3229_vm15, %v3228_v31, %v3201_v25 }
 0x4df   :  { %v3359_v10 = vadd.f32 %v3350_v7, %v3339_v1  ;;  %p4615_p4 = pnand %p4614_p3, %p4608_p0 }
 0x4e0   :  { %v3308_v47 = vpop.permute.xlu0 %3307 }
 0x4e1   :  { %v3362_v23 = vmax.f32 %v3359_v10, 0.0  ;;  %v3327_v61 = vsel %vm3229_vm15, %v3326_v41, %v3308_v47 }
 0x4e3   :  { %3479 = vmatprep.mubr.f32.mxu1 %v3362_v23 }
 0x4e4   :  { %v3312_v2 = vpop.permute.xlu0 %3311  ;;  %3480 = vmatmul.mubr.f32.vlgmr.msra.gmra.mrb[78].mxu1 %v3361_v60 }
 0x4e5   :  { %4460 = vmatpush3.bf16.msra.mxu1 %v4459_v15  ;;  %4363 = vmatprep.mubr.msk.f32.mxu1 %vm4652_vm1, %v4653_v44  ;;  %v3328_v50 = vsel %vm3231_vm14, %v3327_v61, %v3312_v2 }
 0x4e6   :  { %4461 = vmatprep.subr.bf16.mxu1 %v4648_v58  ;;  %v3334_v57 = vrot.slane %v3328_v50, 7 }
 0x4e8   :  { %v3205_v39 = vpop.permute.xlu0 %3204 }
 0x4e9   :  { %v3232_v40 = vsel %vm3231_vm14, %v3230_v55, %v3205_v39  ;;  %4463 = vmatpush3.bf16.msra.mxu1 %v4462_v45 }
 0x4ea   :  { %4464 = vmatprep.subr.bf16.mxu1 %v4648_v58  ;;  %v3340_v42 = vsel %vm614_vm0, %v3232_v40, %v3334_v57  ;;  %vm3646_vm0 = vcmask 74752  }
 0x4eb   :  { %v3360_v52 = vadd.f32 %v3354_v22, %v3340_v42 }
 0x4ed   :  { %4466 = vmatpush3.bf16.msra.mxu1 %v4465_v37  ;;  %v3363_v8 = vmax.f32 %v3360_v52, 0.0 }
 0x4ee   :  { %4467 = vmatprep.subr.bf16.mxu1 %v4648_v58 }
 0x4f1   :  { %4469 = vmatpush3.bf16.msra.mxu1 %v4468_v3 }
 0x4f2   :  { %4470 = vmatprep.subr.bf16.mxu1 %v4648_v58 }
 0x4f4   :  { %4364 = vmatmul.mubr.msk.f32.vlgmr.msra.gmra.mrb[80].mxu1 %vm3411_vm3, %v3363_v8 }
 0x4f5   :  { %4380 = vmatprep.mubr.msk.f32.mxu1 %vm4652_vm1, %v4653_v44  ;;  %4472 = vmatpush3.bf16.msra.mxu1 %v4471_v21 }
 0x4f6   :  { %4473 = vmatprep.subr.bf16.mxu1 %v4648_v58 }
 0x4f9   :  { %4475 = vmatpush3.bf16.msra.mxu1 %v4474_v36 }
 0x4fa   :  { %4476 = vmatprep.subr.bf16.mxu1 %v4648_v58 }
 0x4fd   :  { %4478 = vmatpush3.bf16.msra.mxu1 %v4477_v27 }
 0x4fe   :  { %4378 = vmatprep.subr.mxu1 %v4653_v44 }
 0x501   :  { %4379 = vmatpush3.msk.msra.mxu1 %vm2977_vm12, %v3562_v9 }
 0x5b7   :  { %v4103_v59 = vpop.f32.mrb[78].mxu1 }
 0x5b8   :  { %v4104_v63 = vpop.f32.mrb[79].mxu1 }
 0x5b9   :  { %v4105_v58 = vadd.f32 %v4104_v63, %v4103_v59 }
 0x5bb   :  { %v3482_v33 = vadd.f32 %v4105_v58, %v3838_v11 }
 0x5c7   :  { %v3551_v16 = vpop.f32.mrb[80].mxu1 }
 0x5c8   :  { %v3552_v0 = vadd.f32 %v3551_v16, %v3482_v33  ;;  %v4365_v49 = vpop.f32.mrb[81].mxu1 }
 0x5ca   :  { %v3555_v54 = vmax.f32 %v3552_v0, 0.0 }
 0x5cc   :  { %4381 = vmatmul.mubr.msk.f32.vlgmr.msra.gmra.mrb[82].mxu1 %vm2426_vm2, %v3555_v54 }
 0x69f   :  { %v3642_v26 = vpop.f32.mrb[82].mxu1 }
 0x6a0   :  { %v3643_v43 = vadd.f32 %v3840_v5, %v3642_v26  ;;  %v4382_v13 = vpop.f32.mrb[83].mxu1 }
 0x6a2   :  { %v3647_v30 = vsel %vm3646_vm0, %v3643_v43, -inf }
 0x6a3   :  { %3648 = vmax.xlane.f32.xlu1 %v3647_v30 }
 0x730   :  { %v3649_v7 = vpop.xlane.xlu1 %3648 }
 0x731   :  { %v3650_v14 = vsub.f32 %v3643_v43, %v3649_v7 }
 0x733   :  { %v3651_v20 = vmul.f32 1.442695, %v3650_v14 }
 0x735   :  { %4602 = vpow2.f32 %v3651_v20 }
 0x73f   :  { %v4603_v56 = vpop.eup %4602 }
 0x740   :  { %v3653_v19 = vsel %vm3646_vm0, %v4603_v56, 0.0 }
 0x741   :  { %3654 = vadd.xlane.f32.xlu0 %v3653_v19 }
 0x7ce   :  { %v3655_v12 = vpop.xlane.xlu0 %3654 }
 0x7cf   :  { %4604 = vlog2.f32 %v3655_v12 }
 0x7d9   :  { %v4605_v1 = vpop.eup %4604 }
 0x7da   :  { %v3657_v46 = vmul.f32 0.6931472, %v4605_v1 }
 0x7dc   :  { %v3658_v24 = vadd.f32 %v3657_v46, %v3649_v7 }
 0x7de   :  { %v3659_v17 = vsub.f32 %v3643_v43, %v3658_v24 }
 0x7e0   :  { %3660 = vst.msk [vmem:[#allocation2] sm:$0x3] %vm3646_vm0, %v3659_v17 }
 0x7e1   :  { %4618 = shalt.err (!%p4615_p4)
}
 0x7e2   :  { %s4619_s26 = scalar_lea.hbm %s7665_s9, 32 }
 0x7e3   :  { %p4620_p5 = scmp.ne.s32.totalorder %s7665_s9, %s4619_s26  ;;  %p4623_p6 = scmp.lt.u32.totalorder %s4619_s26, %s7665_s9 }
 0x7e5   :  { %p4625_p7 = pnand %p4623_p6, %p4620_p5 }
 0x7e7   :  { %4628 = shalt.err (!%p4625_p7)
}
 0x7e8   :  { %3670 = dma.vmem_to_hbm [thread:$0]  %s3668_s7, 32, %s7665_s9, [#allocation3]  }
 0x7e9   :  { %4629 = dma.done.wait [#allocation3], 32  }
 0x7ea   :  { %4630 = vsyncadd [#allocation3], 4294967264 }
 0x7eb   :  { %3674 = vsyncpa [#allocation3], 1 }

</bundles_post_ra>
